<compile_context>
chip_gen: v6e
topology: v6e:2x2x1
jax: 0.10.0
libtpu: 0.0.40
codegen_flags: <defaults>
</compile_context>

<pallas_src>
import functools

import jax
import jax.numpy as jnp
import numpy as np
from jax import lax
from jax.experimental import pallas as pl
from jax.experimental.pallas import tpu as pltpu

EPS = 1e-5
_INV_SQRT2 = 0.7071067811865476
LANE = 128


def _round_up(n, m=LANE):
    return ((n + m - 1) // m) * m


def _bf16(x):
    return x.astype(jnp.bfloat16)


def _layernorm(v, gamma, beta, d):
    """LayerNorm over the true hidden dim `d` of a lane-padded activation.

    v: (N, Dp) f32 with lanes >= d exactly zero.  Sum / sum-of-squares statistics are
    unaffected by the zero padding (so no lane mask is needed), and gamma/beta are zero
    in the padded lanes, so padded output lanes stay exactly zero (keeps the residual
    stream lane-clean through the whole block).
    """
    s1 = jnp.sum(v, axis=-1, keepdims=True)
    s2 = jnp.sum(v * v, axis=-1, keepdims=True)
    mu = s1 * (1.0 / d)
    var = s2 * (1.0 / d) - mu * mu
    return (v - mu) * lax.rsqrt(var + EPS) * gamma + beta


def _softmax_lane(s):
    # softmax over the last (lane) axis, f32 in/out; denominator reciprocal on the EUP.
    m = jnp.max(s, axis=-1, keepdims=True)
    e = jnp.exp(s - m)
    return e * pl.reciprocal(jnp.sum(e, axis=-1, keepdims=True), approx=True)


def _gelu_exact(x):
    # PyTorch nn.GELU() default: exact erf formulation (VALU polynomial).  Switch to the
    # tanh approximation (EUP) only if profiling shows VALU as the binding slot.
    return 0.5 * x * (1.0 + lax.erf(x * _INV_SQRT2))


def _attend(q, k, v):
    """Batched attention matching the spec: softmax over the *query* axis (torch dim=1).

    q: (nb, S, Dp), k/v: (nb, Tk, Dp), all f32 with padded lanes zero.
    scoremats[b,t,s] = q[b,t].k[b,s]; softmax over t; ctx[b,t] = sum_s attn[b,t,s] v[b,s].
    Computed transposed (scores_t[b,s,t]) so the softmax reduction runs along lanes.
    """
    scores_t = jnp.einsum("bkd,bqd->bkq", _bf16(k), _bf16(q),
                          preferred_element_type=jnp.float32)            # (nb, Tk, S)
    attn_t = _softmax_lane(scores_t)                                      # softmax over q
    # NOTE: this contraction runs over the sublane axis of both operands (one vxpose);
    # fine at small S/T — revisit if the vector-extended slot saturates at larger seqs.
    return jnp.einsum("bkq,bkd->bqd", _bf16(attn_t), _bf16(v),
                      preferred_element_type=jnp.float32)                 # (nb, S, Dp)


def transformer_block_kernel(
    tok_ref, ctx_ref,
    wqkv_s_ref,                    # fused self-attn QKV: (Dp, 3*Dp) bf16
    wq_c_ref, wkv_c_ref,           # cross-attn: (Dp, Dp) bf16, fused KV (Cp, 2*Dp) bf16
    g1_ref, b1_ref, g2_ref, b2_ref, g3_ref, b3_ref,   # layernorm params (1, Dp) f32
    w1_ref, bias1_ref, w2_ref, bias2_ref,             # FFN (Dp,Hp) bf16,(1,Hp) f32,(Hp,Dp) bf16,(1,Dp) f32
    out_ref,
    *, nb, S, T, D,
):
    Dp = out_ref.shape[-1]
    x = tok_ref[...]               # (nb*S, Dp) f32 tokens, lanes >= D are zero
    ctx = ctx_ref[...]             # (nb*T, Cp) f32 context, lanes >= Cd are zero

    # ---- self attention ----
    h = _layernorm(x, g1_ref[...], b1_ref[...], D)
    qkv = jnp.dot(_bf16(h), wqkv_s_ref[...], preferred_element_type=jnp.float32)   # (nb*S, 3Dp)
    # Slices at multiples of Dp (a multiple of 128) are lane-tile aligned -> free views.
    q = qkv[:, :Dp].reshape(nb, S, Dp)
    k = qkv[:, Dp:2 * Dp].reshape(nb, S, Dp)
    v = qkv[:, 2 * Dp:].reshape(nb, S, Dp)
    x = _attend(q, k, v).reshape(nb * S, Dp) + x

    # ---- cross attention ----
    h = _layernorm(x, g2_ref[...], b2_ref[...], D)
    q = jnp.dot(_bf16(h), wq_c_ref[...], preferred_element_type=jnp.float32).reshape(nb, S, Dp)
    kv = jnp.dot(_bf16(ctx), wkv_c_ref[...], preferred_element_type=jnp.float32)    # (nb*T, 2Dp)
    k = kv[:, :Dp].reshape(nb, T, Dp)
    v = kv[:, Dp:].reshape(nb, T, Dp)
    x = _attend(q, k, v).reshape(nb * S, Dp) + x

    # ---- feed-forward: Linear -> GELU -> Linear -> GELU ----
    h = _layernorm(x, g3_ref[...], b3_ref[...], D)
    y = _gelu_exact(jnp.dot(_bf16(h), w1_ref[...], preferred_element_type=jnp.float32) + bias1_ref[...])
    y = _gelu_exact(jnp.dot(_bf16(y), w2_ref[...], preferred_element_type=jnp.float32) + bias2_ref[...])
    out_ref[...] = y + x


def _choose_batch_block(B, S):
    """Batch elements folded into one grid step.

    The batch is folded into the matmul M dimension, so we want nb*S >= 256 (one full
    256-wide MXU pass on v6e/v7x; >= 128 already fills v5e's MXU).  On v7x (2 TensorCores)
    we additionally try to keep >= 2 grid steps per core so step i+1's token/ctx DMA hides
    under step i's compute.
    """
    try:
        kind = jax.devices()[0].device_kind.lower()
    except Exception:
        kind = ""
    n_cores = 2 if "7" in kind else 1
    divisors = [d for d in range(1, B + 1) if B % d == 0]
    # Smallest fold whose M dimension fills one 256-wide MXU pass; otherwise fold the
    # whole batch into a single step (single-TC chips lose nothing by doing so).
    nb = next((d for d in divisors if d * S >= 256), B)
    if n_cores > 1:
        # Prefer more (pipelined) steps as long as each step still covers >= 128 M rows.
        for d in reversed([d for d in divisors if d < nb]):
            if B // d >= 2 * n_cores and d * S >= 128:
                nb = d
                break
    return nb


def pack_params(params):
    """One-time weight packing (call at init, NOT per forward call):
    pad to 128-lane multiples, fuse QKV / KV, cast matmul weights to bf16."""
    D = params["wq_s"].shape[0]
    Cd = params["wk_c"].shape[0]
    Dp, Cp, Hp = _round_up(D), _round_up(Cd), _round_up(4 * D)

    pad = lambda a, r, c: jnp.pad(a, ((0, r - a.shape[0]), (0, c - a.shape[1])))

    packed = {
        "D": D, "Cd": Cd, "Dp": Dp, "Cp": Cp, "Hp": Hp,
        # self-attn fused QKV (Dp, 3*Dp): each segment is lane-tile aligned
        "wqkv_s": _bf16(jnp.concatenate(
            [pad(params["wq_s"], Dp, Dp),
             pad(params["wk_s"], Dp, Dp),
             pad(params["wv_s"], Dp, Dp)], axis=1)),
        "wq_c": _bf16(pad(params["wq_c"], Dp, Dp)),
        "wkv_c": _bf16(jnp.concatenate(
            [pad(params["wk_c"], Cp, Dp),
             pad(params["wv_c"], Cp, Dp)], axis=1)),
        "w1": _bf16(pad(params["w1"], Dp, Hp)),
        "bias1": pad(params["bias1"], 1, Hp),
        "w2": _bf16(pad(params["w2"], Hp, Dp)),
        "bias2": pad(params["bias2"], 1, Dp),
    }
    for name in ("g1", "b1", "g2", "b2", "g3", "b3"):
        packed[name] = pad(params[name], 1, Dp)   # padded lanes zero (incl. gamma)
    return packed


def transformer_block(x, context, packed, *, batch_block=None):
    """x: (B, S, D) f32 tokens, context: (B, T, Cd) f32. Returns (B, S, D) f32."""
    B, S, D = x.shape
    _, T, Cd = context.shape
    assert packed["D"] == D and packed["Cd"] == Cd
    Dp, Cp = packed["Dp"], packed["Cp"]

    nb = _choose_batch_block(B, S) if batch_block is None else batch_block
    assert B % nb == 0
    grid = (B // nb,)

    # Lane-dense activations: pad the hidden / context dims to the 128-lane boundary.
    tokens = jnp.pad(x, ((0, 0), (0, 0), (0, Dp - D))).reshape(B * S, Dp)
    ctx = jnp.pad(context, ((0, 0), (0, 0), (0, Cp - Cd))).reshape(B * T, Cp)

    weights = [
        packed["wqkv_s"], packed["wq_c"], packed["wkv_c"],
        packed["g1"], packed["b1"], packed["g2"], packed["b2"],
        packed["g3"], packed["b3"],
        packed["w1"], packed["bias1"], packed["w2"], packed["bias2"],
    ]
    # Grid-invariant weights (constant index_map): fetched once, not re-DMAd per step.
    # TODO(synk): at production D (>= ~1k), single-buffer the weight specs / add an FFN
    # N-tiling grid axis and raise vmem_limit_bytes so the block still fits v7x's 64 MiB VMEM.
    def full(a):
        return pl.BlockSpec(a.shape, lambda i: (0,) * a.ndim)
    weight_specs = [full(w) for w in weights]

    kernel = functools.partial(transformer_block_kernel, nb=nb, S=S, T=T, D=D)

    out = pl.pallas_call(
        kernel,
        out_shape=jax.ShapeDtypeStruct((B * S, Dp), jnp.float32),
        grid_spec=pltpu.PrefetchScalarGridSpec(
            num_scalar_prefetch=0,
            grid=grid,
            in_specs=[
                pl.BlockSpec((nb * S, Dp), lambda i: (i, 0)),
                pl.BlockSpec((nb * T, Cp), lambda i: (i, 0)),
            ] + weight_specs,
            out_specs=pl.BlockSpec((nb * S, Dp), lambda i: (i, 0)),
        ),
        compiler_params=pltpu.CompilerParams(dimension_semantics=("parallel",)),
    )(tokens, ctx, *weights)

    return out[:, :D].reshape(B, S, D)


def make_params(key, hidden_dim, context_dim):
    D, Cd = hidden_dim, context_dim
    ks = jax.random.split(key, 16)
    init = lambda k, shp: (0.05 * jax.random.normal(k, shp)).astype(jnp.float32)
    return {
        # self-attention (embed_dim = hidden_dim), weights stored (in, out)
        "wq_s": init(ks[0], (D, D)),
        "wk_s": init(ks[1], (D, D)),
        "wv_s": init(ks[2], (D, D)),
        # cross-attention
        "wq_c": init(ks[3], (D, D)),
        "wk_c": init(ks[4], (Cd, D)),
        "wv_c": init(ks[5], (Cd, D)),
        # layernorms (perturbed so the affine path is exercised)
        "g1": (1.0 + 0.1 * jax.random.normal(ks[10], (1, D))).astype(jnp.float32),
        "b1": init(ks[11], (1, D)),
        "g2": (1.0 + 0.1 * jax.random.normal(ks[12], (1, D))).astype(jnp.float32),
        "b2": init(ks[13], (1, D)),
        "g3": (1.0 + 0.1 * jax.random.normal(ks[14], (1, D))).astype(jnp.float32),
        "b3": init(ks[15], (1, D)),
        # FFN
        "w1": init(ks[6], (D, 4 * D)), "bias1": init(ks[7], (1, 4 * D)),
        "w2": init(ks[8], (4 * D, D)), "bias2": init(ks[9], (1, D)),
    }


def reference(x, context, params):
    """Pure-JAX f32 reference mirroring the PyTorch TransformerBlock exactly."""
    def ln(v, g, b):
        mu = jnp.mean(v, -1, keepdims=True)
        var = jnp.mean((v - mu) ** 2, -1, keepdims=True)
        return (v - mu) / jnp.sqrt(var + EPS) * g + b

    def attn(tok, ctx, wq, wk, wv):
        Q, K, V = tok @ wq, ctx @ wk, ctx @ wv
        s = jnp.einsum("bth,bsh->bts", Q, K)
        a = jax.nn.softmax(s, axis=1)
        return jnp.einsum("bts,bsh->bth", a, V)

    p = params
    t = x
    h = ln(t, p["g1"], p["b1"])
    t = attn(h, h, p["wq_s"], p["wk_s"], p["wv_s"]) + t
    h = ln(t, p["g2"], p["b2"])
    t = attn(h, context, p["wq_c"], p["wk_c"], p["wv_c"]) + t
    h = ln(t, p["g3"], p["b3"])
    gelu = functools.partial(jax.nn.gelu, approximate=False)
    y = gelu(gelu(h @ p["w1"] + p["bias1"]) @ p["w2"] + p["bias2"])
    return y + t


if __name__ == "__main__":
    B, S, D = 2, 64, 32           # batch=2, 64 tokens, hidden_dim=32
    T, CTX_DIM = 8, 16            # context: 8 tokens of dim 16

    key = jax.random.PRNGKey(0)
    k_x, k_ctx, k_p = jax.random.split(key, 3)
    x = jax.random.normal(k_x, (B, S, D), dtype=jnp.float32)
    context = jax.random.normal(k_ctx, (B, T, CTX_DIM), dtype=jnp.float32)
    params = make_params(k_p, D, CTX_DIM)

    packed = pack_params(params)   # one-time fuse/pad/bf16-cast, NOT per forward call

    out = jax.block_until_ready(transformer_block(x, context, packed))
    ref = jax.block_until_ready(reference(x, context, params))

    assert out.shape == (B, S, D) and out.dtype == jnp.float32
    # bf16 MXU operands with f32 accumulation -> bf16-level tolerance vs f32 reference.
    np.testing.assert_allclose(np.asarray(out), np.asarray(ref), rtol=2e-2, atol=2e-2)

    print("KERNEL_OK")
</pallas_src>

<mosaic_0001>
module attributes {stable_mosaic.version = 11 : i64} {
  func.func @transformer_block_kernel(%arg0: i32, %arg1: memref<128x128xf32, #tpu.memory_space<vmem>>, %arg2: memref<16x128xf32, #tpu.memory_space<vmem>>, %arg3: memref<128x384xbf16, #tpu.memory_space<vmem>>, %arg4: memref<128x128xbf16, #tpu.memory_space<vmem>>, %arg5: memref<128x256xbf16, #tpu.memory_space<vmem>>, %arg6: memref<1x128xf32, #tpu.memory_space<vmem>>, %arg7: memref<1x128xf32, #tpu.memory_space<vmem>>, %arg8: memref<1x128xf32, #tpu.memory_space<vmem>>, %arg9: memref<1x128xf32, #tpu.memory_space<vmem>>, %arg10: memref<1x128xf32, #tpu.memory_space<vmem>>, %arg11: memref<1x128xf32, #tpu.memory_space<vmem>>, %arg12: memref<128x128xbf16, #tpu.memory_space<vmem>>, %arg13: memref<1x128xf32, #tpu.memory_space<vmem>>, %arg14: memref<128x128xbf16, #tpu.memory_space<vmem>>, %arg15: memref<1x128xf32, #tpu.memory_space<vmem>>, %arg16: memref<128x128xf32, #tpu.memory_space<vmem>>) attributes {dimension_semantics = [#tpu.dimension_semantics<parallel>], iteration_bounds = array<i64: 1>, scalar_prefetch = 0 : i64, scratch_operands = 0 : i64, tpu.core_type = #tpu.core_type<tc>, window_params = [{transform_indices = @transform_0, window_bounds = array<i64: 128, 128>}, {transform_indices = @transform_1, window_bounds = array<i64: 16, 128>}, {pipeline_mode = #tpu.pipeline_mode<synchronous>, transform_indices = @transform_2, window_bounds = array<i64: 128, 384>}, {pipeline_mode = #tpu.pipeline_mode<synchronous>, transform_indices = @transform_3, window_bounds = array<i64: 128, 128>}, {pipeline_mode = #tpu.pipeline_mode<synchronous>, transform_indices = @transform_4, window_bounds = array<i64: 128, 256>}, {pipeline_mode = #tpu.pipeline_mode<synchronous>, transform_indices = @transform_5, window_bounds = array<i64: 1, 128>}, {pipeline_mode = #tpu.pipeline_mode<synchronous>, transform_indices = @transform_6, window_bounds = array<i64: 1, 128>}, {pipeline_mode = #tpu.pipeline_mode<synchronous>, transform_indices = @transform_7, window_bounds = array<i64: 1, 128>}, {pipeline_mode = #tpu.pipeline_mode<synchronous>, transform_indices = @transform_8, window_bounds = array<i64: 1, 128>}, {pipeline_mode = #tpu.pipeline_mode<synchronous>, transform_indices = @transform_9, window_bounds = array<i64: 1, 128>}, {pipeline_mode = #tpu.pipeline_mode<synchronous>, transform_indices = @transform_10, window_bounds = array<i64: 1, 128>}, {pipeline_mode = #tpu.pipeline_mode<synchronous>, transform_indices = @transform_11, window_bounds = array<i64: 128, 128>}, {pipeline_mode = #tpu.pipeline_mode<synchronous>, transform_indices = @transform_12, window_bounds = array<i64: 1, 128>}, {pipeline_mode = #tpu.pipeline_mode<synchronous>, transform_indices = @transform_13, window_bounds = array<i64: 128, 128>}, {pipeline_mode = #tpu.pipeline_mode<synchronous>, transform_indices = @transform_14, window_bounds = array<i64: 1, 128>}, {transform_indices = @transform_15, window_bounds = array<i64: 128, 128>}]} {
    %c0 = arith.constant 0 : index
    %c0_0 = arith.constant 0 : index
    %0 = vector.load %arg1[%c0, %c0_0] : memref<128x128xf32, #tpu.memory_space<vmem>>, vector<128x128xf32>
    %c0_1 = arith.constant 0 : index
    %c0_2 = arith.constant 0 : index
    %1 = vector.load %arg2[%c0_1, %c0_2] : memref<16x128xf32, #tpu.memory_space<vmem>>, vector<16x128xf32>
    %c0_3 = arith.constant 0 : index
    %c0_4 = arith.constant 0 : index
    %2 = vector.load %arg6[%c0_3, %c0_4] : memref<1x128xf32, #tpu.memory_space<vmem>>, vector<1x128xf32>
    %c0_5 = arith.constant 0 : index
    %c0_6 = arith.constant 0 : index
    %3 = vector.load %arg7[%c0_5, %c0_6] : memref<1x128xf32, #tpu.memory_space<vmem>>, vector<1x128xf32>
    %cst = arith.constant dense<0.000000e+00> : vector<128xf32>
    %4 = vector.multi_reduction <add>, %0, %cst [1] : vector<128x128xf32> to vector<128xf32>
    %5 = vector.shape_cast %4 : vector<128xf32> to vector<128x1xf32>
    %6 = arith.mulf %0, %0 : vector<128x128xf32>
    %cst_7 = arith.constant dense<0.000000e+00> : vector<128xf32>
    %7 = vector.multi_reduction <add>, %6, %cst_7 [1] : vector<128x128xf32> to vector<128xf32>
    %8 = vector.shape_cast %7 : vector<128xf32> to vector<128x1xf32>
    %cst_8 = arith.constant 3.125000e-02 : f32
    %9 = vector.broadcast %cst_8 : f32 to vector<128x1xf32>
    %10 = arith.mulf %5, %9 : vector<128x1xf32>
    %cst_9 = arith.constant 3.125000e-02 : f32
    %11 = vector.broadcast %cst_9 : f32 to vector<128x1xf32>
    %12 = arith.mulf %8, %11 : vector<128x1xf32>
    %13 = arith.mulf %10, %10 : vector<128x1xf32>
    %14 = arith.subf %12, %13 : vector<128x1xf32>
    %15 = vector.broadcast %10 : vector<128x1xf32> to vector<128x128xf32>
    %16 = arith.subf %0, %15 : vector<128x128xf32>
    %cst_10 = arith.constant 9.99999974E-6 : f32
    %17 = vector.broadcast %cst_10 : f32 to vector<128x1xf32>
    %18 = arith.addf %14, %17 : vector<128x1xf32>
    %19 = math.rsqrt %18 : vector<128x1xf32>
    %20 = vector.broadcast %19 : vector<128x1xf32> to vector<128x128xf32>
    %21 = arith.mulf %16, %20 : vector<128x128xf32>
    %22 = vector.broadcast %2 : vector<1x128xf32> to vector<128x128xf32>
    %23 = arith.mulf %21, %22 : vector<128x128xf32>
    %24 = vector.broadcast %3 : vector<1x128xf32> to vector<128x128xf32>
    %25 = arith.addf %23, %24 : vector<128x128xf32>
    %26 = arith.truncf %25 : vector<128x128xf32> to vector<128x128xbf16>
    %c0_11 = arith.constant 0 : index
    %c0_12 = arith.constant 0 : index
    %27 = vector.load %arg3[%c0_11, %c0_12] : memref<128x384xbf16, #tpu.memory_space<vmem>>, vector<128x384xbf16>
    %cst_13 = arith.constant dense<0.000000e+00> : vector<128x384xf32>
    %28 = tpu.matmul %26, %27, %cst_13 {dimension_numbers = #tpu.dot_dimension_numbers<[1], [0], [0], [1], [0, 0, 1, 1], [], []>} : vector<128x128xbf16>, vector<128x384xbf16>, vector<128x384xf32> -> vector<128x384xf32>
    %29 = vector.extract_strided_slice %28 {offsets = [0, 0], sizes = [128, 128], strides = [1, 1]} : vector<128x384xf32> to vector<128x128xf32>
    %30 = vector.shape_cast %29 : vector<128x128xf32> to vector<2x64x128xf32>
    %31 = vector.extract_strided_slice %28 {offsets = [0, 128], sizes = [128, 128], strides = [1, 1]} : vector<128x384xf32> to vector<128x128xf32>
    %32 = vector.shape_cast %31 : vector<128x128xf32> to vector<2x64x128xf32>
    %33 = vector.extract_strided_slice %28 {offsets = [0, 256], sizes = [128, 128], strides = [1, 1]} : vector<128x384xf32> to vector<128x128xf32>
    %34 = vector.shape_cast %33 : vector<128x128xf32> to vector<2x64x128xf32>
    %35 = arith.truncf %32 : vector<2x64x128xf32> to vector<2x64x128xbf16>
    %36 = arith.truncf %30 : vector<2x64x128xf32> to vector<2x64x128xbf16>
    "tpu.trace_start"() <{level = 10 : i32, message = "bkd,bqd->bkq"}> : () -> ()
    %cst_14 = arith.constant dense<0.000000e+00> : vector<2x64x64xf32>
    %37 = tpu.matmul %35, %36, %cst_14 {dimension_numbers = #tpu.dot_dimension_numbers<[2], [2], [1], [1], [0, 0, 0, 1, 1, 1], [0], [0]>} : vector<2x64x128xbf16>, vector<2x64x128xbf16>, vector<2x64x64xf32> -> vector<2x64x64xf32>
    "tpu.trace_stop"() : () -> ()
    %cst_15 = arith.constant dense<0xFF800000> : vector<2x64xf32>
    %38 = vector.multi_reduction <maximumf>, %37, %cst_15 [2] : vector<2x64x64xf32> to vector<2x64xf32>
    %39 = vector.shape_cast %38 : vector<2x64xf32> to vector<2x64x1xf32>
    %40 = vector.broadcast %39 : vector<2x64x1xf32> to vector<2x64x64xf32>
    %41 = arith.subf %37, %40 : vector<2x64x64xf32>
    %42 = math.exp %41 : vector<2x64x64xf32>
    %cst_16 = arith.constant dense<0.000000e+00> : vector<2x64xf32>
    %43 = vector.multi_reduction <add>, %42, %cst_16 [2] : vector<2x64x64xf32> to vector<2x64xf32>
    %44 = vector.shape_cast %43 : vector<2x64xf32> to vector<2x64x1xf32>
    %45 = tpu.reciprocal %44 {approx = true} : vector<2x64x1xf32> -> vector<2x64x1xf32>
    %46 = vector.broadcast %45 : vector<2x64x1xf32> to vector<2x64x64xf32>
    %47 = arith.mulf %42, %46 : vector<2x64x64xf32>
    %48 = arith.truncf %47 : vector<2x64x64xf32> to vector<2x64x64xbf16>
    %49 = arith.truncf %34 : vector<2x64x128xf32> to vector<2x64x128xbf16>
    "tpu.trace_start"() <{level = 10 : i32, message = "bkq,bkd->bqd"}> : () -> ()
    %cst_17 = arith.constant dense<0.000000e+00> : vector<2x64x128xf32>
    %50 = tpu.matmul %48, %49, %cst_17 {dimension_numbers = #tpu.dot_dimension_numbers<[1], [1], [2], [2], [0, 0, 0, 2, 1, 2], [0], [0]>} : vector<2x64x64xbf16>, vector<2x64x128xbf16>, vector<2x64x128xf32> -> vector<2x64x128xf32>
    "tpu.trace_stop"() : () -> ()
    %51 = vector.shape_cast %50 : vector<2x64x128xf32> to vector<128x128xf32>
    %52 = arith.addf %51, %0 : vector<128x128xf32>
    %c0_18 = arith.constant 0 : index
    %c0_19 = arith.constant 0 : index
    %53 = vector.load %arg8[%c0_18, %c0_19] : memref<1x128xf32, #tpu.memory_space<vmem>>, vector<1x128xf32>
    %c0_20 = arith.constant 0 : index
    %c0_21 = arith.constant 0 : index
    %54 = vector.load %arg9[%c0_20, %c0_21] : memref<1x128xf32, #tpu.memory_space<vmem>>, vector<1x128xf32>
    %cst_22 = arith.constant dense<0.000000e+00> : vector<128xf32>
    %55 = vector.multi_reduction <add>, %52, %cst_22 [1] : vector<128x128xf32> to vector<128xf32>
    %56 = vector.shape_cast %55 : vector<128xf32> to vector<128x1xf32>
    %57 = arith.mulf %52, %52 : vector<128x128xf32>
    %cst_23 = arith.constant dense<0.000000e+00> : vector<128xf32>
    %58 = vector.multi_reduction <add>, %57, %cst_23 [1] : vector<128x128xf32> to vector<128xf32>
    %59 = vector.shape_cast %58 : vector<128xf32> to vector<128x1xf32>
    %cst_24 = arith.constant 3.125000e-02 : f32
    %60 = vector.broadcast %cst_24 : f32 to vector<128x1xf32>
    %61 = arith.mulf %56, %60 : vector<128x1xf32>
    %cst_25 = arith.constant 3.125000e-02 : f32
    %62 = vector.broadcast %cst_25 : f32 to vector<128x1xf32>
    %63 = arith.mulf %59, %62 : vector<128x1xf32>
    %64 = arith.mulf %61, %61 : vector<128x1xf32>
    %65 = arith.subf %63, %64 : vector<128x1xf32>
    %66 = vector.broadcast %61 : vector<128x1xf32> to vector<128x128xf32>
    %67 = arith.subf %52, %66 : vector<128x128xf32>
    %cst_26 = arith.constant 9.99999974E-6 : f32
    %68 = vector.broadcast %cst_26 : f32 to vector<128x1xf32>
    %69 = arith.addf %65, %68 : vector<128x1xf32>
    %70 = math.rsqrt %69 : vector<128x1xf32>
    %71 = vector.broadcast %70 : vector<128x1xf32> to vector<128x128xf32>
    %72 = arith.mulf %67, %71 : vector<128x128xf32>
    %73 = vector.broadcast %53 : vector<1x128xf32> to vector<128x128xf32>
    %74 = arith.mulf %72, %73 : vector<128x128xf32>
    %75 = vector.broadcast %54 : vector<1x128xf32> to vector<128x128xf32>
    %76 = arith.addf %74, %75 : vector<128x128xf32>
    %77 = arith.truncf %76 : vector<128x128xf32> to vector<128x128xbf16>
    %c0_27 = arith.constant 0 : index
    %c0_28 = arith.constant 0 : index
    %78 = vector.load %arg4[%c0_27, %c0_28] : memref<128x128xbf16, #tpu.memory_space<vmem>>, vector<128x128xbf16>
    %cst_29 = arith.constant dense<0.000000e+00> : vector<128x128xf32>
    %79 = tpu.matmul %77, %78, %cst_29 {dimension_numbers = #tpu.dot_dimension_numbers<[1], [0], [0], [1], [0, 0, 1, 1], [], []>} : vector<128x128xbf16>, vector<128x128xbf16>, vector<128x128xf32> -> vector<128x128xf32>
    %80 = vector.shape_cast %79 : vector<128x128xf32> to vector<2x64x128xf32>
    %81 = arith.truncf %1 : vector<16x128xf32> to vector<16x128xbf16>
    %c0_30 = arith.constant 0 : index
    %c0_31 = arith.constant 0 : index
    %82 = vector.load %arg5[%c0_30, %c0_31] : memref<128x256xbf16, #tpu.memory_space<vmem>>, vector<128x256xbf16>
    %cst_32 = arith.constant dense<0.000000e+00> : vector<16x256xf32>
    %83 = tpu.matmul %81, %82, %cst_32 {dimension_numbers = #tpu.dot_dimension_numbers<[1], [0], [0], [1], [0, 0, 1, 1], [], []>} : vector<16x128xbf16>, vector<128x256xbf16>, vector<16x256xf32> -> vector<16x256xf32>
    %84 = vector.extract_strided_slice %83 {offsets = [0, 0], sizes = [16, 128], strides = [1, 1]} : vector<16x256xf32> to vector<16x128xf32>
    %85 = vector.shape_cast %84 : vector<16x128xf32> to vector<2x8x128xf32>
    %86 = vector.extract_strided_slice %83 {offsets = [0, 128], sizes = [16, 128], strides = [1, 1]} : vector<16x256xf32> to vector<16x128xf32>
    %87 = vector.shape_cast %86 : vector<16x128xf32> to vector<2x8x128xf32>
    %88 = arith.truncf %85 : vector<2x8x128xf32> to vector<2x8x128xbf16>
    %89 = arith.truncf %80 : vector<2x64x128xf32> to vector<2x64x128xbf16>
    "tpu.trace_start"() <{level = 10 : i32, message = "bkd,bqd->bkq"}> : () -> ()
    %cst_33 = arith.constant dense<0.000000e+00> : vector<2x8x64xf32>
    %90 = tpu.matmul %88, %89, %cst_33 {dimension_numbers = #tpu.dot_dimension_numbers<[2], [2], [1], [1], [0, 0, 0, 1, 1, 1], [0], [0]>} : vector<2x8x128xbf16>, vector<2x64x128xbf16>, vector<2x8x64xf32> -> vector<2x8x64xf32>
    "tpu.trace_stop"() : () -> ()
    %cst_34 = arith.constant dense<0xFF800000> : vector<2x8xf32>
    %91 = vector.multi_reduction <maximumf>, %90, %cst_34 [2] : vector<2x8x64xf32> to vector<2x8xf32>
    %92 = vector.shape_cast %91 : vector<2x8xf32> to vector<2x8x1xf32>
    %93 = vector.broadcast %92 : vector<2x8x1xf32> to vector<2x8x64xf32>
    %94 = arith.subf %90, %93 : vector<2x8x64xf32>
    %95 = math.exp %94 : vector<2x8x64xf32>
    %cst_35 = arith.constant dense<0.000000e+00> : vector<2x8xf32>
    %96 = vector.multi_reduction <add>, %95, %cst_35 [2] : vector<2x8x64xf32> to vector<2x8xf32>
    %97 = vector.shape_cast %96 : vector<2x8xf32> to vector<2x8x1xf32>
    %98 = tpu.reciprocal %97 {approx = true} : vector<2x8x1xf32> -> vector<2x8x1xf32>
    %99 = vector.broadcast %98 : vector<2x8x1xf32> to vector<2x8x64xf32>
    %100 = arith.mulf %95, %99 : vector<2x8x64xf32>
    %101 = arith.truncf %100 : vector<2x8x64xf32> to vector<2x8x64xbf16>
    %102 = arith.truncf %87 : vector<2x8x128xf32> to vector<2x8x128xbf16>
    "tpu.trace_start"() <{level = 10 : i32, message = "bkq,bkd->bqd"}> : () -> ()
    %cst_36 = arith.constant dense<0.000000e+00> : vector<2x64x128xf32>
    %103 = tpu.matmul %101, %102, %cst_36 {dimension_numbers = #tpu.dot_dimension_numbers<[1], [1], [2], [2], [0, 0, 0, 2, 1, 2], [0], [0]>} : vector<2x8x64xbf16>, vector<2x8x128xbf16>, vector<2x64x128xf32> -> vector<2x64x128xf32>
    "tpu.trace_stop"() : () -> ()
    %104 = vector.shape_cast %103 : vector<2x64x128xf32> to vector<128x128xf32>
    %105 = arith.addf %104, %52 : vector<128x128xf32>
    %c0_37 = arith.constant 0 : index
    %c0_38 = arith.constant 0 : index
    %106 = vector.load %arg10[%c0_37, %c0_38] : memref<1x128xf32, #tpu.memory_space<vmem>>, vector<1x128xf32>
    %c0_39 = arith.constant 0 : index
    %c0_40 = arith.constant 0 : index
    %107 = vector.load %arg11[%c0_39, %c0_40] : memref<1x128xf32, #tpu.memory_space<vmem>>, vector<1x128xf32>
    %cst_41 = arith.constant dense<0.000000e+00> : vector<128xf32>
    %108 = vector.multi_reduction <add>, %105, %cst_41 [1] : vector<128x128xf32> to vector<128xf32>
    %109 = vector.shape_cast %108 : vector<128xf32> to vector<128x1xf32>
    %110 = arith.mulf %105, %105 : vector<128x128xf32>
    %cst_42 = arith.constant dense<0.000000e+00> : vector<128xf32>
    %111 = vector.multi_reduction <add>, %110, %cst_42 [1] : vector<128x128xf32> to vector<128xf32>
    %112 = vector.shape_cast %111 : vector<128xf32> to vector<128x1xf32>
    %cst_43 = arith.constant 3.125000e-02 : f32
    %113 = vector.broadcast %cst_43 : f32 to vector<128x1xf32>
    %114 = arith.mulf %109, %113 : vector<128x1xf32>
    %cst_44 = arith.constant 3.125000e-02 : f32
    %115 = vector.broadcast %cst_44 : f32 to vector<128x1xf32>
    %116 = arith.mulf %112, %115 : vector<128x1xf32>
    %117 = arith.mulf %114, %114 : vector<128x1xf32>
    %118 = arith.subf %116, %117 : vector<128x1xf32>
    %119 = vector.broadcast %114 : vector<128x1xf32> to vector<128x128xf32>
    %120 = arith.subf %105, %119 : vector<128x128xf32>
    %cst_45 = arith.constant 9.99999974E-6 : f32
    %121 = vector.broadcast %cst_45 : f32 to vector<128x1xf32>
    %122 = arith.addf %118, %121 : vector<128x1xf32>
    %123 = math.rsqrt %122 : vector<128x1xf32>
    %124 = vector.broadcast %123 : vector<128x1xf32> to vector<128x128xf32>
    %125 = arith.mulf %120, %124 : vector<128x128xf32>
    %126 = vector.broadcast %106 : vector<1x128xf32> to vector<128x128xf32>
    %127 = arith.mulf %125, %126 : vector<128x128xf32>
    %128 = vector.broadcast %107 : vector<1x128xf32> to vector<128x128xf32>
    %129 = arith.addf %127, %128 : vector<128x128xf32>
    %130 = arith.truncf %129 : vector<128x128xf32> to vector<128x128xbf16>
    %c0_46 = arith.constant 0 : index
    %c0_47 = arith.constant 0 : index
    %131 = vector.load %arg12[%c0_46, %c0_47] : memref<128x128xbf16, #tpu.memory_space<vmem>>, vector<128x128xbf16>
    %cst_48 = arith.constant dense<0.000000e+00> : vector<128x128xf32>
    %132 = tpu.matmul %130, %131, %cst_48 {dimension_numbers = #tpu.dot_dimension_numbers<[1], [0], [0], [1], [0, 0, 1, 1], [], []>} : vector<128x128xbf16>, vector<128x128xbf16>, vector<128x128xf32> -> vector<128x128xf32>
    %c0_49 = arith.constant 0 : index
    %c0_50 = arith.constant 0 : index
    %133 = vector.load %arg13[%c0_49, %c0_50] : memref<1x128xf32, #tpu.memory_space<vmem>>, vector<1x128xf32>
    %134 = vector.broadcast %133 : vector<1x128xf32> to vector<128x128xf32>
    %135 = arith.addf %132, %134 : vector<128x128xf32>
    %cst_51 = arith.constant 5.000000e-01 : f32
    %136 = vector.broadcast %cst_51 : f32 to vector<128x128xf32>
    %137 = arith.mulf %136, %135 : vector<128x128xf32>
    %cst_52 = arith.constant 0.707106769 : f32
    %138 = vector.broadcast %cst_52 : f32 to vector<128x128xf32>
    %139 = arith.mulf %135, %138 : vector<128x128xf32>
    %140 = math.erf %139 : vector<128x128xf32>
    %cst_53 = arith.constant 1.000000e+00 : f32
    %141 = vector.broadcast %cst_53 : f32 to vector<128x128xf32>
    %142 = arith.addf %141, %140 : vector<128x128xf32>
    %143 = arith.mulf %137, %142 : vector<128x128xf32>
    %144 = arith.truncf %143 : vector<128x128xf32> to vector<128x128xbf16>
    %c0_54 = arith.constant 0 : index
    %c0_55 = arith.constant 0 : index
    %145 = vector.load %arg14[%c0_54, %c0_55] : memref<128x128xbf16, #tpu.memory_space<vmem>>, vector<128x128xbf16>
    %cst_56 = arith.constant dense<0.000000e+00> : vector<128x128xf32>
    %146 = tpu.matmul %144, %145, %cst_56 {dimension_numbers = #tpu.dot_dimension_numbers<[1], [0], [0], [1], [0, 0, 1, 1], [], []>} : vector<128x128xbf16>, vector<128x128xbf16>, vector<128x128xf32> -> vector<128x128xf32>
    %c0_57 = arith.constant 0 : index
    %c0_58 = arith.constant 0 : index
    %147 = vector.load %arg15[%c0_57, %c0_58] : memref<1x128xf32, #tpu.memory_space<vmem>>, vector<1x128xf32>
    %148 = vector.broadcast %147 : vector<1x128xf32> to vector<128x128xf32>
    %149 = arith.addf %146, %148 : vector<128x128xf32>
    %cst_59 = arith.constant 5.000000e-01 : f32
    %150 = vector.broadcast %cst_59 : f32 to vector<128x128xf32>
    %151 = arith.mulf %150, %149 : vector<128x128xf32>
    %cst_60 = arith.constant 0.707106769 : f32
    %152 = vector.broadcast %cst_60 : f32 to vector<128x128xf32>
    %153 = arith.mulf %149, %152 : vector<128x128xf32>
    %154 = math.erf %153 : vector<128x128xf32>
    %cst_61 = arith.constant 1.000000e+00 : f32
    %155 = vector.broadcast %cst_61 : f32 to vector<128x128xf32>
    %156 = arith.addf %155, %154 : vector<128x128xf32>
    %157 = arith.mulf %151, %156 : vector<128x128xf32>
    %158 = arith.addf %157, %105 : vector<128x128xf32>
    %c0_62 = arith.constant 0 : index
    %c0_63 = arith.constant 0 : index
    %159 = vector.load %arg16[%c0_62, %c0_63] : memref<128x128xf32, #tpu.memory_space<vmem>>, vector<128x128xf32>
    tpu.vector_store %arg16[%c0_62, %c0_63], %158 {strides = array<i32>} : memref<128x128xf32, #tpu.memory_space<vmem>>, vector<128x128xf32>,
    return
  }
  func.func @transform_0(%arg0: i32) -> (i32, i32) {
    %c0_i32 = arith.constant 0 : i32
    %c0_i32_0 = arith.constant 0 : i32
    return %arg0, %c0_i32 : i32, i32
  }
  func.func @transform_1(%arg0: i32) -> (i32, i32) {
    %c0_i32 = arith.constant 0 : i32
    %c0_i32_0 = arith.constant 0 : i32
    return %arg0, %c0_i32 : i32, i32
  }
  func.func @transform_2(%arg0: i32) -> (i32, i32) {
    %c0_i32 = arith.constant 0 : i32
    %c0_i32_0 = arith.constant 0 : i32
    %c0_i32_1 = arith.constant 0 : i32
    return %c0_i32, %c0_i32_0 : i32, i32
  }
  func.func @transform_3(%arg0: i32) -> (i32, i32) {
    %c0_i32 = arith.constant 0 : i32
    %c0_i32_0 = arith.constant 0 : i32
    %c0_i32_1 = arith.constant 0 : i32
    return %c0_i32, %c0_i32_0 : i32, i32
  }
  func.func @transform_4(%arg0: i32) -> (i32, i32) {
    %c0_i32 = arith.constant 0 : i32
    %c0_i32_0 = arith.constant 0 : i32
    %c0_i32_1 = arith.constant 0 : i32
    return %c0_i32, %c0_i32_0 : i32, i32
  }
  func.func @transform_5(%arg0: i32) -> (i32, i32) {
    %c0_i32 = arith.constant 0 : i32
    %c0_i32_0 = arith.constant 0 : i32
    %c0_i32_1 = arith.constant 0 : i32
    return %c0_i32, %c0_i32_0 : i32, i32
  }
  func.func @transform_6(%arg0: i32) -> (i32, i32) {
    %c0_i32 = arith.constant 0 : i32
    %c0_i32_0 = arith.constant 0 : i32
    %c0_i32_1 = arith.constant 0 : i32
    return %c0_i32, %c0_i32_0 : i32, i32
  }
  func.func @transform_7(%arg0: i32) -> (i32, i32) {
    %c0_i32 = arith.constant 0 : i32
    %c0_i32_0 = arith.constant 0 : i32
    %c0_i32_1 = arith.constant 0 : i32
    return %c0_i32, %c0_i32_0 : i32, i32
  }
  func.func @transform_8(%arg0: i32) -> (i32, i32) {
    %c0_i32 = arith.constant 0 : i32
    %c0_i32_0 = arith.constant 0 : i32
    %c0_i32_1 = arith.constant 0 : i32
    return %c0_i32, %c0_i32_0 : i32, i32
  }
  func.func @transform_9(%arg0: i32) -> (i32, i32) {
    %c0_i32 = arith.constant 0 : i32
    %c0_i32_0 = arith.constant 0 : i32
    %c0_i32_1 = arith.constant 0 : i32
    return %c0_i32, %c0_i32_0 : i32, i32
  }
  func.func @transform_10(%arg0: i32) -> (i32, i32) {
    %c0_i32 = arith.constant 0 : i32
    %c0_i32_0 = arith.constant 0 : i32
    %c0_i32_1 = arith.constant 0 : i32
    return %c0_i32, %c0_i32_0 : i32, i32
  }
  func.func @transform_11(%arg0: i32) -> (i32, i32) {
    %c0_i32 = arith.constant 0 : i32
    %c0_i32_0 = arith.constant 0 : i32
    %c0_i32_1 = arith.constant 0 : i32
    return %c0_i32, %c0_i32_0 : i32, i32
  }
  func.func @transform_12(%arg0: i32) -> (i32, i32) {
    %c0_i32 = arith.constant 0 : i32
    %c0_i32_0 = arith.constant 0 : i32
    %c0_i32_1 = arith.constant 0 : i32
    return %c0_i32, %c0_i32_0 : i32, i32
  }
  func.func @transform_13(%arg0: i32) -> (i32, i32) {
    %c0_i32 = arith.constant 0 : i32
    %c0_i32_0 = arith.constant 0 : i32
    %c0_i32_1 = arith.constant 0 : i32
    return %c0_i32, %c0_i32_0 : i32, i32
  }
  func.func @transform_14(%arg0: i32) -> (i32, i32) {
    %c0_i32 = arith.constant 0 : i32
    %c0_i32_0 = arith.constant 0 : i32
    %c0_i32_1 = arith.constant 0 : i32
    return %c0_i32, %c0_i32_0 : i32, i32
  }
  func.func @transform_15(%arg0: i32) -> (i32, i32) {
    %c0_i32 = arith.constant 0 : i32
    %c0_i32_0 = arith.constant 0 : i32
    return %arg0, %c0_i32 : i32, i32
  }
}

</mosaic_0001>

<bundles_post_ra>
// kernel: tpu_custom_call.1
= control target key start
LH: loop header
LB: loop body
LE: loop exit
PB: predicated region body
PF: predicated region fallthrough
CT: control target
= control target key end

     0   :  { %20 = vsyncpa [#allocation3], 0  ;;  %s5032_s0 = inlined_call_operand.hbm [shape: f32[128,128], index: 0, kind: input, shape index: {}]   ;;  %s5033_s1 = inlined_call_operand.hbm [shape: f32[16,128], index: 1, kind: input, shape index: {}]   ;;  %s5034_s2 = inlined_call_operand.hbm [shape: bf16[128,384], index: 2, kind: input, shape index: {}]   ;;  %s5035_s3 = inlined_call_operand.hbm [shape: bf16[128,128], index: 3, kind: input, shape index: {}]   ;;  %s5036_s4 = inlined_call_operand.hbm [shape: bf16[128,256], index: 4, kind: input, shape index: {}]   ;;  %s5037_s5 = inlined_call_operand.vmem [shape: f32[1,128], index: 5, kind: input, shape index: {}]   ;;  %s5038_s6 = inlined_call_operand.vmem [shape: f32[1,128], index: 6, kind: input, shape index: {}]   ;;  %s5039_s7 = inlined_call_operand.vmem [shape: f32[1,128], index: 7, kind: input, shape index: {}]   ;;  %s5040_s8 = inlined_call_operand.vmem [shape: f32[1,128], index: 8, kind: input, shape index: {}]   ;;  %s5041_s9 = inlined_call_operand.vmem [shape: f32[1,128], index: 9, kind: input, shape index: {}]   ;;  %s5042_s10 = inlined_call_operand.vmem [shape: f32[1,128], index: 10, kind: input, shape index: {}]   ;;  %s5043_s11 = inlined_call_operand.hbm [shape: bf16[128,128], index: 11, kind: input, shape index: {}]   ;;  %s5044_s12 = inlined_call_operand.vmem [shape: f32[1,128], index: 12, kind: input, shape index: {}]   ;;  %s5045_s13 = inlined_call_operand.hbm [shape: bf16[128,128], index: 13, kind: input, shape index: {}]   ;;  %s5046_s14 = inlined_call_operand.vmem [shape: f32[1,128], index: 14, kind: input, shape index: {}]   ;;  %s5047_s15 = inlined_call_operand.hbm [shape: f32[128,128], index: 15, kind: output, shape index: {}]  }
   0x1   :  { %21 = vsyncpa [#allocation6], 0 }
   0x2   :  { %22 = vsyncpa [#allocation9], 0 }
   0x3   :  { %23 = vsyncpa [#allocation12], 0 }
   0x4   :  { %24 = vsyncpa [#allocation4], 0  ;;  %s4002_s18 = smov [#allocation5]   ;;  %s4003_s20 = smov [#allocation8]  }
   0x5   :  { %s42_s19 = sshll.u32 %s4002_s18, 4  ;;  %s66_s21 = sshll.u32 %s4003_s20, 4  ;;  %s43_s19 = int_to_ptr.vmem [resolvable:$true] %s42_s19  ;;  %s67_s21 = int_to_ptr.vmem [resolvable:$true] %s66_s21 }
   0x6   :  { %s3840_s22 = scalar_lea.vmem %s43_s19, 256  ;;  %p3845_p1 = scmp.lt.s32.totalorder %s43_s19, %s43_s19 }
   0x7   :  { %p3841_p0 = scmp.ne.s32.totalorder %s43_s19, %s3840_s22  ;;  %p3846_p2 = scmp.lt.s32.totalorder %s3840_s22, %s3840_s22 }
   0x9   :  { %p3847_p3 = por %p3846_p2, %p3845_p1 }
   0xb   :  { %p3848_p4 = pnand %p3847_p3, %p3841_p0 }
   0xd   :  { %3851 = shalt.err (!%p3848_p4)
}
   0xe   :  { %s4004_s23 = smov 128   ;;  %s4005_s24 = smov 8  }
   0xf   :  { %48 = dma.hbm_to_vmem [thread:$0]  %s5033_s1, 256, %s43_s19, [#allocation6], %s4004_s23, %s4004_s23, %s4005_s24  }
  0x10   :  { %s3860_s27 = scalar_lea.vmem %s67_s21, 1024  ;;  %p3865_p6 = scmp.lt.s32.totalorder %s67_s21, %s67_s21 }
  0x11   :  { %p3861_p5 = scmp.ne.s32.totalorder %s67_s21, %s3860_s27  ;;  %p3866_p7 = scmp.lt.s32.totalorder %s3860_s27, %s3860_s27 }
  0x13   :  { %p3867_p8 = por %p3866_p7, %p3865_p6 }
  0x15   :  { %p3868_p9 = pnand %p3867_p8, %p3861_p5 }
  0x17   :  { %3871 = shalt.err (!%p3868_p9)
}
  0x18   :  { %s4006_s28 = smov 64   ;;  %s4007_s29 = smov 4  }
  0x19   :  { %72 = dma.hbm_to_vmem [thread:$0]  %s5035_s3, 1024, %s67_s21, [#allocation9], %s4006_s28, %s4006_s28, %s4007_s29  }
  0x1a   :  { %s4008_s17 = smov [#allocation11]   ;;  %s4009_s20 = smov [#allocation2]  }
  0x1b   :  { %s102_s18 = sshll.u32 %s4008_s17, 4  ;;  %s30_s1 = sshll.u32 %s4009_s20, 4  ;;  %s103_s18 = int_to_ptr.vmem [resolvable:$true] %s102_s18  ;;  %s31_s1 = int_to_ptr.vmem [resolvable:$true] %s30_s1 }
  0x1c   :  { %s3880_s19 = scalar_lea.vmem %s103_s18, 1024  ;;  %p3885_p11 = scmp.lt.s32.totalorder %s103_s18, %s103_s18 }
  0x1d   :  { %p3881_p10 = scmp.ne.s32.totalorder %s103_s18, %s3880_s19  ;;  %p3886_p12 = scmp.lt.s32.totalorder %s3880_s19, %s3880_s19 }
  0x1f   :  { %p3887_p13 = por %p3886_p12, %p3885_p11 }
  0x21   :  { %p3888_p0 = pnand %p3887_p13, %p3881_p10 }
  0x23   :  { %3891 = shalt.err (!%p3888_p0)
}
  0x24   :  { %108 = dma.hbm_to_vmem [thread:$0]  %s5043_s11, 1024, %s103_s18, [#allocation12], %s4006_s28, %s4006_s28, %s4007_s29  }
  0x25   :  { %s3900_s3 = scalar_lea.vmem %s31_s1, 2048  ;;  %p3905_p2 = scmp.lt.s32.totalorder %s31_s1, %s31_s1 }
  0x26   :  { %p3901_p1 = scmp.ne.s32.totalorder %s31_s1, %s3900_s3  ;;  %p3906_p3 = scmp.lt.s32.totalorder %s3900_s3, %s3900_s3 }
  0x28   :  { %p3907_p4 = por %p3906_p3, %p3905_p2 }
  0x2a   :  { %p3908_p5 = pnand %p3907_p4, %p3901_p1 }
  0x2c   :  { %3911 = shalt.err (!%p3908_p5)
}
  0x2d   :  { %36 = dma.hbm_to_vmem [thread:$0]  %s5032_s0, 2048, %s31_s1, [#allocation3], %s4004_s23, %s4004_s23, %s4005_s24  }
  0x2e   :  { %s4010_s27 = smov [#allocation7]  }
  0x2f   :  { %s54_s30 = sshll.u32 %s4010_s27, 4  ;;  %s55_s30 = int_to_ptr.vmem [resolvable:$true] %s54_s30 }
  0x30   :  { %s3920_s16 = scalar_lea.vmem %s55_s30, 3072  ;;  %p3925_p7 = scmp.lt.s32.totalorder %s55_s30, %s55_s30 }
  0x31   :  { %p3921_p6 = scmp.ne.s32.totalorder %s55_s30, %s3920_s16  ;;  %p3926_p8 = scmp.lt.s32.totalorder %s3920_s16, %s3920_s16 }
  0x33   :  { %p3927_p9 = por %p3926_p8, %p3925_p7 }
  0x35   :  { %p3928_p10 = pnand %p3927_p9, %p3921_p6 }
  0x37   :  { %3931 = shalt.err (!%p3928_p10)
}
  0x38   :  { %s4011_s11 = smov 192   ;;  %s4012_s17 = smov 12  }
  0x39   :  { %60 = dma.hbm_to_vmem [thread:$0]  %s5034_s2, 3072, %s55_s30, [#allocation6], %s4011_s11, %s4011_s11, %s4012_s17  }
  0x3a   :  { %s4013_s19 = smov [#allocation10]   ;;  %s4014_s0 = smov [#allocation13]  }
  0x3b   :  { %s78_s22 = sshll.u32 %s4013_s19, 4  ;;  %s116_s1 = sshll.u32 %s4014_s0, 4  ;;  %s79_s22 = int_to_ptr.vmem [resolvable:$true] %s78_s22  ;;  %s117_s1 = int_to_ptr.vmem [resolvable:$true] %s116_s1 }
  0x3c   :  { %s3940_s25 = scalar_lea.vmem %s79_s22, 2048  ;;  %p3945_p12 = scmp.lt.s32.totalorder %s79_s22, %s79_s22 }
  0x3d   :  { %p3941_p11 = scmp.ne.s32.totalorder %s79_s22, %s3940_s25  ;;  %p3946_p13 = scmp.lt.s32.totalorder %s3940_s25, %s3940_s25 }
  0x3f   :  { %p3947_p0 = por %p3946_p13, %p3945_p12 }
  0x41   :  { %p3948_p1 = pnand %p3947_p0, %p3941_p11 }
  0x43   :  { %3951 = shalt.err (!%p3948_p1)
}
  0x44   :  { %84 = dma.hbm_to_vmem [thread:$0]  %s5036_s4, 2048, %s79_s22, [#allocation9], %s4004_s23, %s4004_s23, %s4005_s24  }
  0x45   :  { %s3960_s2 = scalar_lea.vmem %s117_s1, 1024  ;;  %p3965_p3 = scmp.lt.s32.totalorder %s117_s1, %s117_s1 }
  0x46   :  { %p3961_p2 = scmp.ne.s32.totalorder %s117_s1, %s3960_s2  ;;  %p3966_p4 = scmp.lt.s32.totalorder %s3960_s2, %s3960_s2 }
  0x48   :  { %p3967_p5 = por %p3966_p4, %p3965_p3 }
  0x4a   :  { %p3968_p6 = pnand %p3967_p5, %p3961_p2 }
  0x4c   :  { %3971 = shalt.err (!%p3968_p6)
}
  0x4d   :  { %122 = dma.hbm_to_vmem [thread:$0]  %s5045_s13, 1024, %s117_s1, [#allocation12], %s4006_s28, %s4006_s28, %s4007_s29  }
  0x4e   :  { %3992 = dma.done.wait [#allocation3], 2048  }
  0x4f   :  { %3993 = vsyncadd [#allocation3], 4294965248 }
  0x50   :  { %3994 = dma.done.wait [#allocation6], 3328  }
  0x51   :  { %3995 = vsyncadd [#allocation6], 4294963968 }
  0x52   :  { %3996 = dma.done.wait [#allocation9], 3072  }
  0x53   :  { %3997 = vsyncadd [#allocation9], 4294964224 }
  0x54   :  { %3998 = dma.done.wait [#allocation12], 2048  }
  0x55   :  { %3999 = vsyncadd [#allocation12], 4294965248  ;;  %v4138_v0 = vld [vmem:[#allocation2] sm:$0xff]  ;;  %v4140_v1 = vld [vmem:[#allocation2 + $0x8] sm:$0xff]  ;;  %v4015_v47 = vmov 0   ;;  %vm943_vm0 = vcmask 523264  }
  0x56   :  { %167 = vadd.xlane.f32.xlu0 %v4138_v0  ;;  %v199_v2 = vmul.f32 %v4138_v0, %v4138_v0  ;;  %v200_v3 = vmul.f32 %v4140_v1, %v4140_v1  ;;  %v4148_v4 = vld [vmem:[#allocation2 + $0x10] sm:$0xff]  ;;  %v4150_v5 = vld [vmem:[#allocation2 + $0x18] sm:$0xff]  ;;  %v4158_v9 = vld [vmem:[#allocation2 + $0x20] sm:$0xff]  ;;  %619 = vmatprep.mubr.bf16.mxu0 %v4015_v47  ;;  %vm4017_vm1 = vmmov 0   ;;  %vm2046_vm2 = vcmask 1043456  }
  0x57   :  { %v201_v6 = vmul.f32 %v4148_v4, %v4148_v4  ;;  %v202_v7 = vmul.f32 %v4150_v5, %v4150_v5  ;;  %v3504_v8 = vld [vmem:[#allocation7 + $0xac] ss:$12 sps:$4 sm:$0xff]   ;;  %v3506_v10 = vld [vmem:[#allocation7 + $0xa8] ss:$12 sps:$4 sm:$0xff]   ;;  %v3509_v13 = vld [vmem:[#allocation7 + $0x90] ss:$12 sps:$4 sm:$0xff]   ;;  %v203_v14 = vmul.f32 %v4158_v9, %v4158_v9 }
  0x58   :  { %215 = vadd.xlane.f32.xlu1 %v199_v2  ;;  %587 = vmatprep.subr.bf16.mxu0 %v3504_v8  ;;  %v4160_v11 = vld [vmem:[#allocation2 + $0x28] sm:$0xff]  ;;  %v3507_v12 = vld [vmem:[#allocation7 + $0x94] ss:$12 sps:$4 sm:$0xff]   ;;  %v4170_v20 = vld [vmem:[#allocation2 + $0x38] sm:$0xff]  ;;  %vm2033_vm3 = vcmask 64512  }
  0x59   :  { %588 = vmatpush1.bf16.msra.mxu0 %v3506_v10  ;;  %v204_v15 = vmul.f32 %v4160_v11, %v4160_v11  ;;  %v3510_v16 = vld [vmem:[#allocation7 + $0x7c] ss:$12 sps:$4 sm:$0xff]   ;;  %v4168_v18 = vld [vmem:[#allocation2 + $0x30] sm:$0xff]  ;;  %v206_v25 = vmul.f32 %v4170_v20, %v4170_v20  ;;  %v4178_v26 = vld [vmem:[#allocation2 + $0x40] sm:$0xff] }
  0x5a   :  { %169 = vadd.xlane.f32.xlu0 %v4140_v1  ;;  %589 = vmatprep.subr.bf16.mxu0 %v3507_v12  ;;  %v3512_v17 = vld [vmem:[#allocation7 + $0xb0] ss:$12 sps:$4 sm:$0xff]   ;;  %v3513_v19 = vld [vmem:[#allocation7 + $0x78] ss:$12 sps:$4 sm:$0xff]   ;;  %v3517_v23 = vld [vmem:[#allocation7 + $0x60] ss:$12 sps:$4 sm:$0xff]   ;;  %v205_v24 = vmul.f32 %v4168_v18, %v4168_v18  ;;  %v207_v33 = vmul.f32 %v4178_v26, %v4178_v26 }
  0x5b   :  { %3249 = vmatprep.subr.bf16.mxu1 %v3512_v17  ;;  %v3514_v21 = vld [vmem:[#allocation7 + $0x64] ss:$12 sps:$4 sm:$0xff]   ;;  %v3518_v27 = vld [vmem:[#allocation7 + $0x4c] ss:$12 sps:$4 sm:$0xff]   ;;  %v3521_v29 = vld [vmem:[#allocation7 + $0x48] ss:$12 sps:$4 sm:$0xff]  }
  0x5c   :  { %217 = vadd.xlane.f32.xlu1 %v200_v3  ;;  %3250 = vmatpush3.bf16.msra.mxu1 %v3512_v17  ;;  %v3516_v22 = vld [vmem:[#allocation7 + $0x98] ss:$12 sps:$4 sm:$0xff]   ;;  %v3520_v28 = vld [vmem:[#allocation7 + $0x80] ss:$12 sps:$4 sm:$0xff]   ;;  %v3524_v32 = vld [vmem:[#allocation7 + $0x68] ss:$12 sps:$4 sm:$0xff]  }
  0x5d   :  { %590 = vmatpush1.bf16.msra.mxu0 %v3509_v13  ;;  %3251 = vmatprep.subr.bf16.mxu1 %v3516_v22  ;;  %v4180_v30 = vld [vmem:[#allocation2 + $0x48] sm:$0xff]  ;;  %v3522_v31 = vld [vmem:[#allocation7 + $0x34] ss:$12 sps:$4 sm:$0xff]   ;;  %v4190_v40 = vld [vmem:[#allocation2 + $0x58] sm:$0xff] }
  0x5e   :  { %171 = vadd.xlane.f32.xlu0 %v4148_v4  ;;  %591 = vmatprep.subr.bf16.mxu0 %v3510_v16  ;;  %v3525_v34 = vld [vmem:[#allocation7 + $0x30] ss:$12 sps:$4 sm:$0xff]   ;;  %v208_v35 = vmul.f32 %v4180_v30, %v4180_v30  ;;  %v4188_v38 = vld [vmem:[#allocation2 + $0x50] sm:$0xff]  ;;  %v210_v45 = vmul.f32 %v4190_v40, %v4190_v40  ;;  %v3535_v50 = vld [vmem:[#allocation7 + $0x8] ss:$12 sps:$4 sm:$0xff]  }
  0x5f   :  { %v3526_v36 = vld [vmem:[#allocation7 + $0x1c] ss:$12 sps:$4 sm:$0xff]   ;;  %v3529_v39 = vld [vmem:[#allocation7 + $0x18] ss:$12 sps:$4 sm:$0xff]   ;;  %v209_v43 = vmul.f32 %v4188_v38, %v4188_v38  ;;  %v3533_v44 = vld [vmem:[#allocation7] ss:$12 sps:$4 sm:$0xff]  }
  0x60   :  { %173 = vadd.xlane.f32.xlu1 %v4150_v5  ;;  %3252 = vmatpush3.bf16.msra.mxu1 %v3516_v22  ;;  %v3528_v37 = vld [vmem:[#allocation7 + $0x50] ss:$12 sps:$4 sm:$0xff]   ;;  %v3532_v42 = vld [vmem:[#allocation7 + $0x38] ss:$12 sps:$4 sm:$0xff]   ;;  %v3534_v46 = vld [vmem:[#allocation7 + $0x20] ss:$12 sps:$4 sm:$0xff]  }
  0x61   :  { %592 = vmatpush1.bf16.msra.mxu0 %v3513_v19  ;;  %3253 = vmatprep.subr.bf16.mxu1 %v3520_v28  ;;  %v3530_v41 = vld [vmem:[#allocation7 + $0x4] ss:$12 sps:$4 sm:$0xff]   ;;  %v4201_v49 = vld [vmem:[#allocation2 + $0x68] sm:$0xff]  ;;  %v4211_v54 = vld [vmem:[#allocation2 + $0x78] sm:$0xff] }
  0x62   :  { %219 = vadd.xlane.f32.xlu0 %v201_v6  ;;  %593 = vmatprep.subr.bf16.mxu0 %v3514_v21  ;;  %v4199_v48 = vld [vmem:[#allocation2 + $0x60] sm:$0xff]  ;;  %v212_v52 = vmul.f32 %v4201_v49, %v4201_v49  ;;  %v4209_v53 = vld [vmem:[#allocation2 + $0x70] sm:$0xff]  ;;  %v214_v56 = vmul.f32 %v4211_v54, %v4211_v54 }
  0x63   :  { %v211_v51 = vmul.f32 %v4199_v48, %v4199_v48  ;;  %v213_v55 = vmul.f32 %v4209_v53, %v4209_v53 }
  0x64   :  { %221 = vadd.xlane.f32.xlu1 %v202_v7  ;;  %3254 = vmatpush3.bf16.msra.mxu1 %v3520_v28 }
  0x65   :  { %594 = vmatpush1.bf16.msra.mxu0 %v3517_v23  ;;  %3255 = vmatprep.subr.bf16.mxu1 %v3524_v32 }
  0x66   :  { %175 = vadd.xlane.f32.xlu0 %v4158_v9  ;;  %595 = vmatprep.subr.bf16.mxu0 %v3518_v27 }
  0x68   :  { %177 = vadd.xlane.f32.xlu1 %v4160_v11  ;;  %3256 = vmatpush3.bf16.msra.mxu1 %v3524_v32 }
  0x69   :  { %596 = vmatpush1.bf16.msra.mxu0 %v3521_v29  ;;  %3257 = vmatprep.subr.bf16.mxu1 %v3528_v37 }
  0x6a   :  { %223 = vadd.xlane.f32.xlu0 %v203_v14  ;;  %597 = vmatprep.subr.bf16.mxu0 %v3522_v31 }
  0x6c   :  { %225 = vadd.xlane.f32.xlu1 %v204_v15  ;;  %3258 = vmatpush3.bf16.msra.mxu1 %v3528_v37 }
  0x6d   :  { %598 = vmatpush1.bf16.msra.mxu0 %v3525_v34  ;;  %3259 = vmatprep.subr.bf16.mxu1 %v3532_v42 }
  0x6e   :  { %179 = vadd.xlane.f32.xlu0 %v4168_v18  ;;  %599 = vmatprep.subr.bf16.mxu0 %v3526_v36 }
  0x70   :  { %181 = vadd.xlane.f32.xlu1 %v4170_v20  ;;  %3260 = vmatpush3.bf16.msra.mxu1 %v3532_v42 }
  0x71   :  { %600 = vmatpush1.bf16.msra.mxu0 %v3529_v39  ;;  %3261 = vmatprep.subr.bf16.mxu1 %v3534_v46 }
  0x72   :  { %227 = vadd.xlane.f32.xlu0 %v205_v24  ;;  %601 = vmatprep.subr.bf16.mxu0 %v3530_v41 }
  0x74   :  { %229 = vadd.xlane.f32.xlu1 %v206_v25  ;;  %3262 = vmatpush3.bf16.msra.mxu1 %v3534_v46 }
  0x75   :  { %602 = vmatpush1.bf16.msra.mxu0 %v3533_v44  ;;  %3263 = vmatprep.subr.bf16.mxu1 %v3535_v50 }
  0x76   :  { %183 = vadd.xlane.f32.xlu0 %v4178_v26 }
  0x78   :  { %185 = vadd.xlane.f32.xlu1 %v4180_v30  ;;  %3264 = vmatpush3.bf16.msra.mxu1 %v3535_v50 }
  0x7a   :  { %231 = vadd.xlane.f32.xlu0 %v207_v33 }
  0x7c   :  { %233 = vadd.xlane.f32.xlu1 %v208_v35 }
  0x7e   :  { %187 = vadd.xlane.f32.xlu0 %v4188_v38 }
  0x80   :  { %189 = vadd.xlane.f32.xlu1 %v4190_v40 }
  0x82   :  { %235 = vadd.xlane.f32.xlu0 %v209_v43 }
  0x84   :  { %237 = vadd.xlane.f32.xlu1 %v210_v45 }
  0x86   :  { %191 = vadd.xlane.f32.xlu0 %v4199_v48 }
  0x88   :  { %193 = vadd.xlane.f32.xlu1 %v4201_v49 }
  0x8a   :  { %239 = vadd.xlane.f32.xlu0 %v211_v51 }
  0x8c   :  { %241 = vadd.xlane.f32.xlu1 %v212_v52 }
  0x8e   :  { %195 = vadd.xlane.f32.xlu0 %v4209_v53 }
  0x90   :  { %197 = vadd.xlane.f32.xlu1 %v4211_v54 }
  0x92   :  { %243 = vadd.xlane.f32.xlu0 %v213_v55 }
  0x94   :  { %245 = vadd.xlane.f32.xlu1 %v214_v56  ;;  %v4241_v56 = vld [vmem:[%s5037_s5] ss:$0 sm:$0xff] }
  0xdf   :  { %v168_v57 = vpop.xlane.xlu0 %167 }
  0xe0   :  { %v247_v58 = vmul.f32 0.03125, %v168_v57 }
  0xe1   :  { %v216_v59 = vpop.xlane.xlu1 %215 }
  0xe2   :  { %v279_v60 = vmul.f32 %v247_v58, %v247_v58  ;;  %v263_v61 = vmul.f32 0.03125, %v216_v59  ;;  %v311_v41 = vsub.f32 %v4138_v0, %v247_v58 }
  0xe3   :  { %v170_v62 = vpop.xlane.xlu0 %169 }
  0xe4   :  { %v295_v63 = vsub.f32 %v263_v61, %v279_v60  ;;  %v248_v2 = vmul.f32 0.03125, %v170_v62 }
  0xe5   :  { %v218_v3 = vpop.xlane.xlu1 %217 }
  0xe6   :  { %v327_v6 = vadd.f32 1e-05, %v295_v63  ;;  %v280_v7 = vmul.f32 %v248_v2, %v248_v2  ;;  %v264_v8 = vmul.f32 0.03125, %v218_v3  ;;  %v312_v0 = vsub.f32 %v4140_v1, %v248_v2 }
  0xe7   :  { %v172_v10 = vpop.xlane.xlu0 %171 }
  0xe8   :  { %3584 = vrsqrt.f32 %v327_v6  ;;  %v296_v12 = vsub.f32 %v264_v8, %v280_v7  ;;  %v4219_v13 = vmul.f32 0.03125, %v172_v10  ;;  %v4252_v7 = vld [vmem:[%s5038_s6] ss:$0 sm:$0xff] }
  0xe9   :  { %v174_v14 = vpop.xlane.xlu1 %173 }
  0xea   :  { %v328_v15 = vadd.f32 1e-05, %v296_v12  ;;  %v281_v16 = vmul.f32 %v4219_v13, %v4219_v13  ;;  %v4223_v17 = vmul.f32 0.03125, %v174_v14  ;;  %v313_v8 = vsub.f32 %v4148_v4, %v4219_v13 }
  0xeb   :  { %v220_v19 = vpop.xlane.xlu0 %219 }
  0xec   :  { %3586 = vrsqrt.f32 %v328_v15  ;;  %v265_v21 = vmul.f32 0.03125, %v220_v19  ;;  %v282_v23 = vmul.f32 %v4223_v17, %v4223_v17  ;;  %v314_v4 = vsub.f32 %v4150_v5, %v4223_v17 }
  0xed   :  { %v222_v22 = vpop.xlane.xlu1 %221 }
  0xee   :  { %v297_v24 = vsub.f32 %v265_v21, %v281_v16  ;;  %v266_v25 = vmul.f32 0.03125, %v222_v22 }
  0xef   :  { %v176_v27 = vpop.xlane.xlu0 %175 }
  0xf0   :  { %v329_v28 = vadd.f32 1e-05, %v297_v24  ;;  %v298_v29 = vsub.f32 %v266_v25, %v282_v23  ;;  %v4227_v31 = vmul.f32 0.03125, %v176_v27 }
  0xf1   :  { %v178_v32 = vpop.xlane.xlu1 %177 }
  0xf2   :  { %3588 = vrsqrt.f32 %v329_v28  ;;  %v330_v33 = vadd.f32 1e-05, %v298_v29  ;;  %v283_v34 = vmul.f32 %v4227_v31, %v4227_v31  ;;  %v4231_v35 = vmul.f32 0.03125, %v178_v32 }
  0xf3   :  { %v224_v36 = vpop.xlane.xlu0 %223 }
  0xf4   :  { %3590 = vrsqrt.f32 %v330_v33  ;;  %v267_v37 = vmul.f32 0.03125, %v224_v36  ;;  %v284_v43 = vmul.f32 %v4231_v35, %v4231_v35 }
  0xf5   :  { %v3585_v39 = vpop.eup %3584  ;;  %v226_v42 = vpop.xlane.xlu1 %225 }
  0xf6   :  { %v299_v44 = vsub.f32 %v267_v37, %v283_v34  ;;  %v268_v45 = vmul.f32 0.03125, %v226_v42  ;;  %v359_v50 = vmul.f32 %v3585_v39, %v311_v41  ;;  %v315_v42 = vsub.f32 %v4158_v9, %v4227_v31 }
  0xf7   :  { %v180_v46 = vpop.xlane.xlu0 %179 }
  0xf8   :  { %v331_v51 = vadd.f32 1e-05, %v299_v44  ;;  %v300_v52 = vsub.f32 %v268_v45, %v284_v43  ;;  %v4236_v55 = vmul.f32 0.03125, %v180_v46  ;;  %v381_v3 = vmul.f32 %v4241_v56, %v359_v50 }
  0xf9   :  { %v3587_v57 = vpop.eup %3586  ;;  %v182_v58 = vpop.xlane.xlu1 %181 }
  0xfa   :  { %3592 = vrsqrt.f32 %v331_v51  ;;  %v332_v59 = vadd.f32 1e-05, %v300_v52  ;;  %v285_v60 = vmul.f32 %v4236_v55, %v4236_v55  ;;  %v4246_v61 = vmul.f32 0.03125, %v182_v58 }
  0xfb   :  { %v228_v62 = vpop.xlane.xlu0 %227  ;;  %v360_v63 = vmul.f32 %v3587_v57, %v312_v0  ;;  %v403_v19 = vadd.f32 %v4252_v7, %v381_v3 }
  0xfc   :  { %3594 = vrsqrt.f32 %v332_v59  ;;  %v269_v6 = vmul.f32 0.03125, %v228_v62  ;;  %v286_v10 = vmul.f32 %v4246_v61, %v4246_v61 }
  0xfd   :  { %v230_v1 = vpop.xlane.xlu1 %229  ;;  %v382_v2 = vmul.f32 %v4241_v56, %v360_v63 }
  0xfe   :  { %v301_v12 = vsub.f32 %v269_v6, %v285_v60  ;;  %v270_v14 = vmul.f32 0.03125, %v230_v1  ;;  %v316_v60 = vsub.f32 %v4160_v11, %v4231_v35 }
  0xff   :  { %v3589_v15 = vpop.eup %3588  ;;  %v184_v16 = vpop.xlane.xlu0 %183  ;;  %v404_v21 = vadd.f32 %v4252_v7, %v382_v2 }
 0x100   :  { %v333_v22 = vadd.f32 1e-05, %v301_v12  ;;  %v302_v23 = vsub.f32 %v270_v14, %v286_v10  ;;  %v4261_v24 = vmul.f32 0.03125, %v184_v16  ;;  %v361_v25 = vmul.f32 %v3589_v15, %v313_v8 }
 0x101   :  { %v3591_v27 = vpop.eup %3590  ;;  %v186_v13 = vpop.xlane.xlu1 %185  ;;  %v419_v28 = vpack.c.bf16 %v404_v21, %v403_v19  ;;  %v317_v12 = vsub.f32 %v4168_v18, %v4236_v55 }
 0x102   :  { %3596 = vrsqrt.f32 %v333_v22  ;;  %v334_v29 = vadd.f32 1e-05, %v302_v23  ;;  %v287_v32 = vmul.f32 %v4261_v24, %v4261_v24  ;;  %v4267_v33 = vmul.f32 0.03125, %v186_v13 }
 0x103   :  { %620 = vmatmul.mubr.bf16.vlgmr.msra.gmra.mxu0 %v419_v28  ;;  %3265 = vmatprep.mubr.bf16.mxu1 %v419_v28  ;;  %v232_v34 = vpop.xlane.xlu0 %231  ;;  %v362_v36 = vmul.f32 %v3591_v27, %v314_v4  ;;  %v383_v37 = vmul.f32 %v4241_v56, %v361_v25  ;;  %v318_v28 = vsub.f32 %v4170_v20, %v4246_v61 }
 0x104   :  { %3598 = vrsqrt.f32 %v334_v29  ;;  %v271_v39 = vmul.f32 0.03125, %v232_v34  ;;  %629 = vmatprep.mubr.bf16.mxu0 %v4015_v47  ;;  %v288_v5 = vmul.f32 %v4267_v33, %v4267_v33 }
 0x105   :  { %v234_v17 = vpop.xlane.xlu1 %233  ;;  %v384_v41 = vmul.f32 %v4241_v56, %v362_v36  ;;  %v405_v50 = vadd.f32 %v4252_v7, %v383_v37 }
 0x106   :  { %v303_v43 = vsub.f32 %v271_v39, %v287_v32  ;;  %v272_v44 = vmul.f32 0.03125, %v234_v17 }
 0x107   :  { %v3593_v45 = vpop.eup %3592  ;;  %v188_v46 = vpop.xlane.xlu0 %187  ;;  %v406_v51 = vadd.f32 %v4252_v7, %v384_v41  ;;  %v319_v41 = vsub.f32 %v4178_v26, %v4261_v24 }
 0x108   :  { %v335_v52 = vadd.f32 1e-05, %v303_v43  ;;  %v304_v57 = vsub.f32 %v272_v44, %v288_v5  ;;  %v4278_v0 = vmul.f32 0.03125, %v188_v46  ;;  %v363_v58 = vmul.f32 %v3593_v45, %v315_v42 }
 0x109   :  { %v3595_v59 = vpop.eup %3594  ;;  %v190_v62 = vpop.xlane.xlu1 %189  ;;  %v420_v63 = vpack.c.bf16 %v406_v51, %v405_v50 }
 0x10a   :  { %3600 = vrsqrt.f32 %v335_v52  ;;  %v336_v9 = vadd.f32 1e-05, %v304_v57  ;;  %v289_v31 = vmul.f32 %v4278_v0, %v4278_v0  ;;  %v4284_v3 = vmul.f32 0.03125, %v190_v62 }
 0x10b   :  { %630 = vmatmul.mubr.bf16.gmra.mxu0 %v420_v63  ;;  %3266 = vmatmul.mubr.bf16.vlgmr.msra.gmra.mxu1 %v420_v63  ;;  %v236_v6 = vpop.xlane.xlu0 %235  ;;  %v364_v1 = vmul.f32 %v3595_v59, %v316_v60  ;;  %v385_v2 = vmul.f32 %v4241_v56, %v363_v58  ;;  %v320_v60 = vsub.f32 %v4180_v30, %v4267_v33 }
 0x10c   :  { %3602 = vrsqrt.f32 %v336_v9  ;;  %v273_v8 = vmul.f32 0.03125, %v236_v6  ;;  %639 = vmatprep.mubr.bf16.mxu0 %v4015_v47  ;;  %v290_v11 = vmul.f32 %v4284_v3, %v4284_v3 }
 0x10d   :  { %v238_v35 = vpop.xlane.xlu1 %237  ;;  %v386_v10 = vmul.f32 %v4241_v56, %v364_v1  ;;  %v407_v21 = vadd.f32 %v4252_v7, %v385_v2 }
 0x10e   :  { %v305_v14 = vsub.f32 %v273_v8, %v289_v31  ;;  %v274_v15 = vmul.f32 0.03125, %v238_v35 }
 0x10f   :  { %v3597_v16 = vpop.eup %3596  ;;  %v192_v19 = vpop.xlane.xlu0 %191  ;;  %v408_v22 = vadd.f32 %v4252_v7, %v386_v10 }
 0x110   :  { %v337_v23 = vadd.f32 1e-05, %v305_v14  ;;  %v306_v25 = vsub.f32 %v274_v15, %v290_v11  ;;  %v4295_v27 = vmul.f32 0.03125, %v192_v19  ;;  %v365_v4 = vmul.f32 %v3597_v16, %v317_v12 }
 0x111   :  { %v3599_v13 = vpop.eup %3598  ;;  %v194_v29 = vpop.xlane.xlu1 %193  ;;  %v421_v32 = vpack.c.bf16 %v408_v22, %v407_v21  ;;  %v321_v11 = vsub.f32 %v4188_v38, %v4278_v0  ;;  %v322_v16 = vsub.f32 %v4190_v40, %v4284_v3 }
 0x112   :  { %3604 = vrsqrt.f32 %v337_v23  ;;  %v338_v18 = vadd.f32 1e-05, %v306_v25  ;;  %v291_v55 = vmul.f32 %v4295_v27, %v4295_v27  ;;  %v4301_v34 = vmul.f32 0.03125, %v194_v29 }
 0x113   :  { %640 = vmatmul.mubr.bf16.gmra.mxu0 %v421_v32  ;;  %3269 = vmatprep.mubr.bf16.mxu1 %v421_v32  ;;  %v240_v36 = vpop.xlane.xlu0 %239  ;;  %v366_v37 = vmul.f32 %v3599_v13, %v318_v28  ;;  %v387_v39 = vmul.f32 %v4241_v56, %v365_v4  ;;  %v323_v40 = vsub.f32 %v4199_v48, %v4295_v27 }
 0x114   :  { %3606 = vrsqrt.f32 %v338_v18  ;;  %v275_v5 = vmul.f32 0.03125, %v240_v36  ;;  %649 = vmatprep.mubr.bf16.mxu0 %v4015_v47  ;;  %v292_v20 = vmul.f32 %v4301_v34, %v4301_v34  ;;  %v324_v32 = vsub.f32 %v4201_v49, %v4301_v34 }
 0x115   :  { %v242_v61 = vpop.xlane.xlu1 %241  ;;  %v388_v17 = vmul.f32 %v4241_v56, %v366_v37  ;;  %v409_v46 = vadd.f32 %v4252_v7, %v387_v39 }
 0x116   :  { %v307_v42 = vsub.f32 %v275_v5, %v291_v55  ;;  %v276_v43 = vmul.f32 0.03125, %v242_v61 }
 0x117   :  { %v3601_v44 = vpop.eup %3600  ;;  %v196_v45 = vpop.xlane.xlu0 %195  ;;  %v410_v50 = vadd.f32 %v4252_v7, %v388_v17 }
 0x118   :  { %v339_v51 = vadd.f32 1e-05, %v307_v42  ;;  %v308_v52 = vsub.f32 %v276_v43, %v292_v20  ;;  %v4312_v57 = vmul.f32 0.03125, %v196_v45  ;;  %v367_v58 = vmul.f32 %v3601_v44, %v319_v41 }
 0x119   :  { %v3603_v59 = vpop.eup %3602  ;;  %v198_v62 = vpop.xlane.xlu1 %197  ;;  %v422_v63 = vpack.c.bf16 %v410_v50, %v409_v46 }
 0x11a   :  { %3608 = vrsqrt.f32 %v339_v51  ;;  %v340_v26 = vadd.f32 1e-05, %v308_v52  ;;  %v293_v24 = vmul.f32 %v4312_v57, %v4312_v57  ;;  %v262_v9 = vmul.f32 0.03125, %v198_v62 }
 0x11b   :  { %650 = vmatmul.mubr.bf16.gmra.mxu0 %v422_v63  ;;  %3270 = vmatmul.mubr.bf16.gmra.mxu1 %v422_v63  ;;  %v244_v31 = vpop.xlane.xlu0 %243  ;;  %v368_v6 = vmul.f32 %v3603_v59, %v320_v60  ;;  %v389_v1 = vmul.f32 %v4241_v56, %v367_v58  ;;  %v325_v27 = vsub.f32 %v4209_v53, %v4312_v57 }
 0x11c   :  { %3610 = vrsqrt.f32 %v340_v26  ;;  %v277_v2 = vmul.f32 0.03125, %v244_v31  ;;  %659 = vmatprep.mubr.bf16.mxu0 %v4015_v47  ;;  %v294_v8 = vmul.f32 %v262_v9, %v262_v9  ;;  %v326_v34 = vsub.f32 %v4211_v54, %v262_v9 }
 0x11d   :  { %v246_v30 = vpop.xlane.xlu1 %245  ;;  %v390_v33 = vmul.f32 %v4241_v56, %v368_v6  ;;  %v411_v14 = vadd.f32 %v4252_v7, %v389_v1 }
 0x11e   :  { %v309_v35 = vsub.f32 %v277_v2, %v293_v24  ;;  %v278_v10 = vmul.f32 0.03125, %v246_v30 }
 0x11f   :  { %v3605_v12 = vpop.eup %3604  ;;  %v412_v15 = vadd.f32 %v4252_v7, %v390_v33 }
 0x120   :  { %v341_v19 = vadd.f32 1e-05, %v309_v35  ;;  %v310_v21 = vsub.f32 %v278_v10, %v294_v8  ;;  %v369_v22 = vmul.f32 %v3605_v12, %v321_v11 }
 0x121   :  { %v3607_v23 = vpop.eup %3606  ;;  %v423_v25 = vpack.c.bf16 %v412_v15, %v411_v14 }
 0x122   :  { %3612 = vrsqrt.f32 %v341_v19  ;;  %v342_v4 = vadd.f32 1e-05, %v310_v21  ;;  %v370_v13 = vmul.f32 %v3607_v23, %v322_v16  ;;  %v391_v38 = vmul.f32 %v4241_v56, %v369_v22 }
 0x123   :  { %660 = vmatmul.mubr.bf16.gmra.mxu0 %v423_v25  ;;  %3273 = vmatprep.mubr.bf16.mxu1 %v423_v25 }
 0x124   :  { %3614 = vrsqrt.f32 %v342_v4  ;;  %669 = vmatprep.mubr.bf16.mxu0 %v4015_v47  ;;  %v392_v0 = vmul.f32 %v4241_v56, %v370_v13  ;;  %v413_v3 = vadd.f32 %v4252_v7, %v391_v38 }
 0x126   :  { %v414_v28 = vadd.f32 %v4252_v7, %v392_v0 }
 0x127   :  { %v3609_v29 = vpop.eup %3608 }
 0x128   :  { %v424_v18 = vpack.c.bf16 %v414_v28, %v413_v3  ;;  %v371_v55 = vmul.f32 %v3609_v29, %v323_v40 }
 0x129   :  { %v3611_v36 = vpop.eup %3610 }
 0x12a   :  { %3274 = vmatmul.mubr.bf16.gmra.mxu1 %v424_v18  ;;  %v372_v37 = vmul.f32 %v3611_v36, %v324_v32  ;;  %v393_v39 = vmul.f32 %v4241_v56, %v371_v55 }
 0x12b   :  { %670 = vmatmul.mubr.bf16.gmra.mxu0 %v424_v18 }
 0x12c   :  { %679 = vmatprep.mubr.bf16.mxu0 %v4015_v47  ;;  %v394_v48 = vmul.f32 %v4241_v56, %v372_v37  ;;  %v415_v5 = vadd.f32 %v4252_v7, %v393_v39 }
 0x12e   :  { %v416_v20 = vadd.f32 %v4252_v7, %v394_v48 }
 0x12f   :  { %v3613_v49 = vpop.eup %3612 }
 0x130   :  { %v425_v61 = vpack.c.bf16 %v416_v20, %v415_v5  ;;  %v373_v17 = vmul.f32 %v3613_v49, %v325_v27 }
 0x131   :  { %v3615_v41 = vpop.eup %3614 }
 0x132   :  { %3277 = vmatprep.mubr.bf16.mxu1 %v425_v61  ;;  %v374_v42 = vmul.f32 %v3615_v41, %v326_v34  ;;  %v395_v43 = vmul.f32 %v4241_v56, %v373_v17 }
 0x133   :  { %680 = vmatmul.mubr.bf16.gmra.mxu0 %v425_v61 }
 0x134   :  { %689 = vmatprep.mubr.bf16.mxu0 %v4015_v47  ;;  %v396_v44 = vmul.f32 %v4241_v56, %v374_v42  ;;  %v417_v53 = vadd.f32 %v4252_v7, %v395_v43 }
 0x136   :  { %v418_v45 = vadd.f32 %v4252_v7, %v396_v44 }
 0x138   :  { %v426_v46 = vpack.c.bf16 %v418_v45, %v417_v53 }
 0x13a   :  { %3278 = vmatmul.mubr.bf16.gmra.mxu1 %v426_v46 }
 0x13b   :  { %690 = vmatmul.mubr.bf16.gmra.mxu0 %v426_v46 }
 0x1c3   :  { %v621_v54 = vpop.f32.mrf.mxu0 }
 0x1c5   :  { %v623_v50 = vpop.f32.mrf.mxu0 }
 0x1c7   :  { %v625_v51 = vpop.f32.mrf.mxu0 }
 0x1c8   :  { %v805_v18 = vpack.c.bf16 %v625_v51, %v621_v54 }
 0x1c9   :  { %v627_v52 = vpop.f32.mrf.mxu0 }
 0x1ca   :  { %v797_v57 = vpack.c.bf16 %v627_v52, %v623_v50 }
 0x1cb   :  { %v631_v58 = vpop.f32.mrf.mxu0  ;;  %v4349_v60 = vpop.f32.mrf.mxu1 }
 0x1cc   :  { %3289 = vmatprep.mubr.bf16.mxu1 %v797_v57 }
 0x1cd   :  { %v633_v59 = vpop.f32.mrf.mxu0  ;;  %v4351_v56 = vpop.f32.mrf.mxu1 }
 0x1cf   :  { %v635_v62 = vpop.f32.mrf.mxu0  ;;  %v3268_v7 = vpop.f32.mrf.mxu1 }
 0x1d0   :  { %v806_v22 = vpack.c.bf16 %v635_v62, %v631_v58  ;;  %v1129_v43 = vpack.c.bf16 %v3268_v7, %v4349_v60 }
 0x1d1   :  { %v637_v63 = vpop.f32.mrf.mxu0  ;;  %v4353_v6 = vpop.f32.mrf.mxu1 }
 0x1d2   :  { %v798_v49 = vpack.c.bf16 %v637_v63, %v633_v59  ;;  %v1128_v46 = vpack.c.bf16 %v4353_v6, %v4351_v56 }
 0x1d3   :  { %v641_v26 = vpop.f32.mrf.mxu0 }
 0x1d5   :  { %v643_v24 = vpop.f32.mrf.mxu0 }
 0x1d7   :  { %v645_v9 = vpop.f32.mrf.mxu0 }
 0x1d8   :  { %v807_v10 = vpack.c.bf16 %v645_v9, %v641_v26 }
 0x1d9   :  { %v647_v31 = vpop.f32.mrf.mxu0 }
 0x1da   :  { %v799_v61 = vpack.c.bf16 %v647_v31, %v643_v24 }
 0x1db   :  { %v651_v1 = vpop.f32.mrf.mxu0  ;;  %v3271_v2 = vpop.f32.mrf.mxu1 }
 0x1dd   :  { %v653_v8 = vpop.f32.mrf.mxu0  ;;  %v750_v33 = vpop.f32.mrf.mxu1 }
 0x1df   :  { %v655_v30 = vpop.f32.mrf.mxu0  ;;  %v3272_v14 = vpop.f32.mrf.mxu1 }
 0x1e0   :  { %v808_v11 = vpack.c.bf16 %v655_v30, %v651_v1  ;;  %v1131_v48 = vpack.c.bf16 %v3272_v14, %v3271_v2 }
 0x1e1   :  { %v657_v35 = vpop.f32.mrf.mxu0  ;;  %v753_v19 = vpop.f32.mrf.mxu1 }
 0x1e2   :  { %3281 = vmatprep.subr.bf16.mxu1 %v808_v11  ;;  %v1130_v41 = vpack.c.bf16 %v753_v19, %v750_v33  ;;  %v800_v44 = vpack.c.bf16 %v657_v35, %v653_v8 }
 0x1e3   :  { %v4355_v12 = vpop.f32.mrf.mxu0  ;;  %3282 = vmatpush3.bf16.xpose.msra.mxu1 %v808_v11 }
 0x1e4   :  { %3283 = vmatprep.subr.bf16.mxu1 %v807_v10 }
 0x1e5   :  { %v663_v15 = vpop.f32.mrf.mxu0 }
 0x1e7   :  { %v665_v16 = vpop.f32.mrf.mxu0 }
 0x1e8   :  { %v809_v51 = vpack.c.bf16 %v665_v16, %v4355_v12 }
 0x1e9   :  { %v667_v21 = vpop.f32.mrf.mxu0 }
 0x1ea   :  { %v801_v23 = vpack.c.bf16 %v667_v21, %v663_v15  ;;  %v3275_v25 = vpop.f32.mrf.mxu1 }
 0x1eb   :  { %v671_v4 = vpop.f32.mrf.mxu0  ;;  %3284 = vmatpush3.bf16.xpose.msra.mxu1 %v807_v10 }
 0x1ec   :  { %3285 = vmatprep.subr.bf16.mxu1 %v806_v22  ;;  %3305 = vmatprep.mubr.bf16.mxu0 %v801_v23  ;;  %v766_v13 = vpop.f32.mrf.mxu1 }
 0x1ed   :  { %v673_v38 = vpop.f32.mrf.mxu0 }
 0x1ee   :  { %v3276_v0 = vpop.f32.mrf.mxu1 }
 0x1ef   :  { %v675_v40 = vpop.f32.mrf.mxu0  ;;  %v4357_v3 = vpack.c.bf16 %v3276_v0, %v3275_v25 }
 0x1f0   :  { %v769_v28 = vpop.f32.mrf.mxu1  ;;  %v810_v45 = vpack.c.bf16 %v675_v40, %v671_v4 }
 0x1f1   :  { %v677_v29 = vpop.f32.mrf.mxu0  ;;  %v4359_v32 = vpack.c.bf16 %v769_v28, %v766_v13 }
 0x1f2   :  { %v802_v52 = vpack.c.bf16 %v677_v29, %v673_v38 }
 0x1f3   :  { %v681_v55 = vpop.f32.mrf.mxu0  ;;  %3286 = vmatpush3.bf16.xpose.msra.mxu1 %v806_v22 }
 0x1f4   :  { %3287 = vmatprep.subr.bf16.mxu1 %v805_v18 }
 0x1f5   :  { %v683_v36 = vpop.f32.mrf.mxu0 }
 0x1f7   :  { %v685_v37 = vpop.f32.mrf.mxu0 }
 0x1f8   :  { %v811_v17 = vpack.c.bf16 %v685_v37, %v681_v55 }
 0x1f9   :  { %v687_v39 = vpop.f32.mrf.mxu0 }
 0x1fa   :  { %v3279_v42 = vpop.f32.mrf.mxu1  ;;  %v803_v57 = vpack.c.bf16 %v687_v39, %v683_v36 }
 0x1fb   :  { %v691_v27 = vpop.f32.mrf.mxu0  ;;  %3288 = vmatpush3.bf16.xpose.msra.mxu1 %v805_v18 }
 0x1fc   :  { %3313 = vmatprep.subr.bf16.mxu1 %v1131_v48  ;;  %v4362_v53 = vpop.f32.mrf.mxu1 }
 0x1fd   :  { %v693_v5 = vpop.f32.mrf.mxu0 }
 0x1fe   :  { %v3280_v54 = vpop.f32.mrf.mxu1 }
 0x1ff   :  { %v695_v20 = vpop.f32.mrf.mxu0  ;;  %v4366_v50 = vpack.c.bf16 %v3280_v54, %v3279_v42 }
 0x200   :  { %v812_v34 = vpack.c.bf16 %v695_v20, %v691_v27  ;;  %v4370_v60 = vpop.f32.mrf.mxu1 }
 0x201   :  { %v697_v58 = vpop.f32.mrf.mxu0 }
 0x202   :  { %3290 = vmatmul.mubr.bf16.vlgmr.msra.gmra.mxu1 %v798_v49  ;;  %3297 = vmatprep.subr.bf16.mxu0 %v812_v34  ;;  %v804_v59 = vpack.c.bf16 %v697_v58, %v693_v5 }
 0x203   :  { %3293 = vmatprep.mubr.bf16.mxu1 %v799_v61  ;;  %3298 = vmatpush3.bf16.xpose.msra.mxu0 %v812_v34 }
 0x204   :  { %3314 = vmatpush3.bf16.msra.mxu1 %v1131_v48  ;;  %3299 = vmatprep.subr.bf16.mxu0 %v811_v17 }
 0x205   :  { %3315 = vmatprep.subr.bf16.mxu1 %v1130_v41 }
 0x208   :  { %3316 = vmatpush3.bf16.msra.mxu1 %v1130_v41 }
 0x209   :  { %3317 = vmatprep.subr.bf16.mxu1 %v1129_v43 }
 0x20a   :  { %3294 = vmatmul.mubr.bf16.gmra.mxu1 %v800_v44 }
 0x20b   :  { %3300 = vmatpush3.bf16.xpose.msra.mxu0 %v811_v17 }
 0x20c   :  { %3318 = vmatpush3.bf16.msra.mxu1 %v1129_v43  ;;  %3301 = vmatprep.subr.bf16.mxu0 %v810_v45 }
 0x20d   :  { %3319 = vmatprep.subr.bf16.mxu1 %v1128_v46 }
 0x210   :  { %3320 = vmatpush3.bf16.msra.mxu1 %v1128_v46 }
 0x211   :  { %3329 = vmatprep.subr.bf16.mxu1 %v4366_v50 }
 0x213   :  { %3302 = vmatpush3.bf16.xpose.msra.mxu0 %v810_v45 }
 0x214   :  { %3303 = vmatprep.subr.bf16.mxu0 %v809_v51 }
 0x21b   :  { %3304 = vmatpush3.bf16.xpose.msra.mxu0 %v809_v51 }
 0x222   :  { %3306 = vmatmul.mubr.bf16.vlgmr.msra.gmra.mxu0 %v802_v52 }
 0x223   :  { %3309 = vmatprep.mubr.bf16.mxu0 %v803_v57 }
 0x22a   :  { %3310 = vmatmul.mubr.bf16.gmra.mxu0 %v804_v59 }
 0x2c2   :  { %v3291_v62 = vpop.f32.mrf.mxu1 }
 0x2c3   :  { %v950_v63 = vsel %vm943_vm0, %v3291_v62, -inf }
 0x2c4   :  { %951 = vmax.xlane.f32.xlu0 %v950_v63  ;;  %v847_v56 = vpop.f32.mrf.mxu1 }
 0x2c5   :  { %v944_v24 = vsel %vm943_vm0, %v847_v56, -inf }
 0x2c6   :  { %v3292_v26 = vpop.f32.mrf.mxu1 }
 0x2c7   :  { %v953_v7 = vsel %vm943_vm0, %v3292_v26, -inf }
 0x2c8   :  { %945 = vmax.xlane.f32.xlu0 %v944_v24  ;;  %954 = vmax.xlane.f32.xlu1 %v953_v7  ;;  %v850_v9 = vpop.f32.mrf.mxu1 }
 0x2c9   :  { %v947_v6 = vsel %vm943_vm0, %v850_v9, -inf }
 0x2ca   :  { %v3295_v31 = vpop.f32.mrf.mxu1 }
 0x2cb   :  { %v962_v33 = vsel %vm943_vm0, %v3295_v31, -inf }
 0x2cc   :  { %948 = vmax.xlane.f32.xlu1 %v947_v6  ;;  %v863_v1 = vpop.f32.mrf.mxu1 }
 0x2cd   :  { %v956_v2 = vsel %vm943_vm0, %v863_v1, -inf }
 0x2ce   :  { %957 = vmax.xlane.f32.xlu0 %v956_v2  ;;  %v4377_v8 = vpop.f32.mrf.mxu1 }
 0x2cf   :  { %v965_v35 = vsel %vm943_vm0, %v4377_v8, -inf }
 0x2d0   :  { %v866_v30 = vpop.f32.mrf.mxu1 }
 0x2d1   :  { %v959_v11 = vsel %vm943_vm0, %v866_v30, -inf }
 0x2d2   :  { %963 = vmax.xlane.f32.xlu0 %v962_v33  ;;  %960 = vmax.xlane.f32.xlu1 %v959_v11 }
 0x2d6   :  { %966 = vmax.xlane.f32.xlu1 %v965_v35 }
 0x2e2   :  { %v4383_v10 = vpop.f32.mrf.mxu0 }
 0x2e3   :  { %v974_v12 = vsel %vm943_vm0, %v4383_v10, -inf }
 0x2e4   :  { %975 = vmax.xlane.f32.xlu0 %v974_v12  ;;  %v4387_v14 = vpop.f32.mrf.mxu0 }
 0x2e5   :  { %v968_v16 = vsel %vm943_vm0, %v4387_v14, -inf }
 0x2e6   :  { %v4389_v15 = vpop.f32.mrf.mxu0 }
 0x2e7   :  { %v977_v19 = vsel %vm943_vm0, %v4389_v15, -inf }
 0x2e8   :  { %969 = vmax.xlane.f32.xlu0 %v968_v16  ;;  %978 = vmax.xlane.f32.xlu1 %v977_v19  ;;  %v4395_v21 = vpop.f32.mrf.mxu0 }
 0x2e9   :  { %v971_v23 = vsel %vm943_vm0, %v4395_v21, -inf }
 0x2ea   :  { %v4397_v22 = vpop.f32.mrf.mxu0 }
 0x2eb   :  { %v986_v0 = vsel %vm943_vm0, %v4397_v22, -inf }
 0x2ec   :  { %972 = vmax.xlane.f32.xlu1 %v971_v23  ;;  %v4401_v25 = vpop.f32.mrf.mxu0 }
 0x2ed   :  { %v980_v4 = vsel %vm943_vm0, %v4401_v25, -inf }
 0x2ee   :  { %981 = vmax.xlane.f32.xlu0 %v980_v4  ;;  %v4405_v13 = vpop.f32.mrf.mxu0 }
 0x2ef   :  { %v989_v28 = vsel %vm943_vm0, %v4405_v13, -inf }
 0x2f0   :  { %v4407_v38 = vpop.f32.mrf.mxu0 }
 0x2f1   :  { %v983_v40 = vsel %vm943_vm0, %v4407_v38, -inf }
 0x2f2   :  { %987 = vmax.xlane.f32.xlu0 %v986_v0  ;;  %984 = vmax.xlane.f32.xlu1 %v983_v40 }
 0x2f6   :  { %990 = vmax.xlane.f32.xlu1 %v989_v28 }
 0x34d   :  { %v952_v29 = vpop.xlane.xlu0 %951 }
 0x34e   :  { %v994_v18 = vsub.f32 %v3291_v62, %v952_v29 }
 0x350   :  { %v1012_v55 = vmul.f32 1.442695, %v994_v18 }
 0x351   :  { %v946_v36 = vpop.xlane.xlu0 %945  ;;  %v955_v37 = vpop.xlane.xlu1 %954 }
 0x352   :  { %3616 = vpow2.f32 %v1012_v55  ;;  %v992_v39 = vsub.f32 %v847_v56, %v946_v36  ;;  %v995_v48 = vsub.f32 %v3292_v26, %v955_v37 }
 0x354   :  { %v1008_v27 = vmul.f32 1.442695, %v992_v39  ;;  %v1014_v5 = vmul.f32 1.442695, %v995_v48 }
 0x355   :  { %v949_v20 = vpop.xlane.xlu1 %948 }
 0x356   :  { %3618 = vpow2.f32 %v1008_v27  ;;  %v993_v49 = vsub.f32 %v850_v9, %v949_v20 }
 0x357   :  { %3620 = vpow2.f32 %v1014_v5  ;;  %v958_v34 = vpop.xlane.xlu0 %957 }
 0x358   :  { %v1010_v61 = vmul.f32 1.442695, %v993_v49  ;;  %v996_v17 = vsub.f32 %v863_v1, %v958_v34 }
 0x35a   :  { %3622 = vpow2.f32 %v1010_v61  ;;  %v1016_v41 = vmul.f32 1.442695, %v996_v17 }
 0x35b   :  { %v964_v42 = vpop.xlane.xlu0 %963  ;;  %v961_v43 = vpop.xlane.xlu1 %960 }
 0x35c   :  { %3624 = vpow2.f32 %v1016_v41  ;;  %v998_v44 = vsub.f32 %v3295_v31, %v964_v42  ;;  %v997_v45 = vsub.f32 %v866_v30, %v961_v43 }
 0x35e   :  { %v1020_v46 = vmul.f32 1.442695, %v998_v44  ;;  %v1018_v54 = vmul.f32 1.442695, %v997_v45 }
 0x35f   :  { %v4415_v51 = vpop.eup %3616  ;;  %v967_v52 = vpop.xlane.xlu1 %966 }
 0x360   :  { %3626 = vpow2.f32 %v1020_v46  ;;  %v999_v57 = vsub.f32 %v4377_v8, %v967_v52  ;;  %v1046_v58 = vsel %vm943_vm0, %v4415_v51, 0.0 }
 0x361   :  { %3628 = vpow2.f32 %v1018_v54  ;;  %1047 = vadd.xlane.f32.xlu0 %v1046_v58 }
 0x362   :  { %v1022_v59 = vmul.f32 1.442695, %v999_v57 }
 0x363   :  { %v4420_v62 = vpop.eup %3618 }
 0x364   :  { %v4422_v63 = vpop.eup %3620  ;;  %3630 = vpow2.f32 %v1022_v59  ;;  %v1040_v56 = vsel %vm943_vm0, %v4420_v62, 0.0 }
 0x365   :  { %1041 = vadd.xlane.f32.xlu0 %v1040_v56  ;;  %v1049_v26 = vsel %vm943_vm0, %v4422_v63, 0.0 }
 0x366   :  { %1050 = vadd.xlane.f32.xlu1 %v1049_v26 }
 0x367   :  { %v4428_v24 = vpop.eup %3622 }
 0x368   :  { %v1043_v7 = vsel %vm943_vm0, %v4428_v24, 0.0 }
 0x369   :  { %v4432_v9 = vpop.eup %3624 }
 0x36a   :  { %1044 = vadd.xlane.f32.xlu1 %v1043_v7  ;;  %v1052_v31 = vsel %vm943_vm0, %v4432_v9, 0.0 }
 0x36b   :  { %1053 = vadd.xlane.f32.xlu0 %v1052_v31 }
 0x36d   :  { %v4436_v6 = vpop.eup %3626  ;;  %v976_v1 = vpop.xlane.xlu0 %975 }
 0x36e   :  { %v4438_v2 = vpop.eup %3628  ;;  %v1002_v8 = vsub.f32 %v4383_v10, %v976_v1  ;;  %v1058_v30 = vsel %vm943_vm0, %v4436_v6, 0.0 }
 0x36f   :  { %1059 = vadd.xlane.f32.xlu0 %v1058_v30  ;;  %v1055_v33 = vsel %vm943_vm0, %v4438_v2, 0.0 }
 0x370   :  { %v1028_v11 = vmul.f32 1.442695, %v1002_v8  ;;  %1056 = vadd.xlane.f32.xlu1 %v1055_v33 }
 0x371   :  { %v4445_v35 = vpop.eup %3630  ;;  %v970_v12 = vpop.xlane.xlu0 %969 }
 0x372   :  { %v979_v16 = vpop.xlane.xlu1 %978  ;;  %3632 = vpow2.f32 %v1028_v11  ;;  %v1000_v19 = vsub.f32 %v4387_v14, %v970_v12  ;;  %v1061_v10 = vsel %vm943_vm0, %v4445_v35, 0.0 }
 0x373   :  { %v1003_v23 = vsub.f32 %v4389_v15, %v979_v16 }
 0x374   :  { %v1024_v4 = vmul.f32 1.442695, %v1000_v19  ;;  %1062 = vadd.xlane.f32.xlu1 %v1061_v10 }
 0x375   :  { %v1030_v0 = vmul.f32 1.442695, %v1003_v23 }
 0x376   :  { %v973_v40 = vpop.xlane.xlu1 %972  ;;  %3634 = vpow2.f32 %v1024_v4 }
 0x377   :  { %v1001_v28 = vsub.f32 %v4395_v21, %v973_v40  ;;  %3636 = vpow2.f32 %v1030_v0  ;;  %v982_v29 = vpop.xlane.xlu0 %981 }
 0x378   :  { %v1004_v55 = vsub.f32 %v4401_v25, %v982_v29 }
 0x379   :  { %v1026_v18 = vmul.f32 1.442695, %v1001_v28 }
 0x37a   :  { %v1032_v36 = vmul.f32 1.442695, %v1004_v55 }
 0x37b   :  { %3638 = vpow2.f32 %v1026_v18  ;;  %v988_v14 = vpop.xlane.xlu0 %987  ;;  %v985_v37 = vpop.xlane.xlu1 %984 }
 0x37c   :  { %3640 = vpow2.f32 %v1032_v36  ;;  %v1006_v15 = vsub.f32 %v4397_v22, %v988_v14  ;;  %v1005_v39 = vsub.f32 %v4407_v38, %v985_v37 }
 0x37e   :  { %v1036_v48 = vmul.f32 1.442695, %v1006_v15  ;;  %v1034_v27 = vmul.f32 1.442695, %v1005_v39 }
 0x37f   :  { %v4455_v5 = vpop.eup %3632  ;;  %v991_v20 = vpop.xlane.xlu1 %990 }
 0x380   :  { %3642 = vpow2.f32 %v1036_v48  ;;  %v1007_v21 = vsub.f32 %v4405_v13, %v991_v20  ;;  %v1070_v25 = vsel %vm943_vm0, %v4455_v5, 0.0 }
 0x381   :  { %3644 = vpow2.f32 %v1034_v27  ;;  %1071 = vadd.xlane.f32.xlu0 %v1070_v25 }
 0x382   :  { %v1038_v49 = vmul.f32 1.442695, %v1007_v21 }
 0x383   :  { %v4460_v34 = vpop.eup %3634 }
 0x384   :  { %v4462_v61 = vpop.eup %3636  ;;  %3646 = vpow2.f32 %v1038_v49  ;;  %v1064_v22 = vsel %vm943_vm0, %v4460_v34, 0.0 }
 0x385   :  { %1065 = vadd.xlane.f32.xlu0 %v1064_v22  ;;  %v1073_v38 = vsel %vm943_vm0, %v4462_v61, 0.0 }
 0x386   :  { %1074 = vadd.xlane.f32.xlu1 %v1073_v38 }
 0x388   :  { %v4468_v13 = vpop.eup %3638 }
 0x389   :  { %v1067_v17 = vsel %vm943_vm0, %v4468_v13, 0.0  ;;  %v4472_v41 = vpop.eup %3640 }
 0x38a   :  { %1068 = vadd.xlane.f32.xlu1 %v1067_v17  ;;  %v1076_v42 = vsel %vm943_vm0, %v4472_v41, 0.0 }
 0x38b   :  { %1077 = vadd.xlane.f32.xlu0 %v1076_v42 }
 0x38d   :  { %v4476_v43 = vpop.eup %3642 }
 0x38e   :  { %v4478_v44 = vpop.eup %3644  ;;  %v1082_v45 = vsel %vm943_vm0, %v4476_v43, 0.0 }
 0x38f   :  { %1083 = vadd.xlane.f32.xlu0 %v1082_v45  ;;  %v1079_v46 = vsel %vm943_vm0, %v4478_v44, 0.0 }
 0x390   :  { %1080 = vadd.xlane.f32.xlu1 %v1079_v46 }
 0x391   :  { %v4484_v54 = vpop.eup %3646 }
 0x392   :  { %v1085_v52 = vsel %vm943_vm0, %v4484_v54, 0.0 }
 0x394   :  { %1086 = vadd.xlane.f32.xlu1 %v1085_v52 }
 0x3ea   :  { %v1048_v57 = vpop.xlane.xlu0 %1047 }
 0x3ee   :  { %v1042_v58 = vpop.xlane.xlu0 %1041 }
 0x3ef   :  { %v1051_v59 = vpop.xlane.xlu1 %1050  ;;  %3648 = vrcp.f32 %v1042_v58 }
 0x3f0   :  { %3650 = vrcp.f32 %v1051_v59 }
 0x3f3   :  { %v1045_v56 = vpop.xlane.xlu1 %1044 }
 0x3f4   :  { %3652 = vrcp.f32 %v1045_v56  ;;  %v1054_v26 = vpop.xlane.xlu0 %1053 }
 0x3f5   :  { %3654 = vrcp.f32 %v1048_v57 }
 0x3f6   :  { %3656 = vrcp.f32 %v1054_v26 }
 0x3f8   :  { %v1060_v31 = vpop.xlane.xlu0 %1059 }
 0x3f9   :  { %v1057_v7 = vpop.xlane.xlu1 %1056 }
 0x3fa   :  { %3658 = vrcp.f32 %v1057_v7 }
 0x3fb   :  { %3660 = vrcp.f32 %v1060_v31 }
 0x3fc   :  { %v3649_v8 = vpop.eup %3648 }
 0x3fd   :  { %v1063_v1 = vpop.xlane.xlu1 %1062  ;;  %v3651_v30 = vpop.eup %3650  ;;  %v1104_v11 = vmul.f32 %v3649_v8, %v4420_v62 }
 0x3fe   :  { %3662 = vrcp.f32 %v1063_v1  ;;  %v1107_v23 = vmul.f32 %v3651_v30, %v4422_v63  ;;  %v3817_v1 = vld [vmem:[#allocation2] sm:$0xff]  ;;  %v3818_v30 = vld [vmem:[#allocation2 + $0x18] sm:$0xff] }
 0x401   :  { %v3653_v33 = vpop.eup %3652 }
 0x402   :  { %v1105_v12 = vmul.f32 %v3653_v33, %v4428_v24  ;;  %v3655_v16 = vpop.eup %3654 }
 0x403   :  { %v3657_v10 = vpop.eup %3656  ;;  %v1106_v4 = vmul.f32 %v3655_v16, %v4415_v51 }
 0x404   :  { %v1120_v19 = vpack.c.bf16 %v1105_v12, %v1104_v11  ;;  %v1108_v55 = vmul.f32 %v3657_v10, %v4432_v9 }
 0x405   :  { %v1121_v40 = vpack.c.bf16 %v1107_v23, %v1106_v4 }
 0x406   :  { %1136 = vxpose.xlu0.c.b16.start [1/4] (short) (narrow) %v1120_v19, 64 }
 0x407   :  { %v3659_v0 = vpop.eup %3658 }
 0x408   :  { %v1109_v28 = vmul.f32 %v3659_v0, %v4438_v2  ;;  %v3661_v29 = vpop.eup %3660  ;;  %v3820_v0 = vld [vmem:[#allocation2 + $0x30] sm:$0xff] }
 0x409   :  { %v1110_v63 = vmul.f32 %v3661_v29, %v4436_v6 }
 0x40a   :  { %1137 = vxpose.xlu0.c.b16.cont [2/4] (short) (narrow) %v1121_v40, 64  ;;  %v1072_v18 = vpop.xlane.xlu0 %1071  ;;  %v1122_v36 = vpack.c.bf16 %v1109_v28, %v1108_v55 }
 0x40b   :  { %v3663_v62 = vpop.eup %3662 }
 0x40c   :  { %v1111_v24 = vmul.f32 %v3663_v62, %v4445_v35  ;;  %v3822_v62 = vld [vmem:[#allocation2 + $0x38] sm:$0xff] }
 0x40e   :  { %1138 = vxpose.xlu0.c.b16.cont [3/4] (short) (narrow) %v1122_v36, 64  ;;  %v1066_v14 = vpop.xlane.xlu0 %1065  ;;  %v1123_v15 = vpack.c.bf16 %v1111_v24, %v1110_v63  ;;  %v3823_v63 = vld [vmem:[#allocation2 + $0x28] sm:$0xff] }
 0x40f   :  { %v1075_v37 = vpop.xlane.xlu1 %1074  ;;  %3664 = vrcp.f32 %v1066_v14 }
 0x410   :  { %3666 = vrcp.f32 %v1075_v37 }
 0x412   :  { %1139 = vxpose.xlu0.c.b16.end [4/4] (short) (narrow) %v1123_v15, 64  ;;  %v3536_v15 = vld [vmem:[#allocation8 + $0x38] sm:$0xff]  }
 0x413   :  { %v1069_v51 = vpop.xlane.xlu1 %1068  ;;  %3345 = vmatprep.subr.bf16.mxu0 %v3536_v15 }
 0x414   :  { %3668 = vrcp.f32 %v1069_v51  ;;  %v1078_v2 = vpop.xlane.xlu0 %1077  ;;  %3346 = vmatpush3.bf16.msra.mxu0 %v3536_v15  ;;  %v3562_v15 = vld [vmem:[#allocation10 + $0x10] ss:$8 sps:$4 sm:$0xff]  }
 0x415   :  { %3670 = vrcp.f32 %v1072_v18  ;;  %v3821_v18 = vld [vmem:[#allocation2 + $0x20] sm:$0xff] }
 0x416   :  { %3672 = vrcp.f32 %v1078_v2 }
 0x418   :  { %v1084_v9 = vpop.xlane.xlu0 %1083 }
 0x419   :  { %v1081_v39 = vpop.xlane.xlu1 %1080 }
 0x41a   :  { %3674 = vrcp.f32 %v1081_v39  ;;  %v3537_v39 = vld [vmem:[#allocation8 + $0x30] sm:$0xff]  }
 0x41b   :  { %3676 = vrcp.f32 %v1084_v9  ;;  %3347 = vmatprep.subr.bf16.mxu0 %v3537_v39 }
 0x41c   :  { %v3665_v35 = vpop.eup %3664  ;;  %3348 = vmatpush3.bf16.msra.mxu0 %v3537_v39  ;;  %v163_v39 = vld [vmem:[#allocation5] sm:$0xff] }
 0x41d   :  { %v1087_v48 = vpop.xlane.xlu1 %1086  ;;  %v3667_v27 = vpop.eup %3666  ;;  %v1112_v20 = vmul.f32 %v3665_v35, %v4460_v34 }
 0x41e   :  { %3678 = vrcp.f32 %v1087_v48  ;;  %v1115_v22 = vmul.f32 %v3667_v27, %v4462_v61  ;;  %v3824_v48 = vld [vmem:[#allocation2 + $0x50] sm:$0xff] }
 0x421   :  { %v3669_v6 = vpop.eup %3668 }
 0x422   :  { %v1113_v21 = vmul.f32 %v3669_v6, %v4468_v13  ;;  %v3671_v25 = vpop.eup %3670  ;;  %v3538_v6 = vld [vmem:[#allocation8 + $0x28] sm:$0xff]  }
 0x423   :  { %v3673_v38 = vpop.eup %3672  ;;  %v1114_v17 = vmul.f32 %v3671_v25, %v4455_v5  ;;  %3349 = vmatprep.subr.bf16.mxu0 %v3538_v6  ;;  %v3825_v25 = vld [vmem:[#allocation2 + $0x40] sm:$0xff] }
 0x424   :  { %v1124_v49 = vpack.c.bf16 %v1113_v21, %v1112_v20  ;;  %v1116_v57 = vmul.f32 %v3673_v38, %v4472_v41  ;;  %3350 = vmatpush3.bf16.msra.mxu0 %v3538_v6 }
 0x425   :  { %v1125_v45 = vpack.c.bf16 %v1115_v22, %v1114_v17  ;;  %v3826_v22 = vld [vmem:[#allocation2 + $0x58] sm:$0xff]  ;;  %v3539_v17 = vld [vmem:[#allocation8 + $0x20] sm:$0xff]  }
 0x426   :  { %1229 = vxpose.xlu1.c.b16.start [1/4] (short) (narrow) %v1124_v49, 64  ;;  %3351 = vmatprep.subr.bf16.mxu0 %v3539_v17 }
 0x427   :  { %v3675_v42 = vpop.eup %3674 }
 0x428   :  { %v1117_v46 = vmul.f32 %v3675_v42, %v4478_v44  ;;  %v3677_v52 = vpop.eup %3676  ;;  %v1134_v44 = vpack.c.bf16 %v4370_v60, %v4362_v53  ;;  %3352 = vmatpush3.bf16.msra.mxu0 %v3539_v17 }
 0x429   :  { %v1118_v59 = vmul.f32 %v3677_v52, %v4476_v43 }
 0x42a   :  { %1230 = vxpose.xlu1.c.b16.cont [2/4] (short) (narrow) %v1125_v45, 64  ;;  %v1126_v34 = vpack.c.bf16 %v1117_v46, %v1116_v57  ;;  %v3827_v45 = vld [vmem:[#allocation2 + $0x48] sm:$0xff] }
 0x42b   :  { %v3679_v58 = vpop.eup %3678  ;;  %v3540_v57 = vld [vmem:[#allocation8 + $0x18] sm:$0xff]  }
 0x42c   :  { %v1119_v13 = vmul.f32 %v3679_v58, %v4484_v54  ;;  %3353 = vmatprep.subr.bf16.mxu0 %v3540_v57 }
 0x42d   :  { %3354 = vmatpush3.bf16.msra.mxu0 %v3540_v57 }
 0x42e   :  { %1231 = vxpose.xlu1.c.b16.cont [3/4] (short) (narrow) %v1126_v34, 64  ;;  %v1127_v61 = vpack.c.bf16 %v1119_v13, %v1118_v59  ;;  %v3541_v59 = vld [vmem:[#allocation8 + $0x10] sm:$0xff]  }
 0x42f   :  { %3355 = vmatprep.subr.bf16.mxu0 %v3541_v59 }
 0x431   :  { %3356 = vmatpush3.bf16.msra.mxu0 %v3541_v59 }
 0x432   :  { %1232 = vxpose.xlu1.c.b16.end [4/4] (short) (narrow) %v1127_v61, 64 }
 0x468   :  { %v1144_v56 = vpop.trf.xlu0 }
 0x469   :  { %3321 = vmatprep.mubr.msk.bf16.mxu1 %vm943_vm0, %v1144_v56  ;;  %v3828_v56 = vld [vmem:[#allocation2 + $0x70] sm:$0xff] }
 0x46c   :  { %v1145_v5 = vpop.trf.xlu0 }
 0x46d   :  { %3322 = vmatmul.mubr.msk.bf16.vlgmr.msra.gmra.mxu1 %vm943_vm0, %v1145_v5 }
 0x46e   :  { %3330 = vmatpush3.bf16.msra.mxu1 %v4366_v50 }
 0x46f   :  { %3331 = vmatprep.subr.bf16.mxu1 %v1134_v44 }
 0x470   :  { %v1146_v41 = vpop.trf.xlu0 }
 0x471   :  { %3325 = vmatprep.mubr.msk.bf16.mxu1 %vm943_vm0, %v1146_v41  ;;  %v3542_v41 = vld [vmem:[#allocation8 + $0x8] sm:$0xff]  }
 0x472   :  { %3332 = vmatpush3.bf16.msra.mxu1 %v1134_v44  ;;  %3357 = vmatprep.subr.bf16.mxu0 %v3542_v41 }
 0x473   :  { %3333 = vmatprep.subr.bf16.mxu1 %v4357_v3  ;;  %3358 = vmatpush3.bf16.msra.mxu0 %v3542_v41 }
 0x474   :  { %v1147_v43 = vpop.trf.xlu0 }
 0x475   :  { %3326 = vmatmul.mubr.msk.bf16.gmra.mxu1 %vm943_vm0, %v1147_v43 }
 0x476   :  { %3334 = vmatpush3.bf16.msra.mxu1 %v4357_v3  ;;  %v3816_v3 = vld [vmem:[#allocation2 + $0x10] sm:$0xff] }
 0x477   :  { %3335 = vmatprep.subr.bf16.mxu1 %v4359_v32 }
 0x47a   :  { %3336 = vmatpush3.bf16.msra.mxu1 %v4359_v32 }
 0x488   :  { %v1237_v53 = vpop.trf.xlu1 }
 0x489   :  { %3337 = vmatprep.mubr.msk.bf16.mxu1 %vm943_vm0, %v1237_v53  ;;  %v3829_v53 = vld [vmem:[#allocation2 + $0x60] sm:$0xff] }
 0x48c   :  { %v1238_v50 = vpop.trf.xlu1 }
 0x48d   :  { %3338 = vmatmul.mubr.msk.bf16.vlgmr.msra.gmra.mxu1 %vm943_vm0, %v1238_v50 }
 0x490   :  { %v1239_v60 = vpop.trf.xlu1 }
 0x491   :  { %3341 = vmatprep.mubr.msk.bf16.mxu1 %vm943_vm0, %v1239_v60  ;;  %v3830_v60 = vld [vmem:[#allocation2 + $0x78] sm:$0xff] }
 0x494   :  { %v1240_v54 = vpop.trf.xlu1 }
 0x495   :  { %3342 = vmatmul.mubr.msk.bf16.gmra.mxu1 %vm943_vm0, %v1240_v54 }
 0x496   :  { %1890 = vmatprep.mubr.bf16.mxu1 %v4015_v47  ;;  %v3819_v47 = vld [vmem:[#allocation2 + $0x8] sm:$0xff] }
 0x52d   :  { %v3323_v26 = vpop.f32.mrf.mxu1 }
 0x52e   :  { %v4520_v7 = vadd.f32 %v3816_v3, %v3323_v26  ;;  %v3543_v26 = vld [vmem:[#allocation8] sm:$0xff]  }
 0x52f   :  { %v1198_v31 = vpop.f32.mrf.mxu1  ;;  %3359 = vmatprep.subr.bf16.mxu0 %v3543_v26 }
 0x530   :  { %1344 = vadd.xlane.f32.xlu0 %v4520_v7  ;;  %v4523_v8 = vadd.f32 %v3817_v1, %v1198_v31  ;;  %v1374_v16 = vmul.f32 %v4520_v7, %v4520_v7  ;;  %v3831_v31 = vld [vmem:[#allocation2 + $0x68] sm:$0xff]  ;;  %3360 = vmatpush3.bf16.msra.mxu0 %v3543_v26 }
 0x531   :  { %v3324_v32 = vpop.f32.mrf.mxu1 }
 0x532   :  { %v4525_v33 = vadd.f32 %v3818_v30, %v3324_v32  ;;  %v1372_v23 = vmul.f32 %v4523_v8, %v4523_v8 }
 0x533   :  { %v1201_v11 = vpop.f32.mrf.mxu1 }
 0x534   :  { %1340 = vadd.xlane.f32.xlu0 %v4523_v8  ;;  %1346 = vadd.xlane.f32.xlu1 %v4525_v33  ;;  %v4529_v12 = vadd.f32 %v3819_v47, %v1201_v11  ;;  %v1375_v10 = vmul.f32 %v4525_v33, %v4525_v33 }
 0x535   :  { %v3327_v19 = vpop.f32.mrf.mxu1 }
 0x536   :  { %v4538_v40 = vadd.f32 %v3820_v0, %v3327_v19  ;;  %v1373_v28 = vmul.f32 %v4529_v12, %v4529_v12  ;;  %v3544_v19 = vld [vmem:[#allocation10 + $0x70] ss:$8 sps:$4 sm:$0xff]  }
 0x537   :  { %v1214_v4 = vpop.f32.mrf.mxu1  ;;  %v3550_v0 = vld [vmem:[#allocation10 + $0x50] ss:$8 sps:$4 sm:$0xff]  }
 0x538   :  { %1392 = vadd.xlane.f32.xlu0 %v1374_v16  ;;  %1342 = vadd.xlane.f32.xlu1 %v4529_v12  ;;  %v4543_v55 = vadd.f32 %v3821_v18, %v1214_v4  ;;  %v1378_v37 = vmul.f32 %v4538_v40, %v4538_v40  ;;  %v3546_v16 = vld [vmem:[#allocation10 + $0x74] ss:$8 sps:$4 sm:$0xff]  }
 0x539   :  { %v3328_v29 = vpop.f32.mrf.mxu1  ;;  %1858 = vmatprep.subr.bf16.mxu1 %v3546_v16  ;;  %v3552_v4 = vld [vmem:[#allocation10 + $0x54] ss:$8 sps:$4 sm:$0xff]  }
 0x53a   :  { %v4545_v36 = vadd.f32 %v3822_v62, %v3328_v29  ;;  %v1376_v51 = vmul.f32 %v4543_v55, %v4543_v55  ;;  %1859 = vmatpush1.bf16.msra.mxu1 %v3544_v19  ;;  %v3553_v29 = vld [vmem:[#allocation10 + $0x40] ss:$8 sps:$4 sm:$0xff]   ;;  %v3558_v18 = vld [vmem:[#allocation10 + $0x34] ss:$8 sps:$4 sm:$0xff]   ;;  %v3556_v62 = vld [vmem:[#allocation10 + $0x30] ss:$8 sps:$4 sm:$0xff]  }
 0x53b   :  { %v1217_v24 = vpop.f32.mrf.mxu1 }
 0x53c   :  { %1388 = vadd.xlane.f32.xlu0 %v1372_v23  ;;  %1394 = vadd.xlane.f32.xlu1 %v1375_v10  ;;  %v4549_v14 = vadd.f32 %v3823_v63, %v1217_v24  ;;  %v1379_v2 = vmul.f32 %v4545_v36, %v4545_v36  ;;  %v3549_v23 = vld [vmem:[#allocation10 + $0x64] ss:$8 sps:$4 sm:$0xff]   ;;  %v3547_v10 = vld [vmem:[#allocation10 + $0x60] ss:$8 sps:$4 sm:$0xff]  }
 0x53d   :  { %1860 = vmatprep.subr.bf16.mxu1 %v3549_v23  ;;  %v3559_v24 = vld [vmem:[#allocation10 + $0x20] ss:$8 sps:$4 sm:$0xff]   ;;  %v3561_v63 = vld [vmem:[#allocation10 + $0x24] ss:$8 sps:$4 sm:$0xff]  }
 0x53e   :  { %v1377_v27 = vmul.f32 %v4549_v14, %v4549_v14  ;;  %1861 = vmatpush1.bf16.msra.mxu1 %v3547_v10 }
 0x53f   :  { %1862 = vmatprep.subr.bf16.mxu1 %v3552_v4 }
 0x540   :  { %1352 = vadd.xlane.f32.xlu0 %v4538_v40  ;;  %1390 = vadd.xlane.f32.xlu1 %v1373_v28  ;;  %v3555_v28 = vld [vmem:[#allocation10 + $0x44] ss:$8 sps:$4 sm:$0xff]  }
 0x542   :  { %1863 = vmatpush1.bf16.msra.mxu1 %v3550_v0 }
 0x543   :  { %1864 = vmatprep.subr.bf16.mxu1 %v3555_v28 }
 0x544   :  { %1348 = vadd.xlane.f32.xlu0 %v4543_v55  ;;  %1354 = vadd.xlane.f32.xlu1 %v4545_v36 }
 0x546   :  { %1865 = vmatpush1.bf16.msra.mxu1 %v3553_v29 }
 0x547   :  { %1866 = vmatprep.subr.bf16.mxu1 %v3558_v18 }
 0x548   :  { %1400 = vadd.xlane.f32.xlu0 %v1378_v37  ;;  %1350 = vadd.xlane.f32.xlu1 %v4549_v14  ;;  %v3564_v37 = vld [vmem:[#allocation10 + $0x14] ss:$8 sps:$4 sm:$0xff]  }
 0x54a   :  { %1867 = vmatpush1.bf16.msra.mxu1 %v3556_v62 }
 0x54b   :  { %1868 = vmatprep.subr.bf16.mxu1 %v3561_v63 }
 0x54c   :  { %1396 = vadd.xlane.f32.xlu0 %v1376_v51  ;;  %1402 = vadd.xlane.f32.xlu1 %v1379_v2  ;;  %v3567_v51 = vld [vmem:[#allocation10 + $0x4] ss:$8 sps:$4 sm:$0xff]   ;;  %v3565_v2 = vld [vmem:[#allocation10] ss:$8 sps:$4 sm:$0xff]  }
 0x54d   :  { %v3339_v9 = vpop.f32.mrf.mxu1 }
 0x54e   :  { %v4558_v35 = vadd.f32 %v3824_v48, %v3339_v9  ;;  %1869 = vmatpush1.bf16.msra.mxu1 %v3559_v24  ;;  %v164_v9 = vld [vmem:[#allocation5 + $0x8] sm:$0xff] }
 0x54f   :  { %v1291_v20 = vpop.f32.mrf.mxu1  ;;  %1870 = vmatprep.subr.bf16.mxu1 %v3564_v37  ;;  %v1761_v48 = vpack.c.bf16 %v164_v9, %v163_v39 }
 0x550   :  { %1398 = vadd.xlane.f32.xlu1 %v1377_v27  ;;  %1360 = vadd.xlane.f32.xlu0 %v4558_v35  ;;  %v4563_v49 = vadd.f32 %v3825_v25, %v1291_v20  ;;  %v1382_v52 = vmul.f32 %v4558_v35, %v4558_v35 }
 0x551   :  { %v3340_v21 = vpop.f32.mrf.mxu1 }
 0x552   :  { %v4565_v38 = vadd.f32 %v3826_v22, %v3340_v21  ;;  %v1380_v34 = vmul.f32 %v4563_v49, %v4563_v49  ;;  %1871 = vmatpush1.bf16.msra.mxu1 %v3562_v15 }
 0x553   :  { %v1294_v42 = vpop.f32.mrf.mxu1  ;;  %1872 = vmatprep.subr.bf16.mxu1 %v3567_v51 }
 0x554   :  { %1356 = vadd.xlane.f32.xlu0 %v4563_v49  ;;  %1362 = vadd.xlane.f32.xlu1 %v4565_v38  ;;  %v4569_v46 = vadd.f32 %v3827_v45, %v1294_v42  ;;  %v1383_v13 = vmul.f32 %v4565_v38, %v4565_v38 }
 0x555   :  { %v3343_v58 = vpop.f32.mrf.mxu1 }
 0x556   :  { %v4578_v5 = vadd.f32 %v3828_v56, %v3343_v58  ;;  %v1381_v44 = vmul.f32 %v4569_v46, %v4569_v46  ;;  %1873 = vmatpush1.bf16.msra.mxu1 %v3565_v2 }
 0x557   :  { %v1307_v61 = vpop.f32.mrf.mxu1 }
 0x558   :  { %1408 = vadd.xlane.f32.xlu0 %v1382_v52  ;;  %1358 = vadd.xlane.f32.xlu1 %v4569_v46  ;;  %v4583_v50 = vadd.f32 %v3829_v53, %v1307_v61  ;;  %v1386_v30 = vmul.f32 %v4578_v5, %v4578_v5 }
 0x559   :  { %v3344_v43 = vpop.f32.mrf.mxu1  ;;  %1891 = vmatmul.mubr.bf16.vlgmr.msra.gmra.mxu1 %v1761_v48 }
 0x55a   :  { %v4585_v54 = vadd.f32 %v3830_v60, %v3344_v43  ;;  %v1384_v1 = vmul.f32 %v4583_v50, %v4583_v50 }
 0x55b   :  { %v1310_v3 = vpop.f32.mrf.mxu1 }
 0x55c   :  { %1404 = vadd.xlane.f32.xlu0 %v1380_v34  ;;  %1410 = vadd.xlane.f32.xlu1 %v1383_v13  ;;  %v4589_v32 = vadd.f32 %v3831_v31, %v1310_v3  ;;  %v1387_v47 = vmul.f32 %v4585_v54, %v4585_v54 }
 0x55e   :  { %v1385_v11 = vmul.f32 %v4589_v32, %v4589_v32 }
 0x560   :  { %1406 = vadd.xlane.f32.xlu1 %v1381_v44  ;;  %1368 = vadd.xlane.f32.xlu0 %v4578_v5 }
 0x564   :  { %1364 = vadd.xlane.f32.xlu0 %v4583_v50  ;;  %1370 = vadd.xlane.f32.xlu1 %v4585_v54 }
 0x568   :  { %1412 = vadd.xlane.f32.xlu0 %v1384_v1  ;;  %1366 = vadd.xlane.f32.xlu1 %v4589_v32 }
 0x56c   :  { %1416 = vadd.xlane.f32.xlu0 %v1386_v30  ;;  %1414 = vadd.xlane.f32.xlu1 %v1385_v11 }
 0x570   :  { %1418 = vadd.xlane.f32.xlu1 %v1387_v47 }
 0x5b9   :  { %v1345_v27 = vpop.xlane.xlu0 %1344 }
 0x5ba   :  { %v4600_v21 = vmul.f32 0.03125, %v1345_v27 }
 0x5bc   :  { %v1454_v42 = vmul.f32 %v4600_v21, %v4600_v21 }
 0x5bd   :  { %v1341_v6 = vpop.xlane.xlu0 %1340  ;;  %v1347_v20 = vpop.xlane.xlu1 %1346 }
 0x5be   :  { %v4602_v25 = vmul.f32 0.03125, %v1341_v6  ;;  %v1423_v45 = vmul.f32 0.03125, %v1347_v20 }
 0x5c0   :  { %v1452_v58 = vmul.f32 %v4602_v25, %v4602_v25  ;;  %v1455_v59 = vmul.f32 %v1423_v45, %v1423_v45 }
 0x5c1   :  { %v1393_v22 = vpop.xlane.xlu0 %1392  ;;  %v1343_v17 = vpop.xlane.xlu1 %1342 }
 0x5c2   :  { %v1438_v52 = vmul.f32 0.03125, %v1393_v22  ;;  %v4608_v61 = vmul.f32 0.03125, %v1343_v17  ;;  %v1486_v22 = vsub.f32 %v4520_v7, %v4600_v21  ;;  %v1484_v17 = vsub.f32 %v4523_v8, %v4602_v25 }
 0x5c4   :  { %v1470_v57 = vsub.f32 %v1438_v52, %v1454_v42  ;;  %v1453_v3 = vmul.f32 %v4608_v61, %v4608_v61  ;;  %v1487_v42 = vsub.f32 %v4525_v33, %v1423_v45  ;;  %v1485_v21 = vsub.f32 %v4529_v12, %v4608_v61 }
 0x5c5   :  { %v1389_v34 = vpop.xlane.xlu0 %1388  ;;  %v1395_v13 = vpop.xlane.xlu1 %1394 }
 0x5c6   :  { %v1436_v56 = vmul.f32 0.03125, %v1389_v34  ;;  %v1439_v44 = vmul.f32 0.03125, %v1395_v13  ;;  %v1502_v41 = vadd.f32 1e-05, %v1470_v57 }
 0x5c8   :  { %v1468_v43 = vsub.f32 %v1436_v56, %v1452_v58  ;;  %v1471_v53 = vsub.f32 %v1439_v44, %v1455_v59  ;;  %3680 = vrsqrt.f32 %v1502_v41 }
 0x5c9   :  { %v1353_v60 = vpop.xlane.xlu0 %1352  ;;  %v1391_v26 = vpop.xlane.xlu1 %1390 }
 0x5ca   :  { %v1500_v31 = vadd.f32 1e-05, %v1468_v43  ;;  %v1503_v1 = vadd.f32 1e-05, %v1471_v53  ;;  %v1437_v30 = vmul.f32 0.03125, %v1391_v26  ;;  %v4612_v19 = vmul.f32 0.03125, %v1353_v60 }
 0x5cb   :  { %v4638_v26 = vld [vmem:[%s5039_s7] ss:$0 sm:$0xff] }
 0x5cc   :  { %3682 = vrsqrt.f32 %v1500_v31  ;;  %v1469_v11 = vsub.f32 %v1437_v30, %v1453_v3  ;;  %v1458_v28 = vmul.f32 %v4612_v19, %v4612_v19 }
 0x5cd   :  { %3684 = vrsqrt.f32 %v1503_v1  ;;  %v1349_v47 = vpop.xlane.xlu0 %1348  ;;  %v1355_v16 = vpop.xlane.xlu1 %1354 }
 0x5ce   :  { %v1501_v23 = vadd.f32 1e-05, %v1469_v11  ;;  %v4614_v10 = vmul.f32 0.03125, %v1349_v47  ;;  %v4618_v29 = vmul.f32 0.03125, %v1355_v16 }
 0x5d0   :  { %3686 = vrsqrt.f32 %v1501_v23  ;;  %v1456_v24 = vmul.f32 %v4614_v10, %v4614_v10  ;;  %v1459_v15 = vmul.f32 %v4618_v29, %v4618_v29 }
 0x5d1   :  { %v1401_v4 = vpop.xlane.xlu0 %1400  ;;  %v1351_v0 = vpop.xlane.xlu1 %1350 }
 0x5d2   :  { %v1442_v18 = vmul.f32 0.03125, %v1401_v4  ;;  %v4624_v51 = vmul.f32 0.03125, %v1351_v0  ;;  %v4652_v0 = vld [vmem:[%s5040_s8] ss:$0 sm:$0xff] }
 0x5d4   :  { %v1474_v62 = vsub.f32 %v1442_v18, %v1458_v28  ;;  %v1457_v34 = vmul.f32 %v4624_v51, %v4624_v51 }
 0x5d5   :  { %v1397_v63 = vpop.xlane.xlu0 %1396  ;;  %v1403_v37 = vpop.xlane.xlu1 %1402 }
 0x5d6   :  { %v1440_v2 = vmul.f32 0.03125, %v1397_v63  ;;  %v1443_v39 = vmul.f32 0.03125, %v1403_v37  ;;  %v1506_v9 = vadd.f32 1e-05, %v1474_v62  ;;  %v3681_v48 = vpop.eup %3680 }
 0x5d7   :  { %v1534_v43 = vmul.f32 %v3681_v48, %v1486_v22 }
 0x5d8   :  { %v1472_v27 = vsub.f32 %v1440_v2, %v1456_v24  ;;  %v1475_v6 = vsub.f32 %v1443_v39, %v1459_v15  ;;  %3688 = vrsqrt.f32 %v1506_v9 }
 0x5d9   :  { %v3683_v20 = vpop.eup %3682  ;;  %v1361_v52 = vpop.xlane.xlu0 %1360  ;;  %v1556_v61 = vmul.f32 %v4638_v26, %v1534_v43 }
 0x5da   :  { %v1399_v57 = vpop.xlane.xlu1 %1398  ;;  %v3685_v58 = vpop.eup %3684  ;;  %v1504_v13 = vadd.f32 1e-05, %v1472_v27  ;;  %v1507_v59 = vadd.f32 1e-05, %v1475_v6  ;;  %v1532_v41 = vmul.f32 %v3683_v20, %v1484_v17  ;;  %v4640_v3 = vmul.f32 0.03125, %v1361_v52 }
 0x5db   :  { %v1441_v56 = vmul.f32 0.03125, %v1399_v57  ;;  %v1535_v44 = vmul.f32 %v3685_v58, %v1487_v42  ;;  %v1578_v2 = vadd.f32 %v4652_v0, %v1556_v61 }
 0x5dc   :  { %3690 = vrsqrt.f32 %v1504_v13  ;;  %v1554_v11 = vmul.f32 %v4638_v26, %v1532_v41  ;;  %v1462_v18 = vmul.f32 %v4640_v3, %v4640_v3 }
 0x5dd   :  { %v1473_v25 = vsub.f32 %v1441_v56, %v1457_v34  ;;  %v3687_v53 = vpop.eup %3686  ;;  %3692 = vrsqrt.f32 %v1507_v59  ;;  %v1357_v45 = vpop.xlane.xlu0 %1356  ;;  %v1557_v30 = vmul.f32 %v4638_v26, %v1535_v44  ;;  %v1490_v59 = vsub.f32 %v4538_v40, %v4612_v19 }
 0x5de   :  { %v1363_v60 = vpop.xlane.xlu1 %1362  ;;  %v1533_v1 = vmul.f32 %v3687_v53, %v1485_v21  ;;  %v4645_v47 = vmul.f32 0.03125, %v1357_v45  ;;  %v1576_v63 = vadd.f32 %v4652_v0, %v1554_v11  ;;  %v1488_v56 = vsub.f32 %v4543_v55, %v4614_v10 }
 0x5df   :  { %v1505_v31 = vadd.f32 1e-05, %v1473_v25  ;;  %v4647_v16 = vmul.f32 0.03125, %v1363_v60  ;;  %v1579_v24 = vadd.f32 %v4652_v0, %v1557_v30  ;;  %v1491_v44 = vsub.f32 %v4545_v36, %v4618_v29 }
 0x5e0   :  { %v1555_v28 = vmul.f32 %v4638_v26, %v1533_v1  ;;  %v1460_v39 = vmul.f32 %v4645_v47, %v4645_v47  ;;  %v1489_v19 = vsub.f32 %v4549_v14, %v4624_v51 }
 0x5e1   :  { %3694 = vrsqrt.f32 %v1505_v31  ;;  %v1409_v23 = vpop.xlane.xlu0 %1408  ;;  %v1463_v9 = vmul.f32 %v4647_v16, %v4647_v16  ;;  %v1593_v42 = vpack.c.bf16 %v1579_v24, %v1578_v2 }
 0x5e2   :  { %v1359_v4 = vpop.xlane.xlu1 %1358  ;;  %v1446_v62 = vmul.f32 0.03125, %v1409_v23  ;;  %v1577_v37 = vadd.f32 %v4652_v0, %v1555_v28 }
 0x5e3   :  { %v4665_v20 = vmul.f32 0.03125, %v1359_v4 }
 0x5e4   :  { %v1478_v15 = vsub.f32 %v1446_v62, %v1462_v18  ;;  %v1592_v6 = vpack.c.bf16 %v1577_v37, %v1576_v63 }
 0x5e5   :  { %v1405_v48 = vpop.xlane.xlu0 %1404  ;;  %v3689_v57 = vpop.eup %3688  ;;  %v1461_v25 = vmul.f32 %v4665_v20, %v4665_v20 }
 0x5e6   :  { %v1411_v27 = vpop.xlane.xlu1 %1410  ;;  %v1444_v22 = vmul.f32 0.03125, %v1405_v48  ;;  %v1510_v52 = vadd.f32 1e-05, %v1478_v15  ;;  %3361 = vmatprep.mubr.bf16.mxu0 %v1592_v6  ;;  %v1538_v1 = vmul.f32 %v3689_v57, %v1490_v59 }
 0x5e7   :  { %v1447_v17 = vmul.f32 0.03125, %v1411_v27  ;;  %3362 = vmatmul.mubr.bf16.vlgmr.msra.gmra.mxu0 %v1593_v42 }
 0x5e8   :  { %v1476_v58 = vsub.f32 %v1444_v22, %v1460_v39  ;;  %3696 = vrsqrt.f32 %v1510_v52  ;;  %v1560_v24 = vmul.f32 %v4638_v26, %v1538_v1 }
 0x5e9   :  { %v1479_v34 = vsub.f32 %v1447_v17, %v1463_v9  ;;  %v3691_v13 = vpop.eup %3690  ;;  %v1369_v41 = vpop.xlane.xlu0 %1368 }
 0x5ea   :  { %v1407_v43 = vpop.xlane.xlu1 %1406  ;;  %v3693_v21 = vpop.eup %3692  ;;  %v1508_v53 = vadd.f32 1e-05, %v1476_v58  ;;  %v1536_v31 = vmul.f32 %v3691_v13, %v1488_v56  ;;  %v4682_v63 = vmul.f32 0.03125, %v1369_v41  ;;  %v1582_v22 = vadd.f32 %v4652_v0, %v1560_v24 }
 0x5eb   :  { %v1511_v45 = vadd.f32 1e-05, %v1479_v34  ;;  %v1445_v60 = vmul.f32 0.03125, %v1407_v43  ;;  %v1539_v30 = vmul.f32 %v3693_v21, %v1491_v44  ;;  %v1492_v21 = vsub.f32 %v4563_v49, %v4645_v47 }
 0x5ec   :  { %3698 = vrsqrt.f32 %v1508_v53  ;;  %v1558_v62 = vmul.f32 %v4638_v26, %v1536_v31  ;;  %v1466_v42 = vmul.f32 %v4682_v63, %v4682_v63  ;;  %v1495_v31 = vsub.f32 %v4565_v38, %v4647_v16 }
 0x5ed   :  { %v1477_v10 = vsub.f32 %v1445_v60, %v1461_v25  ;;  %3700 = vrsqrt.f32 %v1511_v45  ;;  %v1365_v29 = vpop.xlane.xlu0 %1364  ;;  %v1561_v23 = vmul.f32 %v4638_v26, %v1539_v30  ;;  %v1494_v60 = vsub.f32 %v4558_v35, %v4640_v3 }
 0x5ee   :  { %v3695_v11 = vpop.eup %3694  ;;  %v1371_v61 = vpop.xlane.xlu1 %1370  ;;  %v4678_v28 = vmul.f32 0.03125, %v1365_v29  ;;  %v1580_v27 = vadd.f32 %v4652_v0, %v1558_v62 }
 0x5ef   :  { %v1509_v4 = vadd.f32 1e-05, %v1477_v10  ;;  %v1537_v18 = vmul.f32 %v3695_v11, %v1489_v19  ;;  %v1583_v2 = vadd.f32 %v4652_v0, %v1561_v23  ;;  %v1435_v52 = vmul.f32 0.03125, %v1371_v61 }
 0x5f0   :  { %v1464_v39 = vmul.f32 %v4678_v28, %v4678_v28 }
 0x5f1   :  { %3702 = vrsqrt.f32 %v1509_v4  ;;  %v1413_v51 = vpop.xlane.xlu0 %1412  ;;  %v1559_v15 = vmul.f32 %v4638_v26, %v1537_v18  ;;  %v1595_v13 = vpack.c.bf16 %v1583_v2, %v1582_v22  ;;  %v1467_v1 = vmul.f32 %v1435_v52, %v1435_v52 }
 0x5f2   :  { %v1367_v37 = vpop.xlane.xlu1 %1366  ;;  %v1448_v9 = vmul.f32 0.03125, %v1413_v51  ;;  %v1493_v4 = vsub.f32 %v4569_v46, %v4665_v20  ;;  %v1496_v22 = vsub.f32 %v4583_v50, %v4678_v28 }
 0x5f3   :  { %v4688_v48 = vmul.f32 0.03125, %v1367_v37  ;;  %v1581_v6 = vadd.f32 %v4652_v0, %v1559_v15 }
 0x5f4   :  { %v1480_v17 = vsub.f32 %v1448_v9, %v1464_v39 }
 0x5f5   :  { %v1417_v57 = vpop.xlane.xlu0 %1416  ;;  %v1594_v34 = vpack.c.bf16 %v1581_v6, %v1580_v27  ;;  %v1465_v56 = vmul.f32 %v4688_v48, %v4688_v48  ;;  %v3697_v43 = vpop.eup %3696 }
 0x5f6   :  { %v1415_v58 = vpop.xlane.xlu1 %1414  ;;  %v1512_v59 = vadd.f32 1e-05, %v1480_v17  ;;  %v1450_v44 = vmul.f32 0.03125, %v1417_v57  ;;  %v1542_v23 = vmul.f32 %v3697_v43, %v1494_v60  ;;  %v1498_v57 = vsub.f32 %v4578_v5, %v4682_v63 }
 0x5f7   :  { %v1449_v41 = vmul.f32 0.03125, %v1415_v58  ;;  %3365 = vmatprep.mubr.bf16.mxu0 %v1594_v34  ;;  %v1497_v34 = vsub.f32 %v4589_v32, %v4688_v48 }
 0x5f8   :  { %3704 = vrsqrt.f32 %v1512_v59  ;;  %v1482_v25 = vsub.f32 %v1450_v44, %v1466_v42  ;;  %3366 = vmatmul.mubr.bf16.gmra.mxu0 %v1595_v13  ;;  %v1564_v37 = vmul.f32 %v4638_v26, %v1542_v23 }
 0x5f9   :  { %v1481_v53 = vsub.f32 %v1449_v41, %v1465_v56  ;;  %v3699_v45 = vpop.eup %3698  ;;  %v1499_v41 = vsub.f32 %v4585_v54, %v1435_v52  ;;  %v4016_v52 = vmov 0.0  }
 0x5fa   :  { %v1419_v30 = vpop.xlane.xlu1 %1418  ;;  %v3701_v19 = vpop.eup %3700  ;;  %v1514_v10 = vadd.f32 1e-05, %v1482_v25  ;;  %v1540_v61 = vmul.f32 %v3699_v45, %v1492_v21  ;;  %v1586_v9 = vadd.f32 %v4652_v0, %v1564_v37  ;;  %3377 = vmatprep.subr.bf16.mxu0 %v4016_v52  ;;  %3389 = vmatprep.subr.bf16.mxu1 %v4016_v52 }
 0x5fb   :  { %v1513_v11 = vadd.f32 1e-05, %v1481_v53  ;;  %v1451_v29 = vmul.f32 0.03125, %v1419_v30  ;;  %v1543_v47 = vmul.f32 %v3701_v19, %v1495_v31  ;;  %3397 = vmatprep.mubr.msk.bf16.mxu1 %vm4017_vm1, %v4016_v52 }
 0x5fc   :  { %3706 = vrsqrt.f32 %v1514_v10  ;;  %v1562_v51 = vmul.f32 %v4638_v26, %v1540_v61 }
 0x5fd   :  { %v1483_v18 = vsub.f32 %v1451_v29, %v1467_v1  ;;  %3708 = vrsqrt.f32 %v1513_v11  ;;  %v1565_v3 = vmul.f32 %v4638_v26, %v1543_v47 }
 0x5fe   :  { %v3703_v62 = vpop.eup %3702  ;;  %v1584_v39 = vadd.f32 %v4652_v0, %v1562_v51 }
 0x5ff   :  { %v1515_v24 = vadd.f32 1e-05, %v1483_v18  ;;  %v1541_v16 = vmul.f32 %v3703_v62, %v1493_v4  ;;  %v1587_v2 = vadd.f32 %v4652_v0, %v1565_v3 }
 0x601   :  { %3710 = vrsqrt.f32 %v1515_v24  ;;  %v1563_v15 = vmul.f32 %v4638_v26, %v1541_v16  ;;  %v1597_v17 = vpack.c.bf16 %v1587_v2, %v1586_v9 }
 0x603   :  { %v1585_v20 = vadd.f32 %v4652_v0, %v1563_v15 }
 0x605   :  { %v1596_v27 = vpack.c.bf16 %v1585_v20, %v1584_v39  ;;  %v3705_v6 = vpop.eup %3704 }
 0x606   :  { %v1544_v42 = vmul.f32 %v3705_v6, %v1496_v22 }
 0x607   :  { %3369 = vmatprep.mubr.bf16.mxu0 %v1596_v27 }
 0x608   :  { %3370 = vmatmul.mubr.bf16.gmra.mxu0 %v1597_v17  ;;  %v1566_v44 = vmul.f32 %v4638_v26, %v1544_v42 }
 0x609   :  { %v3707_v58 = vpop.eup %3706 }
 0x60a   :  { %v3709_v13 = vpop.eup %3708  ;;  %v1546_v59 = vmul.f32 %v3707_v58, %v1498_v57  ;;  %v1588_v53 = vadd.f32 %v4652_v0, %v1566_v44 }
 0x60b   :  { %v1545_v56 = vmul.f32 %v3709_v13, %v1497_v34 }
 0x60c   :  { %v1568_v25 = vmul.f32 %v4638_v26, %v1546_v59 }
 0x60d   :  { %v1567_v28 = vmul.f32 %v4638_v26, %v1545_v56 }
 0x60e   :  { %v3711_v43 = vpop.eup %3710  ;;  %v1590_v60 = vadd.f32 %v4652_v0, %v1568_v25 }
 0x60f   :  { %v1547_v21 = vmul.f32 %v3711_v43, %v1499_v41  ;;  %v1589_v63 = vadd.f32 %v4652_v0, %v1567_v28 }
 0x611   :  { %v1569_v45 = vmul.f32 %v4638_v26, %v1547_v21  ;;  %v1598_v48 = vpack.c.bf16 %v1589_v63, %v1588_v53 }
 0x613   :  { %v1591_v31 = vadd.f32 %v4652_v0, %v1569_v45  ;;  %3373 = vmatprep.mubr.bf16.mxu0 %v1598_v48 }
 0x615   :  { %v1599_v1 = vpack.c.bf16 %v1591_v31, %v1590_v60 }
 0x617   :  { %3374 = vmatmul.mubr.bf16.gmra.mxu0 %v1599_v1 }
 0x618   :  { %3385 = vmatprep.mubr.msk.bf16.mxu0 %vm4017_vm1, %v4016_v52 }
 0x619   :  { %v1892_v3 = vpop.f32.mrf.mxu1 }
 0x61a   :  { %v1901_v9 = vpack.c.bf16 %v1892_v3, %v1892_v3 }
 0x61b   :  { %v1894_v16 = vpop.f32.mrf.mxu1 }
 0x61c   :  { %v2015_v37 = vpack.c.bf16 %v1894_v16, %v1894_v16 }
 0x61d   :  { %v1896_v57 = vpop.f32.mrf.mxu1 }
 0x61e   :  { %v2048_v6 = vsel %vm2046_vm2, %v2015_v37, 0  ;;  %v1902_v59 = vpack.c.bf16 %v1896_v57, %v1896_v57 }
 0x61f   :  { %v1898_v58 = vpop.f32.mrf.mxu1 }
 0x620   :  { %v2016_v13 = vpack.c.bf16 %v1898_v58, %v1898_v58 }
 0x622   :  { %v2144_v56 = vsel %vm2046_vm2, %v2016_v13, 0 }
 0x6a7   :  { %v3363_v30 = vpop.f32.mrf.mxu0 }
 0x6a9   :  { %v1698_v19 = vpop.f32.mrf.mxu0 }
 0x6ab   :  { %v3364_v10 = vpop.f32.mrf.mxu0 }
 0x6ac   :  { %v1904_v62 = vpack.c.bf16 %v3364_v10, %v3363_v30 }
 0x6ad   :  { %v1701_v11 = vpop.f32.mrf.mxu0 }
 0x6ae   :  { %v1903_v15 = vpack.c.bf16 %v1701_v11, %v1698_v19 }
 0x6b8   :  { %v3367_v29 = vpop.f32.mrf.mxu0 }
 0x6ba   :  { %v1714_v26 = vpop.f32.mrf.mxu0 }
 0x6bc   :  { %v3368_v61 = vpop.f32.mrf.mxu0 }
 0x6bd   :  { %v1906_v23 = vpack.c.bf16 %v3368_v61, %v3367_v29 }
 0x6be   :  { %v1717_v0 = vpop.f32.mrf.mxu0 }
 0x6bf   :  { %3378 = vmatpush3.bf16.xpose.msra.mxu0 %v1906_v23  ;;  %v1905_v47 = vpack.c.bf16 %v1717_v0, %v1714_v26 }
 0x6c0   :  { %3379 = vmatprep.subr.bf16.mxu0 %v4016_v52 }
 0x6c7   :  { %3380 = vmatpush3.bf16.xpose.msra.mxu0 %v1905_v47 }
 0x6c8   :  { %v3371_v4 = vpop.f32.mrf.mxu0  ;;  %3381 = vmatprep.subr.bf16.mxu0 %v4016_v52 }
 0x6ca   :  { %v1730_v18 = vpop.f32.mrf.mxu0 }
 0x6cc   :  { %v3372_v24 = vpop.f32.mrf.mxu0 }
 0x6cd   :  { %v1908_v42 = vpack.c.bf16 %v3372_v24, %v3371_v4 }
 0x6ce   :  { %v1733_v51 = vpop.f32.mrf.mxu0 }
 0x6cf   :  { %3382 = vmatpush3.bf16.xpose.msra.mxu0 %v1904_v62  ;;  %v1907_v34 = vpack.c.bf16 %v1733_v51, %v1730_v18 }
 0x6d0   :  { %3383 = vmatprep.subr.bf16.mxu0 %v4016_v52 }
 0x6d7   :  { %v3375_v2 = vpop.f32.mrf.mxu0  ;;  %3384 = vmatpush3.bf16.xpose.msra.mxu0 %v1903_v15 }
 0x6d8   :  { %3485 = vmatprep.subr.msk.bf16.mxu0 %vm2046_vm2, %v2015_v37 }
 0x6d9   :  { %v1746_v39 = vpop.f32.mrf.mxu0 }
 0x6db   :  { %v3376_v20 = vpop.f32.mrf.mxu0 }
 0x6dc   :  { %v1910_v27 = vpack.c.bf16 %v3376_v20, %v3375_v2 }
 0x6dd   :  { %v1749_v22 = vpop.f32.mrf.mxu0 }
 0x6de   :  { %3390 = vmatpush3.bf16.xpose.msra.mxu1 %v1910_v27  ;;  %3386 = vmatmul.mubr.bf16.vlgmr.msra.gmra.mxu0 %v1901_v9  ;;  %v1909_v17 = vpack.c.bf16 %v1749_v22, %v1746_v39 }
 0x6df   :  { %3391 = vmatprep.subr.bf16.mxu1 %v4016_v52  ;;  %3402 = vmatpush3.bf16.msra.mxu0 %v2048_v6 }
 0x6e6   :  { %3392 = vmatpush3.bf16.xpose.msra.mxu1 %v1909_v17 }
 0x6e7   :  { %3393 = vmatprep.subr.bf16.mxu1 %v4016_v52 }
 0x6ee   :  { %3394 = vmatpush3.bf16.xpose.msra.mxu1 %v1908_v42 }
 0x6ef   :  { %3395 = vmatprep.subr.bf16.mxu1 %v4016_v52 }
 0x6f6   :  { %3396 = vmatpush3.bf16.xpose.msra.mxu1 %v1907_v34 }
 0x6f7   :  { %3486 = vmatprep.subr.msk.bf16.mxu1 %vm2046_vm2, %v2016_v13 }
 0x6fd   :  { %3398 = vmatmul.mubr.bf16.vlgmr.msra.gmra.mxu1 %v1902_v59 }
 0x6fe   :  { %3412 = vmatpush3.bf16.msra.mxu1 %v2144_v56 }
 0x79e   :  { %v1945_v44 = vpop.f32.mrf.mxu0 }
 0x79f   :  { %v1991_v41 = vsel %vm943_vm0, %v1945_v44, -inf }
 0x7a0   :  { %1992 = vmax.xlane.f32.xlu0 %v1991_v41  ;;  %v3387_v43 = vpop.f32.mrf.mxu0 }
 0x7a2   :  { %v1948_v28 = vpop.f32.mrf.mxu0 }
 0x7a4   :  { %v3388_v21 = vpop.f32.mrf.mxu0 }
 0x7a5   :  { %v3568_v21 = vld [vmem:[#allocation11 + $0x38] sm:$0xff]  }
 0x7a6   :  { %3421 = vmatprep.subr.bf16.mxu0 %v3568_v21 }
 0x7bd   :  { %v1985_v25 = vpop.f32.mrf.mxu1 }
 0x7be   :  { %v1994_v53 = vsel %vm943_vm0, %v1985_v25, -inf }
 0x7bf   :  { %1995 = vmax.xlane.f32.xlu1 %v1994_v53  ;;  %v3399_v63 = vpop.f32.mrf.mxu1 }
 0x7c1   :  { %v1988_v45 = vpop.f32.mrf.mxu1 }
 0x7c3   :  { %v3400_v48 = vpop.f32.mrf.mxu1 }
 0x7c4   :  { %v3570_v48 = vld [vmem:[#allocation11 + $0x28] sm:$0xff]  }
 0x829   :  { %v1993_v60 = vpop.xlane.xlu0 %1992 }
 0x82a   :  { %v1997_v31 = vsub.f32 %v1945_v44, %v1993_v60 }
 0x82c   :  { %v1999_v1 = vmul.f32 1.442695, %v1997_v31 }
 0x82e   :  { %3712 = vpow2.f32 %v1999_v1 }
 0x83b   :  { %v3713_v52 = vpop.eup %3712 }
 0x83c   :  { %v2003_v30 = vsel %vm943_vm0, %v3713_v52, 0.0 }
 0x83d   :  { %2004 = vadd.xlane.f32.xlu0 %v2003_v30 }
 0x848   :  { %v1996_v19 = vpop.xlane.xlu1 %1995 }
 0x849   :  { %v1998_v10 = vsub.f32 %v1985_v25, %v1996_v19  ;;  %v3569_v25 = vld [vmem:[#allocation11 + $0x30] sm:$0xff]  }
 0x84b   :  { %v2001_v11 = vmul.f32 1.442695, %v1998_v10 }
 0x84d   :  { %3714 = vpow2.f32 %v2001_v11 }
 0x85a   :  { %v3715_v29 = vpop.eup %3714 }
 0x85b   :  { %v2006_v26 = vsel %vm943_vm0, %v3715_v29, 0.0 }
 0x85c   :  { %2007 = vadd.xlane.f32.xlu1 %v2006_v26 }
 0x8c6   :  { %v2005_v61 = vpop.xlane.xlu0 %2004 }
 0x8c7   :  { %3716 = vrcp.f32 %v2005_v61 }
 0x8d4   :  { %v3717_v23 = vpop.eup %3716 }
 0x8d5   :  { %v2011_v0 = vmul.f32 %v3717_v23, %v3713_v52  ;;  %v3574_v23 = vld [vmem:[#allocation11 + $0x8] sm:$0xff]  }
 0x8d7   :  { %v2013_v47 = vpack.c.bf16 %v2011_v0, %v2011_v0 }
 0x8d9   :  { %2017 = vxpose.xlu0.c.b16.start.end [1/1] (short) (narrow) %v2013_v47, 64 }
 0x8e5   :  { %v2008_v4 = vpop.xlane.xlu1 %2007 }
 0x8e6   :  { %3718 = vrcp.f32 %v2008_v4 }
 0x8f3   :  { %v3719_v18 = vpop.eup %3718 }
 0x8f4   :  { %v2012_v62 = vmul.f32 %v3719_v18, %v3715_v29  ;;  %v3573_v29 = vld [vmem:[#allocation11 + $0x10] sm:$0xff]   ;;  %v3575_v18 = vld [vmem:[#allocation11] sm:$0xff]  }
 0x8f6   :  { %v2014_v3 = vpack.c.bf16 %v2012_v62, %v2012_v62 }
 0x8f8   :  { %2115 = vxpose.xlu1.c.b16.start.end [1/1] (short) (narrow) %v2014_v3, 64 }
 0x93b   :  { %v2025_v24 = vpop.trf.xlu0 }
 0x93c   :  { %3403 = vmatprep.mubr.msk.bf16.mxu0 %vm2033_vm3, %v2025_v24 }
 0x93f   :  { %v2026_v16 = vpop.trf.xlu0 }
 0x940   :  { %3404 = vmatmul.mubr.msk.bf16.vlgmr.msra.gmra.mxu0 %vm2033_vm3, %v2026_v16 }
 0x941   :  { %3422 = vmatpush3.bf16.msra.mxu0 %v3568_v21 }
 0x942   :  { %3423 = vmatprep.subr.bf16.mxu0 %v3569_v25 }
 0x943   :  { %v2027_v51 = vpop.trf.xlu0 }
 0x944   :  { %3407 = vmatprep.mubr.msk.bf16.mxu0 %vm2033_vm3, %v2027_v51 }
 0x945   :  { %3424 = vmatpush3.bf16.msra.mxu0 %v3569_v25 }
 0x946   :  { %3425 = vmatprep.subr.bf16.mxu0 %v3570_v48 }
 0x947   :  { %v2028_v37 = vpop.trf.xlu0 }
 0x948   :  { %3408 = vmatmul.mubr.msk.bf16.gmra.mxu0 %vm2033_vm3, %v2028_v37 }
 0x949   :  { %3426 = vmatpush3.bf16.msra.mxu0 %v3570_v48 }
 0x95a   :  { %v2123_v15 = vpop.trf.xlu1 }
 0x95b   :  { %3413 = vmatprep.mubr.msk.bf16.mxu1 %vm2033_vm3, %v2123_v15 }
 0x95e   :  { %v2124_v2 = vpop.trf.xlu1 }
 0x95f   :  { %3414 = vmatmul.mubr.msk.bf16.vlgmr.msra.gmra.mxu1 %vm2033_vm3, %v2124_v2 }
 0x962   :  { %v2125_v39 = vpop.trf.xlu1 }
 0x963   :  { %3417 = vmatprep.mubr.msk.bf16.mxu1 %vm2033_vm3, %v2125_v39 }
 0x966   :  { %v2126_v20 = vpop.trf.xlu1 }
 0x967   :  { %3418 = vmatmul.mubr.msk.bf16.gmra.mxu1 %vm2033_vm3, %v2126_v20 }
 0xa00   :  { %v3405_v9 = vpop.f32.mrf.mxu0 }
 0xa01   :  { %v4745_v27 = vadd.f32 %v3405_v9, %v4520_v7 }
 0xa02   :  { %v2084_v6 = vpop.f32.mrf.mxu0 }
 0xa03   :  { %2233 = vadd.xlane.f32.xlu0 %v4745_v27  ;;  %v4749_v17 = vadd.f32 %v2084_v6, %v4523_v8  ;;  %v2263_v7 = vmul.f32 %v4745_v27, %v4745_v27 }
 0xa04   :  { %v3406_v22 = vpop.f32.mrf.mxu0 }
 0xa05   :  { %v4752_v42 = vadd.f32 %v3406_v22, %v4525_v33  ;;  %v2261_v8 = vmul.f32 %v4749_v17, %v4749_v17 }
 0xa06   :  { %v2087_v57 = vpop.f32.mrf.mxu0 }
 0xa07   :  { %2229 = vadd.xlane.f32.xlu0 %v4749_v17  ;;  %2235 = vadd.xlane.f32.xlu1 %v4752_v42  ;;  %v4757_v58 = vadd.f32 %v2087_v57, %v4529_v12  ;;  %v2264_v33 = vmul.f32 %v4752_v42, %v4752_v42 }
 0xa08   :  { %v3409_v34 = vpop.f32.mrf.mxu0 }
 0xa09   :  { %v4767_v59 = vadd.f32 %v3409_v34, %v4538_v40  ;;  %v2262_v12 = vmul.f32 %v4757_v58, %v4757_v58 }
 0xa0a   :  { %v2100_v13 = vpop.f32.mrf.mxu0 }
 0xa0b   :  { %2281 = vadd.xlane.f32.xlu0 %v2263_v7  ;;  %2231 = vadd.xlane.f32.xlu1 %v4757_v58  ;;  %v4773_v44 = vadd.f32 %v2100_v13, %v4543_v55  ;;  %v2267_v28 = vmul.f32 %v4767_v59, %v4767_v59 }
 0xa0c   :  { %v3410_v56 = vpop.f32.mrf.mxu0 }
 0xa0d   :  { %v4776_v41 = vadd.f32 %v3410_v56, %v4545_v36  ;;  %v2265_v55 = vmul.f32 %v4773_v44, %v4773_v44 }
 0xa0e   :  { %v2103_v43 = vpop.f32.mrf.mxu0 }
 0xa0f   :  { %2277 = vadd.xlane.f32.xlu0 %v2261_v8  ;;  %2283 = vadd.xlane.f32.xlu1 %v2264_v33  ;;  %v4781_v40 = vadd.f32 %v2103_v43, %v4549_v14  ;;  %v2268_v36 = vmul.f32 %v4776_v41, %v4776_v41 }
 0xa11   :  { %v2266_v45 = vmul.f32 %v4781_v40, %v4781_v40 }
 0xa13   :  { %2241 = vadd.xlane.f32.xlu0 %v4767_v59  ;;  %2279 = vadd.xlane.f32.xlu1 %v2262_v12 }
 0xa17   :  { %2237 = vadd.xlane.f32.xlu0 %v4773_v44  ;;  %2243 = vadd.xlane.f32.xlu1 %v4776_v41 }
 0xa1b   :  { %2289 = vadd.xlane.f32.xlu0 %v2267_v28  ;;  %2239 = vadd.xlane.f32.xlu1 %v4781_v40 }
 0xa1f   :  { %v3415_v53 = vpop.f32.mrf.mxu1  ;;  %2285 = vadd.xlane.f32.xlu0 %v2265_v55  ;;  %2291 = vadd.xlane.f32.xlu1 %v2268_v36 }
 0xa20   :  { %v4791_v14 = vadd.f32 %v3415_v53, %v4558_v35  ;;  %v3571_v35 = vld [vmem:[#allocation11 + $0x20] sm:$0xff]  }
 0xa21   :  { %v2180_v63 = vpop.f32.mrf.mxu1  ;;  %3427 = vmatprep.subr.bf16.mxu0 %v3571_v35 }
 0xa22   :  { %v4800_v1 = vadd.f32 %v2180_v63, %v4563_v49  ;;  %v2271_v19 = vmul.f32 %v4791_v14, %v4791_v14  ;;  %3428 = vmatpush3.bf16.msra.mxu0 %v3571_v35 }
 0xa23   :  { %v3416_v60 = vpop.f32.mrf.mxu1  ;;  %2287 = vadd.xlane.f32.xlu1 %v2266_v45  ;;  %2249 = vadd.xlane.f32.xlu0 %v4791_v14 }
 0xa24   :  { %v4797_v31 = vadd.f32 %v3416_v60, %v4565_v38  ;;  %v3572_v38 = vld [vmem:[#allocation11 + $0x18] sm:$0xff]   ;;  %v2269_v49 = vmul.f32 %v4800_v1, %v4800_v1 }
 0xa25   :  { %v2183_v52 = vpop.f32.mrf.mxu1  ;;  %3429 = vmatprep.subr.bf16.mxu0 %v3572_v38 }
 0xa26   :  { %v4805_v30 = vadd.f32 %v2183_v52, %v4569_v46  ;;  %v2272_v11 = vmul.f32 %v4797_v31, %v4797_v31  ;;  %3430 = vmatpush3.bf16.msra.mxu0 %v3572_v38 }
 0xa27   :  { %2245 = vadd.xlane.f32.xlu0 %v4800_v1  ;;  %2251 = vadd.xlane.f32.xlu1 %v4797_v31  ;;  %v3419_v10 = vpop.f32.mrf.mxu1 }
 0xa28   :  { %3431 = vmatprep.subr.bf16.mxu0 %v3573_v29  ;;  %v4815_v26 = vadd.f32 %v3419_v10, %v4578_v5  ;;  %v2270_v61 = vmul.f32 %v4805_v30, %v4805_v30 }
 0xa29   :  { %v2196_v46 = vpop.f32.mrf.mxu1 }
 0xa2a   :  { %3432 = vmatpush3.bf16.msra.mxu0 %v3573_v29  ;;  %v4821_v47 = vadd.f32 %v2196_v46, %v4583_v50  ;;  %v2275_v50 = vmul.f32 %v4815_v26, %v4815_v26 }
 0xa2b   :  { %2297 = vadd.xlane.f32.xlu0 %v2271_v19  ;;  %2247 = vadd.xlane.f32.xlu1 %v4805_v30  ;;  %v3420_v0 = vpop.f32.mrf.mxu1 }
 0xa2c   :  { %3433 = vmatprep.subr.bf16.mxu0 %v3574_v23  ;;  %v4824_v4 = vadd.f32 %v3420_v0, %v4585_v54  ;;  %v2273_v3 = vmul.f32 %v4821_v47, %v4821_v47 }
 0xa2d   :  { %v2199_v5 = vpop.f32.mrf.mxu1 }
 0xa2e   :  { %3434 = vmatpush3.bf16.msra.mxu0 %v3574_v23  ;;  %v4829_v62 = vadd.f32 %v2199_v5, %v4589_v32  ;;  %v2276_v24 = vmul.f32 %v4824_v4, %v4824_v4 }
 0xa2f   :  { %2293 = vadd.xlane.f32.xlu0 %v2269_v49  ;;  %2299 = vadd.xlane.f32.xlu1 %v2272_v11 }
 0xa30   :  { %3435 = vmatprep.subr.bf16.mxu0 %v3575_v18  ;;  %v2274_v54 = vmul.f32 %v4829_v62, %v4829_v62 }
 0xa32   :  { %3436 = vmatpush3.bf16.msra.mxu0 %v3575_v18 }
 0xa33   :  { %2295 = vadd.xlane.f32.xlu1 %v2270_v61  ;;  %2257 = vadd.xlane.f32.xlu0 %v4815_v26 }
 0xa37   :  { %2253 = vadd.xlane.f32.xlu0 %v4821_v47  ;;  %2259 = vadd.xlane.f32.xlu1 %v4824_v4 }
 0xa3b   :  { %2301 = vadd.xlane.f32.xlu0 %v2273_v3  ;;  %2255 = vadd.xlane.f32.xlu1 %v4829_v62 }
 0xa3f   :  { %2305 = vadd.xlane.f32.xlu0 %v2275_v50  ;;  %2303 = vadd.xlane.f32.xlu1 %v2274_v54 }
 0xa43   :  { %2307 = vadd.xlane.f32.xlu1 %v2276_v24 }
 0xa8c   :  { %v2234_v32 = vpop.xlane.xlu0 %2233 }
 0xa8d   :  { %v4840_v37 = vmul.f32 0.03125, %v2234_v32 }
 0xa8f   :  { %v2343_v20 = vmul.f32 %v4840_v37, %v4840_v37 }
 0xa90   :  { %v2230_v16 = vpop.xlane.xlu0 %2229  ;;  %v2236_v51 = vpop.xlane.xlu1 %2235 }
 0xa91   :  { %v4842_v15 = vmul.f32 0.03125, %v2230_v16  ;;  %v2312_v9 = vmul.f32 0.03125, %v2236_v51 }
 0xa93   :  { %v2341_v57 = vmul.f32 %v4842_v15, %v4842_v15  ;;  %v2344_v8 = vmul.f32 %v2312_v9, %v2312_v9 }
 0xa94   :  { %v2282_v2 = vpop.xlane.xlu0 %2281  ;;  %v2232_v39 = vpop.xlane.xlu1 %2231 }
 0xa95   :  { %v2327_v6 = vmul.f32 0.03125, %v2282_v2  ;;  %v4848_v33 = vmul.f32 0.03125, %v2232_v39  ;;  %v2375_v2 = vsub.f32 %v4745_v27, %v4840_v37  ;;  %v2373_v39 = vsub.f32 %v4749_v17, %v4842_v15 }
 0xa97   :  { %v2359_v22 = vsub.f32 %v2327_v6, %v2343_v20  ;;  %v2342_v36 = vmul.f32 %v4848_v33, %v4848_v33  ;;  %v2376_v20 = vsub.f32 %v4752_v42, %v2312_v9  ;;  %v2374_v37 = vsub.f32 %v4757_v58, %v4848_v33 }
 0xa98   :  { %v2278_v7 = vpop.xlane.xlu0 %2277  ;;  %v2284_v34 = vpop.xlane.xlu1 %2283 }
 0xa99   :  { %v2325_v13 = vmul.f32 0.03125, %v2278_v7  ;;  %v2328_v12 = vmul.f32 0.03125, %v2284_v34  ;;  %v2391_v56 = vadd.f32 1e-05, %v2359_v22 }
 0xa9b   :  { %v2357_v43 = vsub.f32 %v2325_v13, %v2341_v57  ;;  %v2360_v28 = vsub.f32 %v2328_v12, %v2344_v8  ;;  %3720 = vrsqrt.f32 %v2391_v56 }
 0xa9c   :  { %v2242_v21 = vpop.xlane.xlu0 %2241  ;;  %v2280_v55 = vpop.xlane.xlu1 %2279 }
 0xa9d   :  { %v2389_v25 = vadd.f32 1e-05, %v2357_v43  ;;  %v2392_v53 = vadd.f32 1e-05, %v2360_v28  ;;  %v2326_v63 = vmul.f32 0.03125, %v2280_v55  ;;  %v4852_v35 = vmul.f32 0.03125, %v2242_v21 }
 0xa9e   :  { %v4878_v55 = vld [vmem:[%s5041_s9] ss:$0 sm:$0xff] }
 0xa9f   :  { %3722 = vrsqrt.f32 %v2389_v25  ;;  %v2358_v45 = vsub.f32 %v2326_v63, %v2342_v36  ;;  %v2347_v49 = vmul.f32 %v4852_v35, %v4852_v35 }
 0xaa0   :  { %3724 = vrsqrt.f32 %v2392_v53  ;;  %v2238_v48 = vpop.xlane.xlu0 %2237  ;;  %v2244_v60 = vpop.xlane.xlu1 %2243 }
 0xaa1   :  { %v2390_v52 = vadd.f32 1e-05, %v2358_v45  ;;  %v4854_v19 = vmul.f32 0.03125, %v2238_v48  ;;  %v4858_v11 = vmul.f32 0.03125, %v2244_v60 }
 0xaa3   :  { %3726 = vrsqrt.f32 %v2390_v52  ;;  %v2345_v61 = vmul.f32 %v4854_v19, %v4854_v19  ;;  %v2348_v18 = vmul.f32 %v4858_v11, %v4858_v11 }
 0xaa4   :  { %v2290_v38 = vpop.xlane.xlu0 %2289  ;;  %v2240_v10 = vpop.xlane.xlu1 %2239 }
 0xaa5   :  { %v2331_v29 = vmul.f32 0.03125, %v2290_v38  ;;  %v4864_v5 = vmul.f32 0.03125, %v2240_v10  ;;  %v4892_v10 = vld [vmem:[%s5042_s10] ss:$0 sm:$0xff] }
 0xaa7   :  { %v2363_v46 = vsub.f32 %v2331_v29, %v2347_v49  ;;  %v2346_v7 = vmul.f32 %v4864_v5, %v4864_v5 }
 0xaa8   :  { %v2286_v23 = vpop.xlane.xlu0 %2285  ;;  %v2292_v0 = vpop.xlane.xlu1 %2291 }
 0xaa9   :  { %v2329_v3 = vmul.f32 0.03125, %v2286_v23  ;;  %v2332_v50 = vmul.f32 0.03125, %v2292_v0  ;;  %v2395_v54 = vadd.f32 1e-05, %v2363_v46  ;;  %v3721_v24 = vpop.eup %3720 }
 0xaaa   :  { %v2423_v43 = vmul.f32 %v3721_v24, %v2375_v2 }
 0xaab   :  { %v2361_v32 = vsub.f32 %v2329_v3, %v2345_v61  ;;  %v2364_v16 = vsub.f32 %v2332_v50, %v2348_v18  ;;  %3728 = vrsqrt.f32 %v2395_v54 }
 0xaac   :  { %v3723_v51 = vpop.eup %3722  ;;  %v2288_v6 = vpop.xlane.xlu1 %2287  ;;  %v2445_v33 = vmul.f32 %v4878_v55, %v2423_v43 }
 0xaad   :  { %v2250_v22 = vpop.xlane.xlu0 %2249  ;;  %v3725_v57 = vpop.eup %3724  ;;  %v2393_v34 = vadd.f32 1e-05, %v2361_v32  ;;  %v2396_v8 = vadd.f32 1e-05, %v2364_v16  ;;  %v2330_v13 = vmul.f32 0.03125, %v2288_v6  ;;  %v2421_v56 = vmul.f32 %v3723_v51, %v2373_v39 }
 0xaae   :  { %v2424_v12 = vmul.f32 %v3725_v57, %v2376_v20  ;;  %v4880_v25 = vmul.f32 0.03125, %v2250_v22  ;;  %v2467_v3 = vadd.f32 %v4892_v10, %v2445_v33 }
 0xaaf   :  { %3730 = vrsqrt.f32 %v2393_v34  ;;  %v2362_v15 = vsub.f32 %v2330_v13, %v2346_v7  ;;  %v2443_v45 = vmul.f32 %v4878_v55, %v2421_v56  ;;  %v2377_v13 = vsub.f32 %v4773_v44, %v4854_v19 }
 0xab0   :  { %v3727_v28 = vpop.eup %3726  ;;  %3732 = vrsqrt.f32 %v2396_v8  ;;  %v2252_v21 = vpop.xlane.xlu1 %2251  ;;  %v2446_v63 = vmul.f32 %v4878_v55, %v2424_v12  ;;  %v2351_v29 = vmul.f32 %v4880_v25, %v4880_v25  ;;  %v2379_v8 = vsub.f32 %v4767_v59, %v4852_v35 }
 0xab1   :  { %v2246_v9 = vpop.xlane.xlu0 %2245  ;;  %v2394_v36 = vadd.f32 1e-05, %v2362_v15  ;;  %v2422_v53 = vmul.f32 %v3727_v28, %v2374_v37  ;;  %v4887_v60 = vmul.f32 0.03125, %v2252_v21  ;;  %v2465_v23 = vadd.f32 %v4892_v10, %v2443_v45 }
 0xab2   :  { %v4885_v48 = vmul.f32 0.03125, %v2246_v9  ;;  %v2468_v61 = vadd.f32 %v4892_v10, %v2446_v63  ;;  %v2380_v12 = vsub.f32 %v4776_v41, %v4858_v11  ;;  %v2378_v35 = vsub.f32 %v4781_v40, %v4864_v5 }
 0xab3   :  { %3734 = vrsqrt.f32 %v2394_v36  ;;  %v2444_v49 = vmul.f32 %v4878_v55, %v2422_v53  ;;  %v2352_v54 = vmul.f32 %v4887_v60, %v4887_v60 }
 0xab4   :  { %v2248_v38 = vpop.xlane.xlu1 %2247  ;;  %v2349_v50 = vmul.f32 %v4885_v48, %v4885_v48  ;;  %v2482_v20 = vpack.c.bf16 %v2468_v61, %v2467_v3 }
 0xab5   :  { %v2298_v52 = vpop.xlane.xlu0 %2297  ;;  %v2466_v0 = vadd.f32 %v4892_v10, %v2444_v49  ;;  %v4905_v51 = vmul.f32 0.03125, %v2248_v38 }
 0xab6   :  { %v2335_v46 = vmul.f32 0.03125, %v2298_v52 }
 0xab7   :  { %v2481_v16 = vpack.c.bf16 %v2466_v0, %v2465_v23  ;;  %v2350_v15 = vmul.f32 %v4905_v51, %v4905_v51 }
 0xab8   :  { %v2367_v18 = vsub.f32 %v2335_v46, %v2351_v29  ;;  %v2300_v32 = vpop.xlane.xlu1 %2299  ;;  %v3729_v22 = vpop.eup %3728 }
 0xab9   :  { %v2294_v24 = vpop.xlane.xlu0 %2293  ;;  %v2336_v39 = vmul.f32 0.03125, %v2300_v32  ;;  %3437 = vmatprep.mubr.bf16.mxu0 %v2481_v16  ;;  %v2427_v53 = vmul.f32 %v3729_v22, %v2379_v8 }
 0xaba   :  { %v2333_v2 = vmul.f32 0.03125, %v2294_v24  ;;  %v2399_v6 = vadd.f32 1e-05, %v2367_v18  ;;  %3438 = vmatmul.mubr.bf16.vlgmr.msra.gmra.mxu0 %v2482_v20 }
 0xabb   :  { %v2368_v7 = vsub.f32 %v2336_v39, %v2352_v54  ;;  %v2449_v61 = vmul.f32 %v4878_v55, %v2427_v53 }
 0xabc   :  { %v2365_v57 = vsub.f32 %v2333_v2, %v2349_v50  ;;  %v3731_v34 = vpop.eup %3730  ;;  %v2296_v56 = vpop.xlane.xlu1 %2295  ;;  %3736 = vrsqrt.f32 %v2399_v6 }
 0xabd   :  { %v2258_v43 = vpop.xlane.xlu0 %2257  ;;  %v3733_v37 = vpop.eup %3732  ;;  %v2400_v9 = vadd.f32 1e-05, %v2368_v7  ;;  %v2334_v21 = vmul.f32 0.03125, %v2296_v56  ;;  %v2425_v36 = vmul.f32 %v3731_v34, %v2377_v13  ;;  %v2471_v2 = vadd.f32 %v4892_v10, %v2449_v61 }
 0xabe   :  { %v2397_v28 = vadd.f32 1e-05, %v2365_v57  ;;  %v2428_v63 = vmul.f32 %v3733_v37, %v2380_v12  ;;  %v4922_v23 = vmul.f32 0.03125, %v2258_v43  ;;  %v2381_v37 = vsub.f32 %v4800_v1, %v4885_v48 }
 0xabf   :  { %v2366_v19 = vsub.f32 %v2334_v21, %v2350_v15  ;;  %v2447_v46 = vmul.f32 %v4878_v55, %v2425_v36  ;;  %v2383_v21 = vsub.f32 %v4791_v14, %v4880_v25  ;;  %v2384_v36 = vsub.f32 %v4797_v31, %v4887_v60 }
 0xac0   :  { %3738 = vrsqrt.f32 %v2397_v28  ;;  %v3735_v45 = vpop.eup %3734  ;;  %v2260_v33 = vpop.xlane.xlu1 %2259  ;;  %v2450_v52 = vmul.f32 %v4878_v55, %v2428_v63  ;;  %v2355_v20 = vmul.f32 %v4922_v23, %v4922_v23 }
 0xac1   :  { %3740 = vrsqrt.f32 %v2400_v9  ;;  %v2254_v11 = vpop.xlane.xlu0 %2253  ;;  %v2398_v38 = vadd.f32 1e-05, %v2366_v19  ;;  %v2426_v29 = vmul.f32 %v3735_v45, %v2378_v35  ;;  %v2469_v32 = vadd.f32 %v4892_v10, %v2447_v46 }
 0xac2   :  { %v4918_v49 = vmul.f32 0.03125, %v2254_v11  ;;  %v2472_v3 = vadd.f32 %v4892_v10, %v2450_v52  ;;  %v2324_v6 = vmul.f32 0.03125, %v2260_v33 }
 0xac3   :  { %3742 = vrsqrt.f32 %v2398_v38  ;;  %v2448_v18 = vmul.f32 %v4878_v55, %v2426_v29  ;;  %v2382_v38 = vsub.f32 %v4805_v30, %v4905_v51 }
 0xac4   :  { %v2256_v0 = vpop.xlane.xlu1 %2255  ;;  %v2353_v50 = vmul.f32 %v4918_v49, %v4918_v49  ;;  %v2484_v34 = vpack.c.bf16 %v2472_v3, %v2471_v2  ;;  %v2356_v53 = vmul.f32 %v2324_v6, %v2324_v6  ;;  %v2385_v2 = vsub.f32 %v4821_v47, %v4918_v49 }
 0xac5   :  { %v2302_v5 = vpop.xlane.xlu0 %2301  ;;  %v4928_v24 = vmul.f32 0.03125, %v2256_v0  ;;  %v2470_v16 = vadd.f32 %v4892_v10, %v2448_v18 }
 0xac6   :  { %v2337_v54 = vmul.f32 0.03125, %v2302_v5 }
 0xac7   :  { %v2483_v7 = vpack.c.bf16 %v2470_v16, %v2469_v32  ;;  %v2354_v13 = vmul.f32 %v4928_v24, %v4928_v24 }
 0xac8   :  { %v2369_v39 = vsub.f32 %v2337_v54, %v2353_v50  ;;  %v2304_v57 = vpop.xlane.xlu1 %2303 }
 0xac9   :  { %v2306_v22 = vpop.xlane.xlu0 %2305  ;;  %v2338_v56 = vmul.f32 0.03125, %v2304_v57  ;;  %3441 = vmatprep.mubr.bf16.mxu0 %v2483_v7  ;;  %v3737_v43 = vpop.eup %3736  ;;  %v2386_v7 = vsub.f32 %v4829_v62, %v4928_v24 }
 0xaca   :  { %v2401_v8 = vadd.f32 1e-05, %v2369_v39  ;;  %v2339_v12 = vmul.f32 0.03125, %v2306_v22  ;;  %3442 = vmatmul.mubr.bf16.gmra.mxu0 %v2484_v34  ;;  %v2431_v52 = vmul.f32 %v3737_v43, %v2383_v21  ;;  %v2387_v22 = vsub.f32 %v4815_v26, %v4922_v23 }
 0xacb   :  { %v2370_v28 = vsub.f32 %v2338_v56, %v2354_v13  ;;  %v2388_v56 = vsub.f32 %v4824_v4, %v2324_v6  ;;  %v3576_v6 = vld [vmem:[#allocation13 + $0x38] sm:$0xff]  }
 0xacc   :  { %3744 = vrsqrt.f32 %v2401_v8  ;;  %v2371_v15 = vsub.f32 %v2339_v12, %v2355_v20  ;;  %v2308_v63 = vpop.xlane.xlu1 %2307  ;;  %v2453_v0 = vmul.f32 %v4878_v55, %v2431_v52  ;;  %3453 = vmatprep.subr.bf16.mxu1 %v3576_v6 }
 0xacd   :  { %v3739_v9 = vpop.eup %3738  ;;  %v2402_v45 = vadd.f32 1e-05, %v2370_v28  ;;  %v2340_v11 = vmul.f32 0.03125, %v2308_v63  ;;  %3454 = vmatpush3.bf16.msra.mxu1 %v3576_v6  ;;  %v3577_v63 = vld [vmem:[#allocation13 + $0x30] sm:$0xff]  }
 0xace   :  { %v3741_v35 = vpop.eup %3740  ;;  %v2403_v19 = vadd.f32 1e-05, %v2371_v15  ;;  %v2429_v33 = vmul.f32 %v3739_v9, %v2381_v37  ;;  %v2475_v54 = vadd.f32 %v4892_v10, %v2453_v0  ;;  %3455 = vmatprep.subr.bf16.mxu1 %v3577_v63 }
 0xacf   :  { %v2432_v48 = vmul.f32 %v3741_v35, %v2384_v36  ;;  %v2372_v29 = vsub.f32 %v2340_v11, %v2356_v53  ;;  %v3578_v35 = vld [vmem:[#allocation13 + $0x28] sm:$0xff]   ;;  %v3583_v11 = vld [vmem:[#allocation13] sm:$0xff]  }
 0xad0   :  { %3746 = vrsqrt.f32 %v2403_v19  ;;  %v3743_v46 = vpop.eup %3742  ;;  %v2451_v5 = vmul.f32 %v4878_v55, %v2429_v33  ;;  %v3579_v19 = vld [vmem:[#allocation13 + $0x20] sm:$0xff]   ;;  %v4971_v33 = vld [vmem:[%s5044_s12] ss:$0 sm:$0xff] }
 0xad1   :  { %3748 = vrsqrt.f32 %v2402_v45  ;;  %v2454_v25 = vmul.f32 %v4878_v55, %v2432_v48  ;;  %v2404_v61 = vadd.f32 1e-05, %v2372_v29  ;;  %v2430_v60 = vmul.f32 %v3743_v46, %v2382_v38  ;;  %3456 = vmatpush3.bf16.msra.mxu1 %v3577_v63  ;;  %v3581_v45 = vld [vmem:[#allocation13 + $0x10] sm:$0xff]  }
 0xad2   :  { %v2473_v50 = vadd.f32 %v4892_v10, %v2451_v5  ;;  %3457 = vmatprep.subr.bf16.mxu1 %v3578_v35 }
 0xad3   :  { %3750 = vrsqrt.f32 %v2404_v61  ;;  %v2452_v18 = vmul.f32 %v4878_v55, %v2430_v60  ;;  %v2476_v3 = vadd.f32 %v4892_v10, %v2454_v25 }
 0xad5   :  { %v2474_v51 = vadd.f32 %v4892_v10, %v2452_v18  ;;  %v2486_v39 = vpack.c.bf16 %v2476_v3, %v2475_v54  ;;  %3458 = vmatpush3.bf16.msra.mxu1 %v3578_v35 }
 0xad6   :  { %3459 = vmatprep.subr.bf16.mxu1 %v3579_v19 }
 0xad7   :  { %v2485_v32 = vpack.c.bf16 %v2474_v51, %v2473_v50 }
 0xad9   :  { %v3745_v16 = vpop.eup %3744  ;;  %3445 = vmatprep.mubr.bf16.mxu0 %v2485_v32  ;;  %3460 = vmatpush3.bf16.msra.mxu1 %v3579_v19 }
 0xada   :  { %3446 = vmatmul.mubr.bf16.gmra.mxu0 %v2486_v39  ;;  %v2433_v20 = vmul.f32 %v3745_v16, %v2385_v2 }
 0xadc   :  { %v2455_v12 = vmul.f32 %v4878_v55, %v2433_v20 }
 0xadd   :  { %v3747_v57 = vpop.eup %3746 }
 0xade   :  { %v3749_v34 = vpop.eup %3748  ;;  %v2435_v8 = vmul.f32 %v3747_v57, %v2387_v22  ;;  %v2477_v28 = vadd.f32 %v4892_v10, %v2455_v12 }
 0xadf   :  { %v2434_v13 = vmul.f32 %v3749_v34, %v2386_v7 }
 0xae0   :  { %v3751_v43 = vpop.eup %3750  ;;  %v2457_v15 = vmul.f32 %v4878_v55, %v2435_v8 }
 0xae1   :  { %v2456_v49 = vmul.f32 %v4878_v55, %v2434_v13  ;;  %v2436_v37 = vmul.f32 %v3751_v43, %v2388_v56 }
 0xae2   :  { %v2479_v21 = vadd.f32 %v4892_v10, %v2457_v15 }
 0xae3   :  { %v2478_v23 = vadd.f32 %v4892_v10, %v2456_v49  ;;  %v2458_v9 = vmul.f32 %v4878_v55, %v2436_v37  ;;  %v3580_v55 = vld [vmem:[#allocation13 + $0x18] sm:$0xff]  }
 0xae4   :  { %3461 = vmatprep.subr.bf16.mxu1 %v3580_v55 }
 0xae5   :  { %v2487_v24 = vpack.c.bf16 %v2478_v23, %v2477_v28  ;;  %v2480_v36 = vadd.f32 %v4892_v10, %v2458_v9  ;;  %3462 = vmatpush3.bf16.msra.mxu1 %v3580_v55  ;;  %v3582_v10 = vld [vmem:[#allocation13 + $0x8] sm:$0xff]  }
 0xae6   :  { %3463 = vmatprep.subr.bf16.mxu1 %v3581_v45 }
 0xae7   :  { %3449 = vmatprep.mubr.bf16.mxu0 %v2487_v24  ;;  %v2488_v53 = vpack.c.bf16 %v2480_v36, %v2479_v21 }
 0xae9   :  { %3450 = vmatmul.mubr.bf16.gmra.mxu0 %v2488_v53  ;;  %3464 = vmatpush3.bf16.msra.mxu1 %v3581_v45 }
 0xaea   :  { %3465 = vmatprep.subr.bf16.mxu1 %v3582_v10 }
 0xaed   :  { %3466 = vmatpush3.bf16.msra.mxu1 %v3582_v10 }
 0xaee   :  { %3467 = vmatprep.subr.bf16.mxu1 %v3583_v11 }
 0xaf1   :  { %3468 = vmatpush3.bf16.msra.mxu1 %v3583_v11 }
 0xb7a   :  { %v3439_v52 = vpop.f32.mrf.mxu0 }
 0xb7b   :  { %v2603_v48 = vadd.f32 %v3439_v52, %v4971_v33 }
 0xb7c   :  { %v2594_v38 = vpop.f32.mrf.mxu0 }
 0xb7d   :  { %v2595_v29 = vadd.f32 %v4971_v33, %v2594_v38  ;;  %v2675_v46 = vmul.f32 0.70710677, %v2603_v48  ;;  %v2659_v24 = vmul.f32 0.5, %v2603_v48 }
 0xb7e   :  { %v3440_v25 = vpop.f32.mrf.mxu0 }
 0xb7f   :  { %v2673_v61 = vmul.f32 0.70710677, %v2595_v29  ;;  %v2606_v60 = vadd.f32 %v3440_v25, %v4971_v33  ;;  %v2657_v15 = vmul.f32 0.5, %v2595_v29 }
 0xb80   :  { %v2597_v5 = vpop.f32.mrf.mxu0 }
 0xb81   :  { %3752 = verf.f32 %v2673_v61  ;;  %v2676_v0 = vmul.f32 0.70710677, %v2606_v60  ;;  %v2598_v18 = vadd.f32 %v4971_v33, %v2597_v5  ;;  %v2660_v49 = vmul.f32 0.5, %v2606_v60 }
 0xb82   :  { %3754 = verf.f32 %v2675_v46 }
 0xb83   :  { %3756 = verf.f32 %v2676_v0  ;;  %v2674_v3 = vmul.f32 0.70710677, %v2598_v18  ;;  %v2658_v28 = vmul.f32 0.5, %v2598_v18 }
 0xb85   :  { %3758 = verf.f32 %v2674_v3 }
 0xb8a   :  { %v3443_v50 = vpop.f32.mrf.mxu0 }
 0xb8b   :  { %v2619_v51 = vadd.f32 %v3443_v50, %v4971_v33 }
 0xb8c   :  { %v2610_v54 = vpop.f32.mrf.mxu0 }
 0xb8d   :  { %v2679_v32 = vmul.f32 0.70710677, %v2619_v51  ;;  %v2611_v16 = vadd.f32 %v4971_v33, %v2610_v54 }
 0xb8e   :  { %v3753_v2 = vpop.eup %3752  ;;  %v3444_v39 = vpop.f32.mrf.mxu0 }
 0xb8f   :  { %v3755_v20 = vpop.eup %3754  ;;  %v2677_v57 = vmul.f32 0.70710677, %v2611_v16  ;;  %v2622_v7 = vadd.f32 %v3444_v39, %v4971_v33  ;;  %v2705_v8 = vadd.f32 1.0, %v3753_v2  ;;  %3760 = verf.f32 %v2679_v32 }
 0xb90   :  { %v3757_v22 = vpop.eup %3756  ;;  %v2613_v34 = vpop.f32.mrf.mxu0  ;;  %v2707_v43 = vadd.f32 1.0, %v3755_v20  ;;  %v2661_v32 = vmul.f32 0.5, %v2611_v16 }
 0xb91   :  { %v2708_v13 = vadd.f32 1.0, %v3757_v22  ;;  %v2614_v12 = vadd.f32 %v4971_v33, %v2613_v34  ;;  %3762 = verf.f32 %v2677_v57  ;;  %v2680_v37 = vmul.f32 0.70710677, %v2622_v7 }
 0xb92   :  { %v3759_v56 = vpop.eup %3758  ;;  %v2721_v36 = vmul.f32 %v2705_v8, %v2657_v15  ;;  %v2723_v6 = vmul.f32 %v2707_v43, %v2659_v24  ;;  %v2664_v50 = vmul.f32 0.5, %v2622_v7  ;;  %v2663_v22 = vmul.f32 0.5, %v2619_v51 }
 0xb93   :  { %v2706_v23 = vadd.f32 1.0, %v3759_v56  ;;  %v2678_v9 = vmul.f32 0.70710677, %v2614_v12  ;;  %v2724_v21 = vmul.f32 %v2708_v13, %v2660_v49  ;;  %3764 = verf.f32 %v2680_v37 }
 0xb94   :  { %v2662_v2 = vmul.f32 0.5, %v2614_v12 }
 0xb95   :  { %v2722_v53 = vmul.f32 %v2706_v23, %v2658_v28  ;;  %3766 = verf.f32 %v2678_v9  ;;  %v2738_v35 = vpack.c.bf16 %v2724_v21, %v2723_v6 }
 0xb97   :  { %v2737_v63 = vpack.c.bf16 %v2722_v53, %v2721_v36 }
 0xb99   :  { %3469 = vmatprep.mubr.bf16.mxu1 %v2737_v63 }
 0xb9a   :  { %v3447_v19 = vpop.f32.mrf.mxu0  ;;  %3470 = vmatmul.mubr.bf16.vlgmr.msra.gmra.mxu1 %v2738_v35 }
 0xb9b   :  { %v2635_v55 = vadd.f32 %v3447_v19, %v4971_v33 }
 0xb9c   :  { %v2626_v45 = vpop.f32.mrf.mxu0  ;;  %v3761_v38 = vpop.eup %3760 }
 0xb9d   :  { %v2683_v10 = vmul.f32 0.70710677, %v2635_v55  ;;  %v2627_v11 = vadd.f32 %v4971_v33, %v2626_v45  ;;  %v2711_v3 = vadd.f32 1.0, %v3761_v38 }
 0xb9e   :  { %v3448_v52 = vpop.f32.mrf.mxu0  ;;  %v3763_v46 = vpop.eup %3762 }
 0xb9f   :  { %v2681_v48 = vmul.f32 0.70710677, %v2627_v11  ;;  %v2638_v29 = vadd.f32 %v3448_v52, %v4971_v33  ;;  %3768 = verf.f32 %v2683_v10  ;;  %v2709_v5 = vadd.f32 1.0, %v3763_v46 }
 0xba0   :  { %v2629_v25 = vpop.f32.mrf.mxu0  ;;  %v3765_v60 = vpop.eup %3764  ;;  %v2727_v13 = vmul.f32 %v2711_v3, %v2663_v22  ;;  %v2665_v52 = vmul.f32 0.5, %v2627_v11  ;;  %v2667_v46 = vmul.f32 0.5, %v2635_v55 }
 0xba1   :  { %v2684_v61 = vmul.f32 0.70710677, %v2638_v29  ;;  %3770 = verf.f32 %v2681_v48  ;;  %v2630_v0 = vadd.f32 %v4971_v33, %v2629_v25  ;;  %v2712_v54 = vadd.f32 1.0, %v3765_v60 }
 0xba2   :  { %v3767_v18 = vpop.eup %3766  ;;  %v2725_v34 = vmul.f32 %v2709_v5, %v2661_v32  ;;  %v2668_v10 = vmul.f32 0.5, %v2638_v29 }
 0xba3   :  { %3772 = verf.f32 %v2684_v61  ;;  %v2710_v39 = vadd.f32 1.0, %v3767_v18  ;;  %v2682_v20 = vmul.f32 0.70710677, %v2630_v0  ;;  %v2728_v57 = vmul.f32 %v2712_v54, %v2664_v50 }
 0xba4   :  { %v2666_v38 = vmul.f32 0.5, %v2630_v0 }
 0xba5   :  { %v2726_v8 = vmul.f32 %v2710_v39, %v2662_v2  ;;  %3774 = verf.f32 %v2682_v20  ;;  %v2740_v49 = vpack.c.bf16 %v2728_v57, %v2727_v13 }
 0xba7   :  { %v2739_v56 = vpack.c.bf16 %v2726_v8, %v2725_v34 }
 0xba9   :  { %v3451_v43 = vpop.f32.mrf.mxu0  ;;  %3473 = vmatprep.mubr.bf16.mxu1 %v2739_v56 }
 0xbaa   :  { %v2651_v37 = vadd.f32 %v3451_v43, %v4971_v33  ;;  %3474 = vmatmul.mubr.bf16.gmra.mxu1 %v2740_v49  ;;  %v4992_v49 = vld [vmem:[%s5046_s14] ss:$0 sm:$0xff]  ;;  %s4018_s14 = smov [#allocation14]  }
 0xbab   :  { %v2642_v7 = vpop.f32.mrf.mxu0  ;;  %s3030_s20 = sshll.u32 %s4018_s14, 4  ;;  %s3031_s20 = int_to_ptr.vmem [resolvable:$true] %s3030_s20 }
 0xbac   :  { %v2643_v15 = vadd.f32 %v4971_v33, %v2642_v7  ;;  %v2687_v16 = vmul.f32 0.70710677, %v2651_v37  ;;  %v3769_v28 = vpop.eup %3768  ;;  %v2671_v55 = vmul.f32 0.5, %v2651_v37  ;;  %s3972_s19 = scalar_lea.vmem %s3031_s20, 2048  ;;  %p3977_p8 = scmp.lt.s32.totalorder %s3031_s20, %s3031_s20 }
 0xbad   :  { %v3452_v12 = vpop.f32.mrf.mxu0  ;;  %v2715_v45 = vadd.f32 1.0, %v3769_v28  ;;  %p3973_p7 = scmp.ne.s32.totalorder %s3031_s20, %s3972_s19  ;;  %p3978_p9 = scmp.lt.s32.totalorder %s3972_s19, %s3972_s19 }
 0xbae   :  { %v2685_v23 = vmul.f32 0.70710677, %v2643_v15  ;;  %v2654_v51 = vadd.f32 %v3452_v12, %v4971_v33  ;;  %v3771_v9 = vpop.eup %3770  ;;  %v2669_v0 = vmul.f32 0.5, %v2643_v15 }
 0xbaf   :  { %v2645_v24 = vpop.f32.mrf.mxu0  ;;  %v2713_v63 = vadd.f32 1.0, %v3771_v9  ;;  %v2731_v5 = vmul.f32 %v2715_v45, %v2667_v46  ;;  %p3979_p10 = por %p3978_p9, %p3977_p8 }
 0xbb0   :  { %v3773_v21 = vpop.eup %3772  ;;  %3776 = verf.f32 %v2685_v23  ;;  %v2688_v36 = vmul.f32 0.70710677, %v2654_v51  ;;  %v2646_v53 = vadd.f32 %v4971_v33, %v2645_v24  ;;  %v2672_v11 = vmul.f32 0.5, %v2654_v51 }
 0xbb1   :  { %v2716_v6 = vadd.f32 1.0, %v3773_v21  ;;  %3778 = verf.f32 %v2687_v16  ;;  %v2729_v61 = vmul.f32 %v2713_v63, %v2665_v52  ;;  %p3980_p11 = pnand %p3979_p10, %p3973_p7 }
 0xbb2   :  { %3780 = verf.f32 %v2688_v36  ;;  %v2686_v35 = vmul.f32 0.70710677, %v2646_v53  ;;  %v3775_v19 = vpop.eup %3774  ;;  %v2670_v20 = vmul.f32 0.5, %v2646_v53 }
 0xbb3   :  { %v2714_v48 = vadd.f32 1.0, %v3775_v19  ;;  %v2732_v25 = vmul.f32 %v2716_v6, %v2668_v10 }
 0xbb4   :  { %3782 = verf.f32 %v2686_v35 }
 0xbb5   :  { %v2730_v60 = vmul.f32 %v2714_v48, %v2666_v38  ;;  %v2742_v3 = vpack.c.bf16 %v2732_v25, %v2731_v5 }
 0xbb7   :  { %v2741_v18 = vpack.c.bf16 %v2730_v60, %v2729_v61 }
 0xbb9   :  { %3477 = vmatprep.mubr.bf16.mxu1 %v2741_v18 }
 0xbba   :  { %3478 = vmatmul.mubr.bf16.gmra.mxu1 %v2742_v3 }
 0xbbd   :  { %v3777_v33 = vpop.eup %3776 }
 0xbbe   :  { %v3779_v50 = vpop.eup %3778  ;;  %v2717_v32 = vadd.f32 1.0, %v3777_v33 }
 0xbbf   :  { %v3781_v54 = vpop.eup %3780  ;;  %v2719_v29 = vadd.f32 1.0, %v3779_v50 }
 0xbc0   :  { %v2720_v2 = vadd.f32 1.0, %v3781_v54  ;;  %v2733_v34 = vmul.f32 %v2717_v32, %v2669_v0 }
 0xbc1   :  { %v3783_v39 = vpop.eup %3782  ;;  %v2735_v13 = vmul.f32 %v2719_v29, %v2671_v55 }
 0xbc2   :  { %v2718_v22 = vadd.f32 1.0, %v3783_v39  ;;  %v2736_v57 = vmul.f32 %v2720_v2, %v2672_v11 }
 0xbc4   :  { %v2734_v8 = vmul.f32 %v2718_v22, %v2670_v20  ;;  %v2744_v43 = vpack.c.bf16 %v2736_v57, %v2735_v13 }
 0xbc6   :  { %v2743_v56 = vpack.c.bf16 %v2734_v8, %v2733_v34 }
 0xbc8   :  { %3481 = vmatprep.mubr.bf16.mxu1 %v2743_v56 }
 0xbc9   :  { %3482 = vmatmul.mubr.bf16.gmra.mxu1 %v2744_v43 }
 0xc5a   :  { %v3471_v7 = vpop.f32.mrf.mxu1 }
 0xc5b   :  { %v2859_v16 = vadd.f32 %v3471_v7, %v4992_v49 }
 0xc5c   :  { %v2850_v15 = vpop.f32.mrf.mxu1 }
 0xc5d   :  { %v2931_v12 = vmul.f32 0.70710677, %v2859_v16  ;;  %v2851_v37 = vadd.f32 %v4992_v49, %v2850_v15  ;;  %v2915_v19 = vmul.f32 0.5, %v2859_v16 }
 0xc5e   :  { %v3472_v28 = vpop.f32.mrf.mxu1 }
 0xc5f   :  { %3784 = verf.f32 %v2931_v12  ;;  %v2929_v23 = vmul.f32 0.70710677, %v2851_v37  ;;  %v2862_v51 = vadd.f32 %v3472_v28, %v4992_v49  ;;  %v2913_v25 = vmul.f32 0.5, %v2851_v37 }
 0xc60   :  { %v2853_v9 = vpop.f32.mrf.mxu1 }
 0xc61   :  { %3786 = verf.f32 %v2929_v23  ;;  %v2932_v24 = vmul.f32 0.70710677, %v2862_v51  ;;  %v2854_v21 = vadd.f32 %v4992_v49, %v2853_v9  ;;  %v2916_v5 = vmul.f32 0.5, %v2862_v51 }
 0xc63   :  { %3788 = verf.f32 %v2932_v24  ;;  %v2930_v36 = vmul.f32 0.70710677, %v2854_v21  ;;  %v2914_v20 = vmul.f32 0.5, %v2854_v21 }
 0xc65   :  { %3790 = verf.f32 %v2930_v36 }
 0xc6a   :  { %v3475_v53 = vpop.f32.mrf.mxu1 }
 0xc6b   :  { %v2875_v6 = vadd.f32 %v3475_v53, %v4992_v49 }
 0xc6c   :  { %v3785_v63 = vpop.eup %3784  ;;  %v2866_v35 = vpop.f32.mrf.mxu1 }
 0xc6d   :  { %v2963_v45 = vadd.f32 1.0, %v3785_v63  ;;  %v2935_v10 = vmul.f32 0.70710677, %v2875_v6  ;;  %v2867_v52 = vadd.f32 %v4992_v49, %v2866_v35 }
 0xc6e   :  { %v3787_v38 = vpop.eup %3786  ;;  %v3476_v48 = vpop.f32.mrf.mxu1 }
 0xc6f   :  { %v2979_v46 = vmul.f32 %v2963_v45, %v2915_v19  ;;  %v2961_v61 = vadd.f32 1.0, %v3787_v38  ;;  %3792 = verf.f32 %v2935_v10  ;;  %v2933_v18 = vmul.f32 0.70710677, %v2867_v52 }
 0xc70   :  { %v3789_v60 = vpop.eup %3788  ;;  %v2878_v3 = vadd.f32 %v3476_v48, %v4992_v49  ;;  %v2869_v33 = vpop.f32.mrf.mxu1  ;;  %v2917_v23 = vmul.f32 0.5, %v2867_v52 }
 0xc71   :  { %v2995_v50 = vadd.f32 %v2979_v46, %v4745_v27  ;;  %v2977_v54 = vmul.f32 %v2961_v61, %v2913_v25  ;;  %v2964_v32 = vadd.f32 1.0, %v3789_v60  ;;  %v2870_v2 = vadd.f32 %v4992_v49, %v2869_v33 }
 0xc72   :  { %v3791_v39 = vpop.eup %3790  ;;  %3794 = verf.f32 %v2933_v18  ;;  %v2936_v29 = vmul.f32 0.70710677, %v2878_v3 }
 0xc73   :  { %3011 = vst [vmem:[#allocation14 + $0x10] sm:$0xff] %v2995_v50  ;;  %v2993_v11 = vadd.f32 %v2977_v54, %v4749_v17  ;;  %v2980_v0 = vmul.f32 %v2964_v32, %v2916_v5  ;;  %v2962_v22 = vadd.f32 1.0, %v3791_v39  ;;  %v2934_v55 = vmul.f32 0.70710677, %v2870_v2 }
 0xc74   :  { %3796 = verf.f32 %v2936_v29  ;;  %v2919_v17 = vmul.f32 0.5, %v2875_v6  ;;  %v2920_v6 = vmul.f32 0.5, %v2878_v3  ;;  %v2918_v45 = vmul.f32 0.5, %v2870_v2 }
 0xc75   :  { %3009 = vst [vmem:[#allocation14] sm:$0xff] %v2993_v11  ;;  %v2996_v57 = vadd.f32 %v2980_v0, %v4752_v42  ;;  %v2978_v34 = vmul.f32 %v2962_v22, %v2914_v20  ;;  %3798 = verf.f32 %v2934_v55 }
 0xc77   :  { %3012 = vst [vmem:[#allocation14 + $0x18] sm:$0xff] %v2996_v57  ;;  %v2994_v27 = vadd.f32 %v2978_v34, %v4757_v58 }
 0xc79   :  { %3010 = vst [vmem:[#allocation14 + $0x8] sm:$0xff] %v2994_v27 }
 0xc7a   :  { %v3479_v8 = vpop.f32.mrf.mxu1 }
 0xc7b   :  { %v2891_v13 = vadd.f32 %v3479_v8, %v4992_v49 }
 0xc7c   :  { %v3793_v56 = vpop.eup %3792  ;;  %v2882_v43 = vpop.f32.mrf.mxu1 }
 0xc7d   :  { %v2967_v7 = vadd.f32 1.0, %v3793_v56  ;;  %v2939_v16 = vmul.f32 0.70710677, %v2891_v13  ;;  %v2883_v15 = vadd.f32 %v4992_v49, %v2882_v43  ;;  %v2923_v50 = vmul.f32 0.5, %v2891_v13 }
 0xc7e   :  { %v3480_v12 = vpop.f32.mrf.mxu1 }
 0xc7f   :  { %v3795_v37 = vpop.eup %3794  ;;  %v2983_v28 = vmul.f32 %v2967_v7, %v2919_v17  ;;  %3800 = verf.f32 %v2939_v16  ;;  %v2937_v42 = vmul.f32 0.70710677, %v2883_v15  ;;  %v2894_v58 = vadd.f32 %v3480_v12, %v4992_v49 }
 0xc80   :  { %v2965_v51 = vadd.f32 1.0, %v3795_v37  ;;  %v2885_v9 = vpop.f32.mrf.mxu1 }
 0xc81   :  { %v3797_v24 = vpop.eup %3796  ;;  %v2999_v21 = vadd.f32 %v2983_v28, %v4767_v59  ;;  %3802 = verf.f32 %v2937_v42  ;;  %v2886_v36 = vadd.f32 %v4992_v49, %v2885_v9  ;;  %v2940_v35 = vmul.f32 0.70710677, %v2894_v58 }
 0xc82   :  { %v2981_v53 = vmul.f32 %v2965_v51, %v2917_v23  ;;  %v2968_v63 = vadd.f32 1.0, %v3797_v24  ;;  %v3799_v19 = vpop.eup %3798  ;;  %v2924_v8 = vmul.f32 0.5, %v2894_v58 }
 0xc83   :  { %3015 = vst [vmem:[#allocation14 + $0x30] sm:$0xff] %v2999_v21  ;;  %v2938_v10 = vmul.f32 0.70710677, %v2886_v36  ;;  %v2966_v48 = vadd.f32 1.0, %v3799_v19  ;;  %3804 = verf.f32 %v2940_v35  ;;  %v2922_v43 = vmul.f32 0.5, %v2886_v36 }
 0xc84   :  { %v2997_v52 = vadd.f32 %v2981_v53, %v4773_v44  ;;  %v2984_v38 = vmul.f32 %v2968_v63, %v2920_v6 }
 0xc85   :  { %3806 = verf.f32 %v2938_v10  ;;  %v2982_v46 = vmul.f32 %v2966_v48, %v2918_v45 }
 0xc86   :  { %3013 = vst [vmem:[#allocation14 + $0x20] sm:$0xff] %v2997_v52  ;;  %v3000_v59 = vadd.f32 %v2984_v38, %v4776_v41  ;;  %v2921_v41 = vmul.f32 0.5, %v2883_v15 }
 0xc87   :  { %v2998_v25 = vadd.f32 %v2982_v46, %v4781_v40 }
 0xc88   :  { %3016 = vst [vmem:[#allocation14 + $0x38] sm:$0xff] %v3000_v59 }
 0xc89   :  { %v3483_v61 = vpop.f32.mrf.mxu1  ;;  %3014 = vst [vmem:[#allocation14 + $0x28] sm:$0xff] %v2998_v25 }
 0xc8a   :  { %v2907_v60 = vadd.f32 %v3483_v61, %v4992_v49 }
 0xc8b   :  { %v2898_v5 = vpop.f32.mrf.mxu1 }
 0xc8c   :  { %v2943_v18 = vmul.f32 0.70710677, %v2907_v60  ;;  %v2899_v3 = vadd.f32 %v4992_v49, %v2898_v5  ;;  %v3801_v44 = vpop.eup %3800  ;;  %v2927_v12 = vmul.f32 0.5, %v2907_v60 }
 0xc8d   :  { %v3484_v33 = vpop.f32.mrf.mxu1  ;;  %v2971_v54 = vadd.f32 1.0, %v3801_v44 }
 0xc8e   :  { %3808 = verf.f32 %v2943_v18  ;;  %v2941_v32 = vmul.f32 0.70710677, %v2899_v3  ;;  %v3803_v2 = vpop.eup %3802  ;;  %v2910_v39 = vadd.f32 %v3484_v33, %v4992_v49  ;;  %v2925_v23 = vmul.f32 0.5, %v2899_v3 }
 0xc8f   :  { %v2901_v29 = vpop.f32.mrf.mxu1  ;;  %v2987_v40 = vmul.f32 %v2971_v54, %v2923_v50  ;;  %v2969_v11 = vadd.f32 1.0, %v3803_v2 }
 0xc90   :  { %3810 = verf.f32 %v2941_v32  ;;  %v2902_v0 = vadd.f32 %v4992_v49, %v2901_v29  ;;  %v2944_v20 = vmul.f32 0.70710677, %v2910_v39  ;;  %v3805_v22 = vpop.eup %3804  ;;  %v2928_v21 = vmul.f32 0.5, %v2910_v39 }
 0xc91   :  { %v3003_v55 = vadd.f32 %v2987_v40, %v4791_v14  ;;  %v2985_v57 = vmul.f32 %v2969_v11, %v2921_v41  ;;  %v2972_v13 = vadd.f32 1.0, %v3805_v22 }
 0xc92   :  { %v2942_v34 = vmul.f32 0.70710677, %v2902_v0  ;;  %v3807_v27 = vpop.eup %3806  ;;  %3812 = verf.f32 %v2944_v20 }
 0xc93   :  { %3019 = vst [vmem:[#allocation14 + $0x50] sm:$0xff] %v3003_v55  ;;  %v3001_v56 = vadd.f32 %v2985_v57, %v4800_v1  ;;  %v2970_v17 = vadd.f32 1.0, %v3807_v27  ;;  %v2988_v7 = vmul.f32 %v2972_v13, %v2924_v8 }
 0xc94   :  { %3814 = verf.f32 %v2942_v34 }
 0xc95   :  { %3017 = vst [vmem:[#allocation14 + $0x40] sm:$0xff] %v3001_v56  ;;  %v2986_v16 = vmul.f32 %v2970_v17, %v2922_v43  ;;  %v3004_v49 = vadd.f32 %v2988_v7, %v4797_v31 }
 0xc97   :  { %v3002_v15 = vadd.f32 %v2986_v16, %v4805_v30  ;;  %3020 = vst [vmem:[#allocation14 + $0x58] sm:$0xff] %v3004_v49  ;;  %v2926_v30 = vmul.f32 0.5, %v2902_v0 }
 0xc99   :  { %3018 = vst [vmem:[#allocation14 + $0x48] sm:$0xff] %v3002_v15 }
 0xc9b   :  { %v3809_v14 = vpop.eup %3808 }
 0xc9c   :  { %v2975_v37 = vadd.f32 1.0, %v3809_v14 }
 0xc9d   :  { %v3811_v28 = vpop.eup %3810 }
 0xc9e   :  { %v2991_v42 = vmul.f32 %v2975_v37, %v2927_v12  ;;  %v2973_v51 = vadd.f32 1.0, %v3811_v28 }
 0xc9f   :  { %v3813_v1 = vpop.eup %3812 }
 0xca0   :  { %v3007_v58 = vadd.f32 %v2991_v42, %v4815_v26  ;;  %v2989_v9 = vmul.f32 %v2973_v51, %v2925_v23  ;;  %v2976_v36 = vadd.f32 1.0, %v3813_v1 }
 0xca1   :  { %v3815_v24 = vpop.eup %3814 }
 0xca2   :  { %3023 = vst [vmem:[#allocation14 + $0x70] sm:$0xff] %v3007_v58  ;;  %v3005_v31 = vadd.f32 %v2989_v9, %v4821_v47  ;;  %v2974_v53 = vadd.f32 1.0, %v3815_v24  ;;  %v2992_v6 = vmul.f32 %v2976_v36, %v2928_v21 }
 0xca4   :  { %3021 = vst [vmem:[#allocation14 + $0x60] sm:$0xff] %v3005_v31  ;;  %v2990_v63 = vmul.f32 %v2974_v53, %v2926_v30  ;;  %v3008_v35 = vadd.f32 %v2992_v6, %v4824_v4 }
 0xca6   :  { %v3006_v19 = vadd.f32 %v2990_v63, %v4829_v62  ;;  %3024 = vst [vmem:[#allocation14 + $0x78] sm:$0xff] %v3008_v35 }
 0xca8   :  { %3022 = vst [vmem:[#allocation14 + $0x68] sm:$0xff] %v3006_v19 }
 0xca9   :  { %3983 = shalt.err (!%p3980_p11)
}
 0xcaa   :  { %3036 = dma.vmem_to_hbm [thread:$0]  %s3031_s20, 2048, %s5047_s15, [#allocation4], %s4004_s23, %s4004_s23, %s4005_s24  }
 0xcab   :  { %4000 = dma.done.wait [#allocation4], 2048  }
 0xcac   :  { %4001 = vsyncadd [#allocation4], 4294965248 }
 0xcad   :  { %3040 = vsyncpa [#allocation3], 1 }
 0xcae   :  { %3041 = vsyncpa [#allocation6], 1 }
 0xcaf   :  { %3042 = vsyncpa [#allocation9], 1 }
 0xcb0   :  { %3043 = vsyncpa [#allocation12], 1 }
 0xcb1   :  { %3044 = vsyncpa [#allocation4], 1 }

</bundles_post_ra>
